<compile_context>
chip_gen: v5e
topology: v5e:2x2
jax: 0.10.0
libtpu: 0.0.40
codegen_flags: <defaults>
</compile_context>

<pallas_src>
import functools

import jax
import jax.numpy as jnp
from jax.experimental import pallas as pl
from jax.experimental.pallas import tpu as pltpu

# ---------------- configuration (small, consistent with the module) ----------------
N_BLOCKS = 4       # must be even (mask stacked in (m, 1-m) pairs)
INPUT_SIZE = 16    # D
HIDDEN_SIZE = 32   # H
N_HIDDEN = 1       # number of (LeakyReLU, Linear(H,H)) hidden repeats
BATCH = 256        # demo batch
TILE_B = 128       # batch tile (rows per grid step)
OUT_W = 128        # lane-dense output slab width (z lanes 0..D-1, log_det lane D)

_LEAKY_SLOPE = 0.01  # PyTorch nn.LeakyReLU default


def _leaky_relu(x):
    return jnp.where(x > 0, x, _LEAKY_SLOPE * x)


# ----------------------------------- kernel -----------------------------------
def realnvp_fwd_kernel(mask_ref, w0_ref, b0_ref, wh_ref, bh_ref, wo_ref, bo_ref,
                       x_ref, out_ref):
    D = INPUT_SIZE
    z = x_ref[...].astype(jnp.float32)          # [TB, D]
    ld_acc = jnp.zeros_like(z)                  # [TB, D] deferred log_det accumulator

    # Only two alternating mask patterns exist: hoist them (and complements) once.
    m_pat = (mask_ref[0], mask_ref[1])          # each [1, D]
    im_pat = (1.0 - m_pat[0], 1.0 - m_pat[1])

    for i in reversed(range(N_BLOCKS)):         # unrolled at trace time (static i)
        m = m_pat[i % 2]
        one_m = im_pat[i % 2]
        z_ = m * z                              # only needed for the final "+ z_" term

        # Fused s/t MLP. The input mask is folded into w0 at build time, so the
        # first matmul consumes z directly. bf16 MXU operands, f32 accumulate.
        h = jnp.dot(z.astype(jnp.bfloat16), w0_ref[i],
                    preferred_element_type=jnp.float32) + b0_ref[i]           # [TB, 2H]
        for j in range(N_HIDDEN):
            h = _leaky_relu(h)
            h = jnp.dot(h.astype(jnp.bfloat16), wh_ref[i, j],
                        preferred_element_type=jnp.float32) + bh_ref[i, j]    # [TB, 2H]
        h = _leaky_relu(h)
        st = jnp.dot(h.astype(jnp.bfloat16), wo_ref[i],
                     preferred_element_type=jnp.float32) + bo_ref[i]          # [TB, 2D]

        s = jnp.tanh(st[:, :D])                 # s-half gets the final Tanh
        t = st[:, D:]                           # t-half is linear

        z = one_m * (z - t) * jnp.exp(-s) + z_
        ld_acc = ld_acc + one_m * s             # pure VPU; reduce once at the end

    log_det = -jnp.sum(ld_acc, axis=1, keepdims=True)        # [TB, 1] single XLU reduce
    pad = jnp.zeros((z.shape[0], OUT_W - D - 1), jnp.float32)
    out_ref[...] = jnp.concatenate([z, log_det, pad], axis=-1)  # lane-dense 128-wide store


# ----------------------------------- wrapper -----------------------------------
def realnvp_forward(x, mask, packed, *, tile_b=TILE_B):
    """x: [B, D] f32. mask: [n_blocks, 1, D] f32. packed: fused parameter dict."""
    B, D = x.shape
    assert D == INPUT_SIZE

    tb = tile_b if B >= tile_b else B
    n_tiles = pl.cdiv(B, tb)
    Bp = n_tiles * tb
    x_in = x if Bp == B else jnp.pad(x, ((0, Bp - B), (0, 0)))

    weights = (mask, packed["w0"], packed["b0"], packed["wh"], packed["bh"],
               packed["wo"], packed["bo"])

    def _const_spec(a):
        nd = a.ndim
        return pl.BlockSpec(a.shape, lambda i, _n=nd: (0,) * _n)  # VMEM-resident

    in_specs = [_const_spec(a) for a in weights] + [
        pl.BlockSpec((tb, D), lambda i: (i, 0))]
    out_spec = pl.BlockSpec((tb, OUT_W), lambda i: (i, 0))

    out = pl.pallas_call(
        realnvp_fwd_kernel,
        out_shape=jax.ShapeDtypeStruct((Bp, OUT_W), jnp.float32),
        grid=(n_tiles,),
        in_specs=in_specs,
        out_specs=out_spec,
        compiler_params=pltpu.CompilerParams(
            dimension_semantics=("parallel",),        # megacore-shard batch on v7x
            vmem_limit_bytes=32 * 1024 * 1024),
    )(*weights, x_in)

    z = out[:B, :D]
    log_det = out[:B, D]
    return z, log_det


# ---------------- deterministic parameter construction & packing ----------------
def make_params(key, n_blocks, d, h, n_hidden):
    ks = jax.random.split(key, 12)
    scale = 0.1

    def w(k, shape):
        return (scale * jax.random.normal(k, shape)).astype(jnp.float32)

    return {
        "s_w0": w(ks[0], (n_blocks, d, h)),
        "s_b0": w(ks[1], (n_blocks, 1, h)),
        "s_wh": w(ks[2], (n_blocks, n_hidden, h, h)),
        "s_bh": w(ks[3], (n_blocks, n_hidden, 1, h)),
        "s_wo": w(ks[4], (n_blocks, h, d)),
        "s_bo": w(ks[5], (n_blocks, 1, d)),
        "t_w0": w(ks[6], (n_blocks, d, h)),
        "t_b0": w(ks[7], (n_blocks, 1, h)),
        "t_wh": w(ks[8], (n_blocks, n_hidden, h, h)),
        "t_bh": w(ks[9], (n_blocks, n_hidden, 1, h)),
        "t_wo": w(ks[10], (n_blocks, h, d)),
        "t_bo": w(ks[11], (n_blocks, 1, d)),
    }


def make_mask(n_blocks, d):
    m = (jnp.arange(d) % 2).astype(jnp.float32)
    im = 1.0 - m
    mask = jnp.tile(jnp.stack([m, im]), (n_blocks // 2, 1))   # [n_blocks, D]
    return mask.reshape(n_blocks, 1, d)


def pack_params(raw, mask):
    """Fuse the s- and t-networks into one MLP and fold the input mask into w0."""
    # First layer: [nb, D, 2H]; mask folded in so the kernel can feed z directly.
    w0 = jnp.concatenate([raw["s_w0"], raw["t_w0"]], axis=-1)
    w0 = mask[:, 0, :, None] * w0
    b0 = jnp.concatenate([raw["s_b0"], raw["t_b0"]], axis=-1)            # [nb, 1, 2H]

    # Hidden layers: block-diagonal [nb, n_hidden, 2H, 2H].
    zh = jnp.zeros_like(raw["s_wh"])
    wh = jnp.concatenate(
        [jnp.concatenate([raw["s_wh"], zh], axis=-1),
         jnp.concatenate([zh, raw["t_wh"]], axis=-1)], axis=-2)
    bh = jnp.concatenate([raw["s_bh"], raw["t_bh"]], axis=-1)            # [nb, nh, 1, 2H]

    # Output layer: block-diagonal [nb, 2H, 2D].
    zo = jnp.zeros_like(raw["s_wo"])
    wo = jnp.concatenate(
        [jnp.concatenate([raw["s_wo"], zo], axis=-1),
         jnp.concatenate([zo, raw["t_wo"]], axis=-1)], axis=-2)
    bo = jnp.concatenate([raw["s_bo"], raw["t_bo"]], axis=-1)            # [nb, 1, 2D]

    return {
        "w0": w0.astype(jnp.bfloat16), "b0": b0.astype(jnp.float32),
        "wh": wh.astype(jnp.bfloat16), "bh": bh.astype(jnp.float32),
        "wo": wo.astype(jnp.bfloat16), "bo": bo.astype(jnp.float32),
    }


# ---------------- pure-JAX f32 reference (unfused) for verification ----------------
def reference_forward(x, mask, p):
    def mlp(z_, i, w0, b0, wh, bh, wo, bo, tanh):
        h = z_ @ p[w0][i] + p[b0][i]
        for j in range(N_HIDDEN):
            h = _leaky_relu(h)
            h = h @ p[wh][i, j] + p[bh][i, j]
        h = _leaky_relu(h)
        o = h @ p[wo][i] + p[bo][i]
        return jnp.tanh(o) if tanh else o

    z = x
    log_det = jnp.zeros((x.shape[0],), jnp.float32)
    for i in reversed(range(N_BLOCKS)):
        m = mask[i]            # [1, D]
        z_ = m * z
        s = mlp(z_, i, "s_w0", "s_b0", "s_wh", "s_bh", "s_wo", "s_bo", True)
        t = mlp(z_, i, "t_w0", "t_b0", "t_wh", "t_bh", "t_wo", "t_bo", False)
        z = (1.0 - m) * (z - t) * jnp.exp(-s) + z_
        log_det = log_det - ((1.0 - m) * s).sum(axis=1)
    return z, log_det


if __name__ == "__main__":
    key = jax.random.PRNGKey(0)
    k_x, k_p = jax.random.split(key)

    x = jax.random.normal(k_x, (BATCH, INPUT_SIZE), dtype=jnp.float32)
    mask = make_mask(N_BLOCKS, INPUT_SIZE)
    raw = make_params(k_p, N_BLOCKS, INPUT_SIZE, HIDDEN_SIZE, N_HIDDEN)
    packed = pack_params(raw, mask)

    fwd = jax.jit(functools.partial(realnvp_forward))
    z, log_det = fwd(x, mask, packed)
    jax.block_until_ready((z, log_det))

    z_ref, ld_ref = reference_forward(x, mask, raw)
    assert z.shape == (BATCH, INPUT_SIZE) and log_det.shape == (BATCH,)
    # bf16 MXU operands vs. f32 reference -> loosened tolerance.
    assert jnp.allclose(z, z_ref, atol=2e-2, rtol=2e-2)
    assert jnp.allclose(log_det, ld_ref, atol=2e-2, rtol=2e-2)

    print("KERNEL_OK")
</pallas_src>

<mosaic_0001>
module attributes {stable_mosaic.version = 11 : i64} {
  func.func @realnvp_fwd_kernel(%arg0: i32, %arg1: memref<4x1x16xf32, #tpu.memory_space<vmem>>, %arg2: memref<4x16x64xbf16, #tpu.memory_space<vmem>>, %arg3: memref<4x1x64xf32, #tpu.memory_space<vmem>>, %arg4: memref<4x1x64x64xbf16, #tpu.memory_space<vmem>>, %arg5: memref<4x1x1x64xf32, #tpu.memory_space<vmem>>, %arg6: memref<4x64x32xbf16, #tpu.memory_space<vmem>>, %arg7: memref<4x1x32xf32, #tpu.memory_space<vmem>>, %arg8: memref<128x16xf32, #tpu.memory_space<vmem>>, %arg9: memref<128x128xf32, #tpu.memory_space<vmem>>) attributes {dimension_semantics = [#tpu.dimension_semantics<parallel>], iteration_bounds = array<i64: 2>, scalar_prefetch = 0 : i64, scratch_operands = 0 : i64, tpu.core_type = #tpu.core_type<tc>, window_params = [{pipeline_mode = #tpu.pipeline_mode<synchronous>, transform_indices = @transform_0, window_bounds = array<i64: 4, 1, 16>}, {pipeline_mode = #tpu.pipeline_mode<synchronous>, transform_indices = @transform_1, window_bounds = array<i64: 4, 16, 64>}, {pipeline_mode = #tpu.pipeline_mode<synchronous>, transform_indices = @transform_2, window_bounds = array<i64: 4, 1, 64>}, {pipeline_mode = #tpu.pipeline_mode<synchronous>, transform_indices = @transform_3, window_bounds = array<i64: 4, 1, 64, 64>}, {pipeline_mode = #tpu.pipeline_mode<synchronous>, transform_indices = @transform_4, window_bounds = array<i64: 4, 1, 1, 64>}, {pipeline_mode = #tpu.pipeline_mode<synchronous>, transform_indices = @transform_5, window_bounds = array<i64: 4, 64, 32>}, {pipeline_mode = #tpu.pipeline_mode<synchronous>, transform_indices = @transform_6, window_bounds = array<i64: 4, 1, 32>}, {transform_indices = @transform_7, window_bounds = array<i64: 128, 16>}, {transform_indices = @transform_8, window_bounds = array<i64: 128, 128>}]} {
    %c0 = arith.constant 0 : index
    %c0_0 = arith.constant 0 : index
    %0 = vector.load %arg8[%c0, %c0_0] : memref<128x16xf32, #tpu.memory_space<vmem>>, vector<128x16xf32>
    %cst = arith.constant 0.000000e+00 : f32
    %1 = vector.broadcast %cst : f32 to vector<128x16xf32>
    %c0_1 = arith.constant 0 : index
    %c0_2 = arith.constant 0 : index
    %c0_3 = arith.constant 0 : index
    %2 = vector.load %arg1[%c0_1, %c0_2, %c0_3] : memref<4x1x16xf32, #tpu.memory_space<vmem>>, vector<1x1x16xf32>
    %3 = vector.shape_cast %2 : vector<1x1x16xf32> to vector<1x16xf32>
    %c1 = arith.constant 1 : index
    %c0_4 = arith.constant 0 : index
    %c0_5 = arith.constant 0 : index
    %4 = vector.load %arg1[%c1, %c0_4, %c0_5] : memref<4x1x16xf32, #tpu.memory_space<vmem>>, vector<1x1x16xf32>
    %5 = vector.shape_cast %4 : vector<1x1x16xf32> to vector<1x16xf32>
    %cst_6 = arith.constant 1.000000e+00 : f32
    %6 = vector.broadcast %cst_6 : f32 to vector<1x16xf32>
    %7 = arith.subf %6, %3 : vector<1x16xf32>
    %cst_7 = arith.constant 1.000000e+00 : f32
    %8 = vector.broadcast %cst_7 : f32 to vector<1x16xf32>
    %9 = arith.subf %8, %5 : vector<1x16xf32>
    %10 = vector.broadcast %5 : vector<1x16xf32> to vector<128x16xf32>
    %11 = arith.mulf %10, %0 : vector<128x16xf32>
    %12 = arith.truncf %0 : vector<128x16xf32> to vector<128x16xbf16>
    %c3 = arith.constant 3 : index
    %c0_8 = arith.constant 0 : index
    %c0_9 = arith.constant 0 : index
    %13 = vector.load %arg2[%c3, %c0_8, %c0_9] : memref<4x16x64xbf16, #tpu.memory_space<vmem>>, vector<1x16x64xbf16>
    %14 = vector.shape_cast %13 : vector<1x16x64xbf16> to vector<16x64xbf16>
    %cst_10 = arith.constant dense<0.000000e+00> : vector<128x64xf32>
    %15 = tpu.matmul %12, %14, %cst_10 {dimension_numbers = #tpu.dot_dimension_numbers<[1], [0], [0], [1], [0, 0, 1, 1], [], []>} : vector<128x16xbf16>, vector<16x64xbf16>, vector<128x64xf32> -> vector<128x64xf32>
    %c3_11 = arith.constant 3 : index
    %c0_12 = arith.constant 0 : index
    %c0_13 = arith.constant 0 : index
    %16 = vector.load %arg3[%c3_11, %c0_12, %c0_13] : memref<4x1x64xf32, #tpu.memory_space<vmem>>, vector<1x1x64xf32>
    %17 = vector.shape_cast %16 : vector<1x1x64xf32> to vector<1x64xf32>
    %18 = vector.broadcast %17 : vector<1x64xf32> to vector<128x64xf32>
    %19 = arith.addf %15, %18 : vector<128x64xf32>
    %cst_14 = arith.constant 0.000000e+00 : f32
    %20 = vector.broadcast %cst_14 : f32 to vector<128x64xf32>
    %21 = arith.cmpf ogt, %19, %20 : vector<128x64xf32>
    %cst_15 = arith.constant 0.00999999977 : f32
    %22 = vector.broadcast %cst_15 : f32 to vector<128x64xf32>
    %23 = arith.mulf %22, %19 : vector<128x64xf32>
    %24 = arith.select %21, %19, %23 : vector<128x64xi1>, vector<128x64xf32>
    %25 = arith.truncf %24 : vector<128x64xf32> to vector<128x64xbf16>
    %c3_16 = arith.constant 3 : index
    %c0_17 = arith.constant 0 : index
    %c0_18 = arith.constant 0 : index
    %c0_19 = arith.constant 0 : index
    %26 = vector.load %arg4[%c3_16, %c0_17, %c0_18, %c0_19] : memref<4x1x64x64xbf16, #tpu.memory_space<vmem>>, vector<1x1x64x64xbf16>
    %27 = vector.shape_cast %26 : vector<1x1x64x64xbf16> to vector<64x64xbf16>
    %cst_20 = arith.constant dense<0.000000e+00> : vector<128x64xf32>
    %28 = tpu.matmul %25, %27, %cst_20 {dimension_numbers = #tpu.dot_dimension_numbers<[1], [0], [0], [1], [0, 0, 1, 1], [], []>} : vector<128x64xbf16>, vector<64x64xbf16>, vector<128x64xf32> -> vector<128x64xf32>
    %c3_21 = arith.constant 3 : index
    %c0_22 = arith.constant 0 : index
    %c0_23 = arith.constant 0 : index
    %c0_24 = arith.constant 0 : index
    %29 = vector.load %arg5[%c3_21, %c0_22, %c0_23, %c0_24] : memref<4x1x1x64xf32, #tpu.memory_space<vmem>>, vector<1x1x1x64xf32>
    %30 = vector.shape_cast %29 : vector<1x1x1x64xf32> to vector<1x64xf32>
    %31 = vector.broadcast %30 : vector<1x64xf32> to vector<128x64xf32>
    %32 = arith.addf %28, %31 : vector<128x64xf32>
    %cst_25 = arith.constant 0.000000e+00 : f32
    %33 = vector.broadcast %cst_25 : f32 to vector<128x64xf32>
    %34 = arith.cmpf ogt, %32, %33 : vector<128x64xf32>
    %cst_26 = arith.constant 0.00999999977 : f32
    %35 = vector.broadcast %cst_26 : f32 to vector<128x64xf32>
    %36 = arith.mulf %35, %32 : vector<128x64xf32>
    %37 = arith.select %34, %32, %36 : vector<128x64xi1>, vector<128x64xf32>
    %38 = arith.truncf %37 : vector<128x64xf32> to vector<128x64xbf16>
    %c3_27 = arith.constant 3 : index
    %c0_28 = arith.constant 0 : index
    %c0_29 = arith.constant 0 : index
    %39 = vector.load %arg6[%c3_27, %c0_28, %c0_29] : memref<4x64x32xbf16, #tpu.memory_space<vmem>>, vector<1x64x32xbf16>
    %40 = vector.shape_cast %39 : vector<1x64x32xbf16> to vector<64x32xbf16>
    %cst_30 = arith.constant dense<0.000000e+00> : vector<128x32xf32>
    %41 = tpu.matmul %38, %40, %cst_30 {dimension_numbers = #tpu.dot_dimension_numbers<[1], [0], [0], [1], [0, 0, 1, 1], [], []>} : vector<128x64xbf16>, vector<64x32xbf16>, vector<128x32xf32> -> vector<128x32xf32>
    %c3_31 = arith.constant 3 : index
    %c0_32 = arith.constant 0 : index
    %c0_33 = arith.constant 0 : index
    %42 = vector.load %arg7[%c3_31, %c0_32, %c0_33] : memref<4x1x32xf32, #tpu.memory_space<vmem>>, vector<1x1x32xf32>
    %43 = vector.shape_cast %42 : vector<1x1x32xf32> to vector<1x32xf32>
    %44 = vector.broadcast %43 : vector<1x32xf32> to vector<128x32xf32>
    %45 = arith.addf %41, %44 : vector<128x32xf32>
    %46 = vector.extract_strided_slice %45 {offsets = [0, 0], sizes = [128, 16], strides = [1, 1]} : vector<128x32xf32> to vector<128x16xf32>
    %47 = math.tanh %46 : vector<128x16xf32>
    %48 = vector.extract_strided_slice %45 {offsets = [0, 16], sizes = [128, 16], strides = [1, 1]} : vector<128x32xf32> to vector<128x16xf32>
    %49 = arith.subf %0, %48 : vector<128x16xf32>
    %50 = vector.broadcast %9 : vector<1x16xf32> to vector<128x16xf32>
    %51 = arith.mulf %50, %49 : vector<128x16xf32>
    %cst_34 = arith.constant 0.000000e+00 : f32
    %52 = vector.broadcast %cst_34 : f32 to vector<128x16xf32>
    %53 = arith.subf %52, %47 : vector<128x16xf32>
    %54 = math.exp %53 : vector<128x16xf32>
    %55 = arith.mulf %51, %54 : vector<128x16xf32>
    %56 = arith.addf %55, %11 : vector<128x16xf32>
    %57 = vector.broadcast %9 : vector<1x16xf32> to vector<128x16xf32>
    %58 = arith.mulf %57, %47 : vector<128x16xf32>
    %59 = arith.addf %1, %58 : vector<128x16xf32>
    %60 = vector.broadcast %3 : vector<1x16xf32> to vector<128x16xf32>
    %61 = arith.mulf %60, %56 : vector<128x16xf32>
    %62 = arith.truncf %56 : vector<128x16xf32> to vector<128x16xbf16>
    %c2 = arith.constant 2 : index
    %c0_35 = arith.constant 0 : index
    %c0_36 = arith.constant 0 : index
    %63 = vector.load %arg2[%c2, %c0_35, %c0_36] : memref<4x16x64xbf16, #tpu.memory_space<vmem>>, vector<1x16x64xbf16>
    %64 = vector.shape_cast %63 : vector<1x16x64xbf16> to vector<16x64xbf16>
    %cst_37 = arith.constant dense<0.000000e+00> : vector<128x64xf32>
    %65 = tpu.matmul %62, %64, %cst_37 {dimension_numbers = #tpu.dot_dimension_numbers<[1], [0], [0], [1], [0, 0, 1, 1], [], []>} : vector<128x16xbf16>, vector<16x64xbf16>, vector<128x64xf32> -> vector<128x64xf32>
    %c2_38 = arith.constant 2 : index
    %c0_39 = arith.constant 0 : index
    %c0_40 = arith.constant 0 : index
    %66 = vector.load %arg3[%c2_38, %c0_39, %c0_40] : memref<4x1x64xf32, #tpu.memory_space<vmem>>, vector<1x1x64xf32>
    %67 = vector.shape_cast %66 : vector<1x1x64xf32> to vector<1x64xf32>
    %68 = vector.broadcast %67 : vector<1x64xf32> to vector<128x64xf32>
    %69 = arith.addf %65, %68 : vector<128x64xf32>
    %cst_41 = arith.constant 0.000000e+00 : f32
    %70 = vector.broadcast %cst_41 : f32 to vector<128x64xf32>
    %71 = arith.cmpf ogt, %69, %70 : vector<128x64xf32>
    %cst_42 = arith.constant 0.00999999977 : f32
    %72 = vector.broadcast %cst_42 : f32 to vector<128x64xf32>
    %73 = arith.mulf %72, %69 : vector<128x64xf32>
    %74 = arith.select %71, %69, %73 : vector<128x64xi1>, vector<128x64xf32>
    %75 = arith.truncf %74 : vector<128x64xf32> to vector<128x64xbf16>
    %c2_43 = arith.constant 2 : index
    %c0_44 = arith.constant 0 : index
    %c0_45 = arith.constant 0 : index
    %c0_46 = arith.constant 0 : index
    %76 = vector.load %arg4[%c2_43, %c0_44, %c0_45, %c0_46] : memref<4x1x64x64xbf16, #tpu.memory_space<vmem>>, vector<1x1x64x64xbf16>
    %77 = vector.shape_cast %76 : vector<1x1x64x64xbf16> to vector<64x64xbf16>
    %cst_47 = arith.constant dense<0.000000e+00> : vector<128x64xf32>
    %78 = tpu.matmul %75, %77, %cst_47 {dimension_numbers = #tpu.dot_dimension_numbers<[1], [0], [0], [1], [0, 0, 1, 1], [], []>} : vector<128x64xbf16>, vector<64x64xbf16>, vector<128x64xf32> -> vector<128x64xf32>
    %c2_48 = arith.constant 2 : index
    %c0_49 = arith.constant 0 : index
    %c0_50 = arith.constant 0 : index
    %c0_51 = arith.constant 0 : index
    %79 = vector.load %arg5[%c2_48, %c0_49, %c0_50, %c0_51] : memref<4x1x1x64xf32, #tpu.memory_space<vmem>>, vector<1x1x1x64xf32>
    %80 = vector.shape_cast %79 : vector<1x1x1x64xf32> to vector<1x64xf32>
    %81 = vector.broadcast %80 : vector<1x64xf32> to vector<128x64xf32>
    %82 = arith.addf %78, %81 : vector<128x64xf32>
    %cst_52 = arith.constant 0.000000e+00 : f32
    %83 = vector.broadcast %cst_52 : f32 to vector<128x64xf32>
    %84 = arith.cmpf ogt, %82, %83 : vector<128x64xf32>
    %cst_53 = arith.constant 0.00999999977 : f32
    %85 = vector.broadcast %cst_53 : f32 to vector<128x64xf32>
    %86 = arith.mulf %85, %82 : vector<128x64xf32>
    %87 = arith.select %84, %82, %86 : vector<128x64xi1>, vector<128x64xf32>
    %88 = arith.truncf %87 : vector<128x64xf32> to vector<128x64xbf16>
    %c2_54 = arith.constant 2 : index
    %c0_55 = arith.constant 0 : index
    %c0_56 = arith.constant 0 : index
    %89 = vector.load %arg6[%c2_54, %c0_55, %c0_56] : memref<4x64x32xbf16, #tpu.memory_space<vmem>>, vector<1x64x32xbf16>
    %90 = vector.shape_cast %89 : vector<1x64x32xbf16> to vector<64x32xbf16>
    %cst_57 = arith.constant dense<0.000000e+00> : vector<128x32xf32>
    %91 = tpu.matmul %88, %90, %cst_57 {dimension_numbers = #tpu.dot_dimension_numbers<[1], [0], [0], [1], [0, 0, 1, 1], [], []>} : vector<128x64xbf16>, vector<64x32xbf16>, vector<128x32xf32> -> vector<128x32xf32>
    %c2_58 = arith.constant 2 : index
    %c0_59 = arith.constant 0 : index
    %c0_60 = arith.constant 0 : index
    %92 = vector.load %arg7[%c2_58, %c0_59, %c0_60] : memref<4x1x32xf32, #tpu.memory_space<vmem>>, vector<1x1x32xf32>
    %93 = vector.shape_cast %92 : vector<1x1x32xf32> to vector<1x32xf32>
    %94 = vector.broadcast %93 : vector<1x32xf32> to vector<128x32xf32>
    %95 = arith.addf %91, %94 : vector<128x32xf32>
    %96 = vector.extract_strided_slice %95 {offsets = [0, 0], sizes = [128, 16], strides = [1, 1]} : vector<128x32xf32> to vector<128x16xf32>
    %97 = math.tanh %96 : vector<128x16xf32>
    %98 = vector.extract_strided_slice %95 {offsets = [0, 16], sizes = [128, 16], strides = [1, 1]} : vector<128x32xf32> to vector<128x16xf32>
    %99 = arith.subf %56, %98 : vector<128x16xf32>
    %100 = vector.broadcast %7 : vector<1x16xf32> to vector<128x16xf32>
    %101 = arith.mulf %100, %99 : vector<128x16xf32>
    %cst_61 = arith.constant 0.000000e+00 : f32
    %102 = vector.broadcast %cst_61 : f32 to vector<128x16xf32>
    %103 = arith.subf %102, %97 : vector<128x16xf32>
    %104 = math.exp %103 : vector<128x16xf32>
    %105 = arith.mulf %101, %104 : vector<128x16xf32>
    %106 = arith.addf %105, %61 : vector<128x16xf32>
    %107 = vector.broadcast %7 : vector<1x16xf32> to vector<128x16xf32>
    %108 = arith.mulf %107, %97 : vector<128x16xf32>
    %109 = arith.addf %59, %108 : vector<128x16xf32>
    %110 = vector.broadcast %5 : vector<1x16xf32> to vector<128x16xf32>
    %111 = arith.mulf %110, %106 : vector<128x16xf32>
    %112 = arith.truncf %106 : vector<128x16xf32> to vector<128x16xbf16>
    %c1_62 = arith.constant 1 : index
    %c0_63 = arith.constant 0 : index
    %c0_64 = arith.constant 0 : index
    %113 = vector.load %arg2[%c1_62, %c0_63, %c0_64] : memref<4x16x64xbf16, #tpu.memory_space<vmem>>, vector<1x16x64xbf16>
    %114 = vector.shape_cast %113 : vector<1x16x64xbf16> to vector<16x64xbf16>
    %cst_65 = arith.constant dense<0.000000e+00> : vector<128x64xf32>
    %115 = tpu.matmul %112, %114, %cst_65 {dimension_numbers = #tpu.dot_dimension_numbers<[1], [0], [0], [1], [0, 0, 1, 1], [], []>} : vector<128x16xbf16>, vector<16x64xbf16>, vector<128x64xf32> -> vector<128x64xf32>
    %c1_66 = arith.constant 1 : index
    %c0_67 = arith.constant 0 : index
    %c0_68 = arith.constant 0 : index
    %116 = vector.load %arg3[%c1_66, %c0_67, %c0_68] : memref<4x1x64xf32, #tpu.memory_space<vmem>>, vector<1x1x64xf32>
    %117 = vector.shape_cast %116 : vector<1x1x64xf32> to vector<1x64xf32>
    %118 = vector.broadcast %117 : vector<1x64xf32> to vector<128x64xf32>
    %119 = arith.addf %115, %118 : vector<128x64xf32>
    %cst_69 = arith.constant 0.000000e+00 : f32
    %120 = vector.broadcast %cst_69 : f32 to vector<128x64xf32>
    %121 = arith.cmpf ogt, %119, %120 : vector<128x64xf32>
    %cst_70 = arith.constant 0.00999999977 : f32
    %122 = vector.broadcast %cst_70 : f32 to vector<128x64xf32>
    %123 = arith.mulf %122, %119 : vector<128x64xf32>
    %124 = arith.select %121, %119, %123 : vector<128x64xi1>, vector<128x64xf32>
    %125 = arith.truncf %124 : vector<128x64xf32> to vector<128x64xbf16>
    %c1_71 = arith.constant 1 : index
    %c0_72 = arith.constant 0 : index
    %c0_73 = arith.constant 0 : index
    %c0_74 = arith.constant 0 : index
    %126 = vector.load %arg4[%c1_71, %c0_72, %c0_73, %c0_74] : memref<4x1x64x64xbf16, #tpu.memory_space<vmem>>, vector<1x1x64x64xbf16>
    %127 = vector.shape_cast %126 : vector<1x1x64x64xbf16> to vector<64x64xbf16>
    %cst_75 = arith.constant dense<0.000000e+00> : vector<128x64xf32>
    %128 = tpu.matmul %125, %127, %cst_75 {dimension_numbers = #tpu.dot_dimension_numbers<[1], [0], [0], [1], [0, 0, 1, 1], [], []>} : vector<128x64xbf16>, vector<64x64xbf16>, vector<128x64xf32> -> vector<128x64xf32>
    %c1_76 = arith.constant 1 : index
    %c0_77 = arith.constant 0 : index
    %c0_78 = arith.constant 0 : index
    %c0_79 = arith.constant 0 : index
    %129 = vector.load %arg5[%c1_76, %c0_77, %c0_78, %c0_79] : memref<4x1x1x64xf32, #tpu.memory_space<vmem>>, vector<1x1x1x64xf32>
    %130 = vector.shape_cast %129 : vector<1x1x1x64xf32> to vector<1x64xf32>
    %131 = vector.broadcast %130 : vector<1x64xf32> to vector<128x64xf32>
    %132 = arith.addf %128, %131 : vector<128x64xf32>
    %cst_80 = arith.constant 0.000000e+00 : f32
    %133 = vector.broadcast %cst_80 : f32 to vector<128x64xf32>
    %134 = arith.cmpf ogt, %132, %133 : vector<128x64xf32>
    %cst_81 = arith.constant 0.00999999977 : f32
    %135 = vector.broadcast %cst_81 : f32 to vector<128x64xf32>
    %136 = arith.mulf %135, %132 : vector<128x64xf32>
    %137 = arith.select %134, %132, %136 : vector<128x64xi1>, vector<128x64xf32>
    %138 = arith.truncf %137 : vector<128x64xf32> to vector<128x64xbf16>
    %c1_82 = arith.constant 1 : index
    %c0_83 = arith.constant 0 : index
    %c0_84 = arith.constant 0 : index
    %139 = vector.load %arg6[%c1_82, %c0_83, %c0_84] : memref<4x64x32xbf16, #tpu.memory_space<vmem>>, vector<1x64x32xbf16>
    %140 = vector.shape_cast %139 : vector<1x64x32xbf16> to vector<64x32xbf16>
    %cst_85 = arith.constant dense<0.000000e+00> : vector<128x32xf32>
    %141 = tpu.matmul %138, %140, %cst_85 {dimension_numbers = #tpu.dot_dimension_numbers<[1], [0], [0], [1], [0, 0, 1, 1], [], []>} : vector<128x64xbf16>, vector<64x32xbf16>, vector<128x32xf32> -> vector<128x32xf32>
    %c1_86 = arith.constant 1 : index
    %c0_87 = arith.constant 0 : index
    %c0_88 = arith.constant 0 : index
    %142 = vector.load %arg7[%c1_86, %c0_87, %c0_88] : memref<4x1x32xf32, #tpu.memory_space<vmem>>, vector<1x1x32xf32>
    %143 = vector.shape_cast %142 : vector<1x1x32xf32> to vector<1x32xf32>
    %144 = vector.broadcast %143 : vector<1x32xf32> to vector<128x32xf32>
    %145 = arith.addf %141, %144 : vector<128x32xf32>
    %146 = vector.extract_strided_slice %145 {offsets = [0, 0], sizes = [128, 16], strides = [1, 1]} : vector<128x32xf32> to vector<128x16xf32>
    %147 = math.tanh %146 : vector<128x16xf32>
    %148 = vector.extract_strided_slice %145 {offsets = [0, 16], sizes = [128, 16], strides = [1, 1]} : vector<128x32xf32> to vector<128x16xf32>
    %149 = arith.subf %106, %148 : vector<128x16xf32>
    %150 = vector.broadcast %9 : vector<1x16xf32> to vector<128x16xf32>
    %151 = arith.mulf %150, %149 : vector<128x16xf32>
    %cst_89 = arith.constant 0.000000e+00 : f32
    %152 = vector.broadcast %cst_89 : f32 to vector<128x16xf32>
    %153 = arith.subf %152, %147 : vector<128x16xf32>
    %154 = math.exp %153 : vector<128x16xf32>
    %155 = arith.mulf %151, %154 : vector<128x16xf32>
    %156 = arith.addf %155, %111 : vector<128x16xf32>
    %157 = vector.broadcast %9 : vector<1x16xf32> to vector<128x16xf32>
    %158 = arith.mulf %157, %147 : vector<128x16xf32>
    %159 = arith.addf %109, %158 : vector<128x16xf32>
    %160 = vector.broadcast %3 : vector<1x16xf32> to vector<128x16xf32>
    %161 = arith.mulf %160, %156 : vector<128x16xf32>
    %162 = arith.truncf %156 : vector<128x16xf32> to vector<128x16xbf16>
    %c0_90 = arith.constant 0 : index
    %c0_91 = arith.constant 0 : index
    %c0_92 = arith.constant 0 : index
    %163 = vector.load %arg2[%c0_90, %c0_91, %c0_92] : memref<4x16x64xbf16, #tpu.memory_space<vmem>>, vector<1x16x64xbf16>
    %164 = vector.shape_cast %163 : vector<1x16x64xbf16> to vector<16x64xbf16>
    %cst_93 = arith.constant dense<0.000000e+00> : vector<128x64xf32>
    %165 = tpu.matmul %162, %164, %cst_93 {dimension_numbers = #tpu.dot_dimension_numbers<[1], [0], [0], [1], [0, 0, 1, 1], [], []>} : vector<128x16xbf16>, vector<16x64xbf16>, vector<128x64xf32> -> vector<128x64xf32>
    %c0_94 = arith.constant 0 : index
    %c0_95 = arith.constant 0 : index
    %c0_96 = arith.constant 0 : index
    %166 = vector.load %arg3[%c0_94, %c0_95, %c0_96] : memref<4x1x64xf32, #tpu.memory_space<vmem>>, vector<1x1x64xf32>
    %167 = vector.shape_cast %166 : vector<1x1x64xf32> to vector<1x64xf32>
    %168 = vector.broadcast %167 : vector<1x64xf32> to vector<128x64xf32>
    %169 = arith.addf %165, %168 : vector<128x64xf32>
    %cst_97 = arith.constant 0.000000e+00 : f32
    %170 = vector.broadcast %cst_97 : f32 to vector<128x64xf32>
    %171 = arith.cmpf ogt, %169, %170 : vector<128x64xf32>
    %cst_98 = arith.constant 0.00999999977 : f32
    %172 = vector.broadcast %cst_98 : f32 to vector<128x64xf32>
    %173 = arith.mulf %172, %169 : vector<128x64xf32>
    %174 = arith.select %171, %169, %173 : vector<128x64xi1>, vector<128x64xf32>
    %175 = arith.truncf %174 : vector<128x64xf32> to vector<128x64xbf16>
    %c0_99 = arith.constant 0 : index
    %c0_100 = arith.constant 0 : index
    %c0_101 = arith.constant 0 : index
    %c0_102 = arith.constant 0 : index
    %176 = vector.load %arg4[%c0_99, %c0_100, %c0_101, %c0_102] : memref<4x1x64x64xbf16, #tpu.memory_space<vmem>>, vector<1x1x64x64xbf16>
    %177 = vector.shape_cast %176 : vector<1x1x64x64xbf16> to vector<64x64xbf16>
    %cst_103 = arith.constant dense<0.000000e+00> : vector<128x64xf32>
    %178 = tpu.matmul %175, %177, %cst_103 {dimension_numbers = #tpu.dot_dimension_numbers<[1], [0], [0], [1], [0, 0, 1, 1], [], []>} : vector<128x64xbf16>, vector<64x64xbf16>, vector<128x64xf32> -> vector<128x64xf32>
    %c0_104 = arith.constant 0 : index
    %c0_105 = arith.constant 0 : index
    %c0_106 = arith.constant 0 : index
    %c0_107 = arith.constant 0 : index
    %179 = vector.load %arg5[%c0_104, %c0_105, %c0_106, %c0_107] : memref<4x1x1x64xf32, #tpu.memory_space<vmem>>, vector<1x1x1x64xf32>
    %180 = vector.shape_cast %179 : vector<1x1x1x64xf32> to vector<1x64xf32>
    %181 = vector.broadcast %180 : vector<1x64xf32> to vector<128x64xf32>
    %182 = arith.addf %178, %181 : vector<128x64xf32>
    %cst_108 = arith.constant 0.000000e+00 : f32
    %183 = vector.broadcast %cst_108 : f32 to vector<128x64xf32>
    %184 = arith.cmpf ogt, %182, %183 : vector<128x64xf32>
    %cst_109 = arith.constant 0.00999999977 : f32
    %185 = vector.broadcast %cst_109 : f32 to vector<128x64xf32>
    %186 = arith.mulf %185, %182 : vector<128x64xf32>
    %187 = arith.select %184, %182, %186 : vector<128x64xi1>, vector<128x64xf32>
    %188 = arith.truncf %187 : vector<128x64xf32> to vector<128x64xbf16>
    %c0_110 = arith.constant 0 : index
    %c0_111 = arith.constant 0 : index
    %c0_112 = arith.constant 0 : index
    %189 = vector.load %arg6[%c0_110, %c0_111, %c0_112] : memref<4x64x32xbf16, #tpu.memory_space<vmem>>, vector<1x64x32xbf16>
    %190 = vector.shape_cast %189 : vector<1x64x32xbf16> to vector<64x32xbf16>
    %cst_113 = arith.constant dense<0.000000e+00> : vector<128x32xf32>
    %191 = tpu.matmul %188, %190, %cst_113 {dimension_numbers = #tpu.dot_dimension_numbers<[1], [0], [0], [1], [0, 0, 1, 1], [], []>} : vector<128x64xbf16>, vector<64x32xbf16>, vector<128x32xf32> -> vector<128x32xf32>
    %c0_114 = arith.constant 0 : index
    %c0_115 = arith.constant 0 : index
    %c0_116 = arith.constant 0 : index
    %192 = vector.load %arg7[%c0_114, %c0_115, %c0_116] : memref<4x1x32xf32, #tpu.memory_space<vmem>>, vector<1x1x32xf32>
    %193 = vector.shape_cast %192 : vector<1x1x32xf32> to vector<1x32xf32>
    %194 = vector.broadcast %193 : vector<1x32xf32> to vector<128x32xf32>
    %195 = arith.addf %191, %194 : vector<128x32xf32>
    %196 = vector.extract_strided_slice %195 {offsets = [0, 0], sizes = [128, 16], strides = [1, 1]} : vector<128x32xf32> to vector<128x16xf32>
    %197 = math.tanh %196 : vector<128x16xf32>
    %198 = vector.extract_strided_slice %195 {offsets = [0, 16], sizes = [128, 16], strides = [1, 1]} : vector<128x32xf32> to vector<128x16xf32>
    %199 = arith.subf %156, %198 : vector<128x16xf32>
    %200 = vector.broadcast %7 : vector<1x16xf32> to vector<128x16xf32>
    %201 = arith.mulf %200, %199 : vector<128x16xf32>
    %cst_117 = arith.constant 0.000000e+00 : f32
    %202 = vector.broadcast %cst_117 : f32 to vector<128x16xf32>
    %203 = arith.subf %202, %197 : vector<128x16xf32>
    %204 = math.exp %203 : vector<128x16xf32>
    %205 = arith.mulf %201, %204 : vector<128x16xf32>
    %206 = arith.addf %205, %161 : vector<128x16xf32>
    %207 = vector.broadcast %7 : vector<1x16xf32> to vector<128x16xf32>
    %208 = arith.mulf %207, %197 : vector<128x16xf32>
    %209 = arith.addf %159, %208 : vector<128x16xf32>
    %cst_118 = arith.constant dense<0.000000e+00> : vector<128xf32>
    %210 = vector.multi_reduction <add>, %209, %cst_118 [1] : vector<128x16xf32> to vector<128xf32>
    %211 = vector.shape_cast %210 : vector<128xf32> to vector<128x1xf32>
    %cst_119 = arith.constant 0.000000e+00 : f32
    %212 = vector.broadcast %cst_119 : f32 to vector<128x1xf32>
    %213 = arith.subf %212, %211 : vector<128x1xf32>
    %cst_120 = arith.constant 0.000000e+00 : f32
    %214 = vector.broadcast %cst_120 : f32 to vector<128x111xf32>
    %215 = tpu.concatenate %206, %213, %214 in 1 : vector<128x16xf32>, vector<128x1xf32>, vector<128x111xf32> -> vector<128x128xf32>
    %c0_121 = arith.constant 0 : index
    %c0_122 = arith.constant 0 : index
    %216 = vector.load %arg9[%c0_121, %c0_122] : memref<128x128xf32, #tpu.memory_space<vmem>>, vector<128x128xf32>
    tpu.vector_store %arg9[%c0_121, %c0_122], %215 {strides = array<i32>} : memref<128x128xf32, #tpu.memory_space<vmem>>, vector<128x128xf32>,
    return
  }
  func.func @transform_0(%arg0: i32) -> (i32, i32, i32) {
    %c0_i32 = arith.constant 0 : i32
    %c0_i32_0 = arith.constant 0 : i32
    %c0_i32_1 = arith.constant 0 : i32
    %c0_i32_2 = arith.constant 0 : i32
    return %c0_i32, %c0_i32_0, %c0_i32_1 : i32, i32, i32
  }
  func.func @transform_1(%arg0: i32) -> (i32, i32, i32) {
    %c0_i32 = arith.constant 0 : i32
    %c0_i32_0 = arith.constant 0 : i32
    %c0_i32_1 = arith.constant 0 : i32
    %c0_i32_2 = arith.constant 0 : i32
    return %c0_i32, %c0_i32_0, %c0_i32_1 : i32, i32, i32
  }
  func.func @transform_2(%arg0: i32) -> (i32, i32, i32) {
    %c0_i32 = arith.constant 0 : i32
    %c0_i32_0 = arith.constant 0 : i32
    %c0_i32_1 = arith.constant 0 : i32
    %c0_i32_2 = arith.constant 0 : i32
    return %c0_i32, %c0_i32_0, %c0_i32_1 : i32, i32, i32
  }
  func.func @transform_3(%arg0: i32) -> (i32, i32, i32, i32) {
    %c0_i32 = arith.constant 0 : i32
    %c0_i32_0 = arith.constant 0 : i32
    %c0_i32_1 = arith.constant 0 : i32
    %c0_i32_2 = arith.constant 0 : i32
    %c0_i32_3 = arith.constant 0 : i32
    return %c0_i32, %c0_i32_0, %c0_i32_1, %c0_i32_2 : i32, i32, i32, i32
  }
  func.func @transform_4(%arg0: i32) -> (i32, i32, i32, i32) {
    %c0_i32 = arith.constant 0 : i32
    %c0_i32_0 = arith.constant 0 : i32
    %c0_i32_1 = arith.constant 0 : i32
    %c0_i32_2 = arith.constant 0 : i32
    %c0_i32_3 = arith.constant 0 : i32
    return %c0_i32, %c0_i32_0, %c0_i32_1, %c0_i32_2 : i32, i32, i32, i32
  }
  func.func @transform_5(%arg0: i32) -> (i32, i32, i32) {
    %c0_i32 = arith.constant 0 : i32
    %c0_i32_0 = arith.constant 0 : i32
    %c0_i32_1 = arith.constant 0 : i32
    %c0_i32_2 = arith.constant 0 : i32
    return %c0_i32, %c0_i32_0, %c0_i32_1 : i32, i32, i32
  }
  func.func @transform_6(%arg0: i32) -> (i32, i32, i32) {
    %c0_i32 = arith.constant 0 : i32
    %c0_i32_0 = arith.constant 0 : i32
    %c0_i32_1 = arith.constant 0 : i32
    %c0_i32_2 = arith.constant 0 : i32
    return %c0_i32, %c0_i32_0, %c0_i32_1 : i32, i32, i32
  }
  func.func @transform_7(%arg0: i32) -> (i32, i32) {
    %c0_i32 = arith.constant 0 : i32
    %c0_i32_0 = arith.constant 0 : i32
    return %arg0, %c0_i32 : i32, i32
  }
  func.func @transform_8(%arg0: i32) -> (i32, i32) {
    %c0_i32 = arith.constant 0 : i32
    %c0_i32_0 = arith.constant 0 : i32
    return %arg0, %c0_i32 : i32, i32
  }
}

</mosaic_0001>

<bundles_post_ra>
// kernel: realnvp_forward.1
= control target key start
LH: loop header
LB: loop body
LE: loop exit
PB: predicated region body
PF: predicated region fallthrough
CT: control target
= control target key end

     0   :  { %s3870_s27 = smov 0   ;;  %s5442_s0 = inlined_call_operand.vmem [shape: f32[4,1,16], index: 0, kind: input, shape index: {}]   ;;  %s5443_s1 = inlined_call_operand.vmem [shape: bf16[4,16,64], index: 1, kind: input, shape index: {}]   ;;  %s5444_s2 = inlined_call_operand.vmem [shape: f32[4,1,64], index: 2, kind: input, shape index: {}]   ;;  %s5445_s3 = inlined_call_operand.vmem [shape: bf16[4,1,64,64], index: 3, kind: input, shape index: {}]   ;;  %s5446_s4 = inlined_call_operand.vmem [shape: f32[4,1,1,64], index: 4, kind: input, shape index: {}]   ;;  %s5447_s5 = inlined_call_operand.vmem [shape: bf16[4,64,32], index: 5, kind: input, shape index: {}]   ;;  %s5448_s6 = inlined_call_operand.vmem [shape: f32[4,1,32], index: 6, kind: input, shape index: {}]   ;;  %s5449_s7 = inlined_call_operand.vmem [shape: f32[256,16], index: 7, kind: input, shape index: {}]   ;;  %s5450_s8 = inlined_call_operand.vmem [shape: f32[256,128], index: 8, kind: output, shape index: {}]  }
   0x1 LB: > { %s3184_s28 = sadd.s32 4294967295, %s3822_s27   ;;  %p3188_p0 = scmp.ge.s32.totalorder %s3822_s27, 1  ;;  %s3822_s27 = sphi %s3870_s27, %s18_s27  }
   0x2   : > { %p263_p1 = scmp.lt.s32.totalorder %s3822_s27, 3 }
   0x4   : > { %p264_p2 = pnand %p3188_p0, %p263_p1 }
   0x5   : > { %s3189_s9 = sshll.u32 (!%p264_p2), %s3184_s28, 4  ;;  %s3824_s17 = smov (!%p264_p2), 112  }
   0x6   : > { %267 = sbr.rel (%p264_p2) target bundleno = 2530 (0x9e2), region = 52  ;;  %p298_p3 = scmp.lt.s32.totalorder (!%p264_p2), %s3189_s9, 31 }
   0xb   : > { %v3499_v0 = vld [vmem:[%s5443_s1 + $0x18] sm:$0xff]  ;;  %s5452_s9 = smov (!%p298_p3, %s3189_s9), 31  ;;  %vm372_vm0 = vcmask 130048   ;;  %v3502_v23 = vld [vmem:[%s5445_s3 + $0x70] sm:$0xff]  ;;  %v3501_v24 = vld [vmem:[%s5445_s3 + $0x68] sm:$0xff]  ;;  %vm540_vm3 = vcmask 523264  }
   0xc   : > { %404 = vmatpush.bf16.msra.mxu0 %v3499_v0  ;;  %s3190_s10 = sshll.u32 %s5452_s9, 3  ;;  %v3503_v22 = vld [vmem:[%s5445_s3 + $0x78] sm:$0xff]  ;;  %v3500_v25 = vld [vmem:[%s5445_s3 + $0x60] sm:$0xff] }
   0xd   : > { %s3889_s13 = scalar_lea.vmem %s5449_s7, %s3190_s10  ;;  %569 = vmatpush.bf16.msra.mxu1 %v3503_v22  ;;  %v3978_v30 = vld [vmem:[%s5444_s2 + $0x3] ss:$0 sm:$0xff] }
   0xe   : > { %v3892_v1 = vld [vmem:[%s3889_s13] sm:$0xff]  ;;  %v3895_v2 = vld [vmem:[%s3889_s13 + $0x8] sm:$0xff]  ;;  %v3901_v4 = vld [vmem:[%s3889_s13 + $0x10] sm:$0xff] }
   0xf   : > { %v350_v3 = vpack.c.bf16 %v3895_v2, %v3892_v1  ;;  %v3904_v5 = vld [vmem:[%s3889_s13 + $0x18] sm:$0xff]  ;;  %v3910_v7 = vld [vmem:[%s3889_s13 + $0x20] sm:$0xff]  ;;  %v3913_v8 = vld [vmem:[%s3889_s13 + $0x28] sm:$0xff] }
  0x10   : > { %v351_v6 = vpack.c.bf16 %v3904_v5, %v3901_v4  ;;  %v352_v9 = vpack.c.bf16 %v3913_v8, %v3910_v7  ;;  %v3919_v10 = vld [vmem:[%s3889_s13 + $0x30] sm:$0xff]  ;;  %v3922_v11 = vld [vmem:[%s3889_s13 + $0x38] sm:$0xff]  ;;  %v3928_v13 = vld [vmem:[%s3889_s13 + $0x40] sm:$0xff] }
  0x11   : > { %3201 = vmatmul.msk.bf16.vlgmr.msra.gmra.mxu0 %vm372_vm0, %v350_v3  ;;  %v353_v12 = vpack.c.bf16 %v3922_v11, %v3919_v10  ;;  %v3931_v14 = vld [vmem:[%s3889_s13 + $0x48] sm:$0xff]  ;;  %v3937_v16 = vld [vmem:[%s3889_s13 + $0x50] sm:$0xff]  ;;  %v3940_v17 = vld [vmem:[%s3889_s13 + $0x58] sm:$0xff]  ;;  %570 = vmatpush.bf16.msra.mxu1 %v3502_v23 }
  0x12   : > { %v354_v15 = vpack.c.bf16 %v3931_v14, %v3928_v13  ;;  %v355_v18 = vpack.c.bf16 %v3940_v17, %v3937_v16  ;;  %v3946_v19 = vld [vmem:[%s3889_s13 + $0x60] sm:$0xff]  ;;  %v3949_v20 = vld [vmem:[%s3889_s13 + $0x68] sm:$0xff]  ;;  %v3967_v26 = vld [vmem:[%s3889_s13 + $0x70] sm:$0xff] }
  0x13   : > { %v356_v21 = vpack.c.bf16 %v3949_v20, %v3946_v19  ;;  %v3970_v27 = vld [vmem:[%s3889_s13 + $0x78] sm:$0xff]  ;;  %s5253_s13 = scalar_lea.vmem %s5450_s8, %s3190_s10 }
  0x14   : > { %v357_v28 = vpack.c.bf16 %v3970_v27, %v3967_v26 }
  0x15   : > { %571 = vmatpush.bf16.msra.mxu1 %v3501_v24 }
  0x19   : > { %572 = vmatpush.bf16.msra.mxu1 %v3500_v25 }
  0x21   : > { %3202 = vmatmul.msk.bf16.gmra.mxu0 %vm372_vm0, %v351_v6 }
  0x31   : > { %3203 = vmatmul.msk.bf16.gmra.mxu0 %vm372_vm0, %v352_v9 }
  0x41   : > { %3204 = vmatmul.msk.bf16.gmra.mxu0 %vm372_vm0, %v353_v12 }
  0x51   : > { %3205 = vmatmul.msk.bf16.gmra.mxu0 %vm372_vm0, %v354_v15 }
  0x61   : > { %3206 = vmatmul.msk.bf16.gmra.mxu0 %vm372_vm0, %v355_v18 }
  0x71   : > { %3207 = vmatmul.msk.bf16.gmra.mxu0 %vm372_vm0, %v356_v21 }
  0x81   : > { %3208 = vmatmul.msk.bf16.gmra.mxu0 %vm372_vm0, %v357_v28 }
  0x8e   : > { %v406_v29 = vpop.f32.mrf.mxu0 }
  0x8f   : > { %v407_v31 = vadd.f32 %v3978_v30, %v406_v29 }
  0x91   : > { %v462_v33 = vmul.f32 0.01, %v407_v31  ;;  %vm446_vm1 = vcmp.gt.f32.partialorder %v407_v31, 0.0 }
  0x93   : > { %v478_v36 = vsel %vm446_vm1, %v407_v31, %v462_v33 }
  0x96   : > { %v408_v32 = vpop.f32.mrf.mxu0 }
  0x97   : > { %v409_v34 = vadd.f32 %v3978_v30, %v408_v32 }
  0x99   : > { %vm447_vm2 = vcmp.gt.f32.partialorder %v409_v34, 0.0  ;;  %v463_v35 = vmul.f32 0.01, %v409_v34 }
  0x9b   : > { %v479_v37 = vsel %vm447_vm2, %v409_v34, %v463_v35 }
  0x9c   : > { %v494_v38 = vpack.c.bf16 %v479_v37, %v478_v36 }
  0x9e   : > { %v411_v39 = vpop.f32.mrf.mxu0  ;;  %3234 = vmatmul.msk.bf16.vlgmr.msra.gmra.mxu1 %vm540_vm3, %v494_v38 }
  0x9f   : > { %v412_v40 = vadd.f32 %v3978_v30, %v411_v39 }
  0xa1   : > { %v464_v42 = vmul.f32 0.01, %v412_v40  ;;  %vm448_vm4 = vcmp.gt.f32.partialorder %v412_v40, 0.0 }
  0xa3   : > { %v480_v45 = vsel %vm448_vm4, %v412_v40, %v464_v42 }
  0xa6   : > { %v413_v41 = vpop.f32.mrf.mxu0 }
  0xa7   : > { %v414_v43 = vadd.f32 %v3978_v30, %v413_v41 }
  0xa9   : > { %vm449_vm5 = vcmp.gt.f32.partialorder %v414_v43, 0.0  ;;  %v465_v44 = vmul.f32 0.01, %v414_v43 }
  0xab   : > { %v481_v46 = vsel %vm449_vm5, %v414_v43, %v465_v44  ;;  %v3507_v44 = vld [vmem:[%s5447_s5 + $0x78] sm:$0xff] }
  0xac   : > { %v495_v47 = vpack.c.bf16 %v481_v46, %v480_v45  ;;  %736 = vmatpush.bf16.msra.mxu2 %v3507_v44 }
  0xae   : > { %v416_v48 = vpop.f32.mrf.mxu0  ;;  %3235 = vmatmul.msk.bf16.gmra.mxu1 %vm540_vm3, %v495_v47 }
  0xaf   : > { %v417_v49 = vadd.f32 %v3978_v30, %v416_v48  ;;  %v3506_v48 = vld [vmem:[%s5447_s5 + $0x70] sm:$0xff] }
  0xb0   : > { %737 = vmatpush.bf16.msra.mxu2 %v3506_v48 }
  0xb1   : > { %v466_v50 = vmul.f32 0.01, %v417_v49  ;;  %vm450_vm6 = vcmp.gt.f32.partialorder %v417_v49, 0.0 }
  0xb3   : > { %v482_v54 = vsel %vm450_vm6, %v417_v49, %v466_v50  ;;  %v3505_v50 = vld [vmem:[%s5447_s5 + $0x68] sm:$0xff] }
  0xb4   : > { %738 = vmatpush.bf16.msra.mxu2 %v3505_v50 }
  0xb6   : > { %v418_v51 = vpop.f32.mrf.mxu0 }
  0xb7   : > { %v419_v52 = vadd.f32 %v3978_v30, %v418_v51 }
  0xb9   : > { %vm451_vm7 = vcmp.gt.f32.partialorder %v419_v52, 0.0  ;;  %v467_v53 = vmul.f32 0.01, %v419_v52 }
  0xbb   : > { %v483_v55 = vsel %vm451_vm7, %v419_v52, %v467_v53  ;;  %v3504_v53 = vld [vmem:[%s5447_s5 + $0x60] sm:$0xff] }
  0xbc   : > { %v496_v56 = vpack.c.bf16 %v483_v55, %v482_v54  ;;  %739 = vmatpush.bf16.msra.mxu2 %v3504_v53 }
  0xbe   : > { %v421_v57 = vpop.f32.mrf.mxu0  ;;  %3236 = vmatmul.msk.bf16.gmra.mxu1 %vm540_vm3, %v496_v56 }
  0xbf   : > { %v422_v58 = vadd.f32 %v3978_v30, %v421_v57 }
  0xc1   : > { %v468_v59 = vmul.f32 0.01, %v422_v58  ;;  %vm452_vm8 = vcmp.gt.f32.partialorder %v422_v58, 0.0 }
  0xc3   : > { %v484_v63 = vsel %vm452_vm8, %v422_v58, %v468_v59 }
  0xc6   : > { %v423_v60 = vpop.f32.mrf.mxu0 }
  0xc7   : > { %v424_v61 = vadd.f32 %v3978_v30, %v423_v60  ;;  %v4019_v60 = vld [vmem:[%s5446_s4 + $0x3] ss:$0 sm:$0xff] }
  0xc9   : > { %vm453_vm9 = vcmp.gt.f32.partialorder %v424_v61, 0.0  ;;  %v469_v62 = vmul.f32 0.01, %v424_v61 }
  0xcb   : > { %v485_v0 = vsel %vm453_vm9, %v424_v61, %v469_v62 }
  0xcc   : > { %v497_v3 = vpack.c.bf16 %v485_v0, %v484_v63 }
  0xce   : > { %v426_v6 = vpop.f32.mrf.mxu0  ;;  %3237 = vmatmul.msk.bf16.gmra.mxu1 %vm540_vm3, %v497_v3 }
  0xcf   : > { %v427_v9 = vadd.f32 %v3978_v30, %v426_v6 }
  0xd1   : > { %v470_v12 = vmul.f32 0.01, %v427_v9  ;;  %vm454_vm10 = vcmp.gt.f32.partialorder %v427_v9, 0.0 }
  0xd3   : > { %v486_v22 = vsel %vm454_vm10, %v427_v9, %v470_v12 }
  0xd6   : > { %v428_v15 = vpop.f32.mrf.mxu0 }
  0xd7   : > { %v429_v18 = vadd.f32 %v3978_v30, %v428_v15 }
  0xd9   : > { %vm455_vm11 = vcmp.gt.f32.partialorder %v429_v18, 0.0  ;;  %v471_v21 = vmul.f32 0.01, %v429_v18 }
  0xdb   : > { %v487_v23 = vsel %vm455_vm11, %v429_v18, %v471_v21 }
  0xdc   : > { %v498_v24 = vpack.c.bf16 %v487_v23, %v486_v22 }
  0xde   : > { %v431_v25 = vpop.f32.mrf.mxu0  ;;  %3238 = vmatmul.msk.bf16.gmra.mxu1 %vm540_vm3, %v498_v24 }
  0xdf   : > { %v432_v28 = vadd.f32 %v3978_v30, %v431_v25 }
  0xe1   : > { %v472_v29 = vmul.f32 0.01, %v432_v28  ;;  %vm456_vm12 = vcmp.gt.f32.partialorder %v432_v28, 0.0 }
  0xe3   : > { %v488_v34 = vsel %vm456_vm12, %v432_v28, %v472_v29 }
  0xe6   : > { %v433_v31 = vpop.f32.mrf.mxu0 }
  0xe7   : > { %v434_v32 = vadd.f32 %v3978_v30, %v433_v31 }
  0xe9   : > { %vm457_vm13 = vcmp.gt.f32.partialorder %v434_v32, 0.0  ;;  %v473_v33 = vmul.f32 0.01, %v434_v32 }
  0xeb   : > { %v489_v35 = vsel %vm457_vm13, %v434_v32, %v473_v33 }
  0xec   : > { %v499_v36 = vpack.c.bf16 %v489_v35, %v488_v34 }
  0xee   : > { %v436_v37 = vpop.f32.mrf.mxu0  ;;  %3239 = vmatmul.msk.bf16.gmra.mxu1 %vm540_vm3, %v499_v36 }
  0xef   : > { %v437_v38 = vadd.f32 %v3978_v30, %v436_v37 }
  0xf1   : > { %v474_v39 = vmul.f32 0.01, %v437_v38  ;;  %vm458_vm14 = vcmp.gt.f32.partialorder %v437_v38, 0.0 }
  0xf3   : > { %v490_v43 = vsel %vm458_vm14, %v437_v38, %v474_v39 }
  0xf6   : > { %v438_v40 = vpop.f32.mrf.mxu0 }
  0xf7   : > { %v439_v41 = vadd.f32 %v3978_v30, %v438_v40 }
  0xf9   : > { %vm459_vm15 = vcmp.gt.f32.partialorder %v439_v41, 0.0  ;;  %v475_v42 = vmul.f32 0.01, %v439_v41 }
  0xfb   : > { %v491_v45 = vsel %vm459_vm15, %v439_v41, %v475_v42 }
  0xfc   : > { %v500_v46 = vpack.c.bf16 %v491_v45, %v490_v43 }
  0xfe   : > { %v441_v47 = vpop.f32.mrf.mxu0  ;;  %3240 = vmatmul.msk.bf16.gmra.mxu1 %vm540_vm3, %v500_v46 }
  0xff   : > { %v442_v49 = vadd.f32 %v3978_v30, %v441_v47 }
 0x101   : > { %v476_v51 = vmul.f32 0.01, %v442_v49  ;;  %vm460_vm1 = vcmp.gt.f32.partialorder %v442_v49, 0.0 }
 0x103   : > { %v492_v56 = vsel %vm460_vm1, %v442_v49, %v476_v51 }
 0x106   : > { %v443_v52 = vpop.f32.mrf.mxu0 }
 0x107   : > { %v444_v54 = vadd.f32 %v3978_v30, %v443_v52 }
 0x109   : > { %vm461_vm2 = vcmp.gt.f32.partialorder %v444_v54, 0.0  ;;  %v477_v55 = vmul.f32 0.01, %v444_v54 }
 0x10b   : > { %v493_v57 = vsel %vm461_vm2, %v444_v54, %v477_v55 }
 0x10c   : > { %v501_v58 = vpack.c.bf16 %v493_v57, %v492_v56 }
 0x10e   : > { %3241 = vmatmul.msk.bf16.gmra.mxu1 %vm540_vm3, %v501_v58 }
 0x11b   : > { %v574_v59 = vpop.f32.mrf.mxu1 }
 0x11c   : > { %v575_v61 = vadd.f32 %v4019_v60, %v574_v59 }
 0x11e   : > { %v630_v63 = vmul.f32 0.01, %v575_v61  ;;  %vm614_vm4 = vcmp.gt.f32.partialorder %v575_v61, 0.0 }
 0x120   : > { %v646_v3 = vsel %vm614_vm4, %v575_v61, %v630_v63 }
 0x123   : > { %v576_v62 = vpop.f32.mrf.mxu1 }
 0x124   : > { %v577_v30 = vadd.f32 %v4019_v60, %v576_v62 }
 0x126   : > { %vm615_vm5 = vcmp.gt.f32.partialorder %v577_v30, 0.0  ;;  %v631_v0 = vmul.f32 0.01, %v577_v30 }
 0x128   : > { %v647_v6 = vsel %vm615_vm5, %v577_v30, %v631_v0 }
 0x129   : > { %v662_v9 = vpack.c.bf16 %v647_v6, %v646_v3 }
 0x12b   : > { %v579_v12 = vpop.f32.mrf.mxu1  ;;  %3267 = vmatmul.msk.bf16.vlgmr.msra.gmra.mxu2 %vm540_vm3, %v662_v9 }
 0x12c   : > { %v580_v15 = vadd.f32 %v4019_v60, %v579_v12 }
 0x12e   : > { %v632_v21 = vmul.f32 0.01, %v580_v15  ;;  %vm616_vm6 = vcmp.gt.f32.partialorder %v580_v15, 0.0 }
 0x130   : > { %v648_v24 = vsel %vm616_vm6, %v580_v15, %v632_v21 }
 0x133   : > { %v581_v18 = vpop.f32.mrf.mxu1 }
 0x134   : > { %v582_v22 = vadd.f32 %v4019_v60, %v581_v18 }
 0x136   : > { %vm617_vm7 = vcmp.gt.f32.partialorder %v582_v22, 0.0  ;;  %v633_v23 = vmul.f32 0.01, %v582_v22 }
 0x138   : > { %v649_v25 = vsel %vm617_vm7, %v582_v22, %v633_v23 }
 0x139   : > { %v663_v28 = vpack.c.bf16 %v649_v25, %v648_v24 }
 0x13b   : > { %v584_v29 = vpop.f32.mrf.mxu1  ;;  %3268 = vmatmul.msk.bf16.gmra.mxu2 %vm540_vm3, %v663_v28 }
 0x13c   : > { %v585_v31 = vadd.f32 %v4019_v60, %v584_v29 }
 0x13e   : > { %v634_v32 = vmul.f32 0.01, %v585_v31  ;;  %vm618_vm8 = vcmp.gt.f32.partialorder %v585_v31, 0.0 }
 0x140   : > { %v650_v36 = vsel %vm618_vm8, %v585_v31, %v634_v32 }
 0x143   : > { %v586_v33 = vpop.f32.mrf.mxu1 }
 0x144   : > { %v587_v34 = vadd.f32 %v4019_v60, %v586_v33 }
 0x146   : > { %vm619_vm9 = vcmp.gt.f32.partialorder %v587_v34, 0.0  ;;  %v635_v35 = vmul.f32 0.01, %v587_v34 }
 0x148   : > { %v651_v37 = vsel %vm619_vm9, %v587_v34, %v635_v35 }
 0x149   : > { %v664_v38 = vpack.c.bf16 %v651_v37, %v650_v36  ;;  %v4048_v37 = vld [vmem:[%s5448_s6 + $0x3] ss:$0 sm:$0xff] }
 0x14b   : > { %v589_v39 = vpop.f32.mrf.mxu1  ;;  %3269 = vmatmul.msk.bf16.gmra.mxu2 %vm540_vm3, %v664_v38 }
 0x14c   : > { %v590_v40 = vadd.f32 %v4019_v60, %v589_v39 }
 0x14e   : > { %v636_v41 = vmul.f32 0.01, %v590_v40  ;;  %vm620_vm10 = vcmp.gt.f32.partialorder %v590_v40, 0.0 }
 0x150   : > { %v652_v45 = vsel %vm620_vm10, %v590_v40, %v636_v41 }
 0x153   : > { %v591_v42 = vpop.f32.mrf.mxu1 }
 0x154   : > { %v592_v43 = vadd.f32 %v4019_v60, %v591_v42 }
 0x156   : > { %vm621_vm11 = vcmp.gt.f32.partialorder %v592_v43, 0.0  ;;  %v637_v44 = vmul.f32 0.01, %v592_v43 }
 0x158   : > { %v653_v46 = vsel %vm621_vm11, %v592_v43, %v637_v44 }
 0x159   : > { %v665_v47 = vpack.c.bf16 %v653_v46, %v652_v45 }
 0x15b   : > { %v594_v48 = vpop.f32.mrf.mxu1  ;;  %3270 = vmatmul.msk.bf16.gmra.mxu2 %vm540_vm3, %v665_v47 }
 0x15c   : > { %v595_v49 = vadd.f32 %v4019_v60, %v594_v48 }
 0x15e   : > { %v638_v50 = vmul.f32 0.01, %v595_v49  ;;  %vm622_vm12 = vcmp.gt.f32.partialorder %v595_v49, 0.0 }
 0x160   : > { %v654_v54 = vsel %vm622_vm12, %v595_v49, %v638_v50 }
 0x163   : > { %v596_v51 = vpop.f32.mrf.mxu1 }
 0x164   : > { %v597_v52 = vadd.f32 %v4019_v60, %v596_v51 }
 0x166   : > { %vm623_vm13 = vcmp.gt.f32.partialorder %v597_v52, 0.0  ;;  %v639_v53 = vmul.f32 0.01, %v597_v52 }
 0x168   : > { %v655_v55 = vsel %vm623_vm13, %v597_v52, %v639_v53 }
 0x169   : > { %v666_v56 = vpack.c.bf16 %v655_v55, %v654_v54 }
 0x16b   : > { %v599_v57 = vpop.f32.mrf.mxu1  ;;  %3271 = vmatmul.msk.bf16.gmra.mxu2 %vm540_vm3, %v666_v56 }
 0x16c   : > { %v600_v58 = vadd.f32 %v4019_v60, %v599_v57 }
 0x16e   : > { %v640_v59 = vmul.f32 0.01, %v600_v58  ;;  %vm624_vm14 = vcmp.gt.f32.partialorder %v600_v58, 0.0 }
 0x170   : > { %v656_v30 = vsel %vm624_vm14, %v600_v58, %v640_v59 }
 0x173   : > { %v601_v61 = vpop.f32.mrf.mxu1 }
 0x174   : > { %v602_v62 = vadd.f32 %v4019_v60, %v601_v61 }
 0x176   : > { %vm625_vm15 = vcmp.gt.f32.partialorder %v602_v62, 0.0  ;;  %v641_v63 = vmul.f32 0.01, %v602_v62 }
 0x178   : > { %v657_v0 = vsel %vm625_vm15, %v602_v62, %v641_v63 }
 0x179   : > { %v667_v3 = vpack.c.bf16 %v657_v0, %v656_v30  ;;  %v3508_v30 = vld [vmem:[%s5443_s1 + $0x10] sm:$0xff] }
 0x17a   : > { %1080 = vmatpush.bf16.msra.mxu3 %v3508_v30 }
 0x17b   : > { %v604_v6 = vpop.f32.mrf.mxu1  ;;  %3272 = vmatmul.msk.bf16.gmra.mxu2 %vm540_vm3, %v667_v3 }
 0x17c   : > { %v605_v9 = vadd.f32 %v4019_v60, %v604_v6 }
 0x17e   : > { %v642_v12 = vmul.f32 0.01, %v605_v9  ;;  %vm626_vm1 = vcmp.gt.f32.partialorder %v605_v9, 0.0 }
 0x180   : > { %v658_v22 = vsel %vm626_vm1, %v605_v9, %v642_v12 }
 0x183   : > { %v606_v15 = vpop.f32.mrf.mxu1 }
 0x184   : > { %v607_v18 = vadd.f32 %v4019_v60, %v606_v15 }
 0x186   : > { %vm627_vm2 = vcmp.gt.f32.partialorder %v607_v18, 0.0  ;;  %v643_v21 = vmul.f32 0.01, %v607_v18 }
 0x188   : > { %v659_v23 = vsel %vm627_vm2, %v607_v18, %v643_v21 }
 0x189   : > { %v668_v24 = vpack.c.bf16 %v659_v23, %v658_v22  ;;  %v3193_v22 = vld [vmem:[%s5442_s0 + $0x1] sm:$0x1] }
 0x18b   : > { %v609_v25 = vpop.f32.mrf.mxu1  ;;  %3273 = vmatmul.msk.bf16.gmra.mxu2 %vm540_vm3, %v668_v24 }
 0x18c   : > { %v610_v28 = vadd.f32 %v4019_v60, %v609_v25  ;;  %v330_v25 = vsub.f32 1.0, %v3193_v22 }
 0x18e   : > { %v644_v29 = vmul.f32 0.01, %v610_v28  ;;  %vm628_vm4 = vcmp.gt.f32.partialorder %v610_v28, 0.0 }
 0x190   : > { %v660_v34 = vsel %vm628_vm4, %v610_v28, %v644_v29 }
 0x193   : > { %v611_v31 = vpop.f32.mrf.mxu1 }
 0x194   : > { %v612_v32 = vadd.f32 %v4019_v60, %v611_v31 }
 0x196   : > { %vm629_vm5 = vcmp.gt.f32.partialorder %v612_v32, 0.0  ;;  %v645_v33 = vmul.f32 0.01, %v612_v32 }
 0x198   : > { %v661_v35 = vsel %vm629_vm5, %v612_v32, %v645_v33  ;;  %v3512_v32 = vld [vmem:[%s5445_s3 + $0x58] sm:$0xff] }
 0x199   : > { %v669_v36 = vpack.c.bf16 %v661_v35, %v660_v34  ;;  %v4132_v34 = vperm.slane %v330_v25, 0  ;;  %1244 = vmatpush.bf16.msrb.mxu0 %v3512_v32  ;;  %v4139_v35 = vld [vmem:[%s5442_s0 + $0x1] ss:$0 sm:$0xff] }
 0x19a   : > { %v337_v25 = vmul.f32 %v4139_v35, %v3904_v5 }
 0x19b   : > { %3274 = vmatmul.msk.bf16.gmra.mxu2 %vm540_vm3, %v669_v36 }
 0x1ae   : > { %v741_v38 = vpop.f32.mrf.mxu2 }
 0x1af   : > { %v742_v39 = vadd.f32 %v4048_v37, %v741_v38 }
 0x1b1   : > { %813 = vrot.lane.b32.xlu0 %v742_v39, %s3824_s17  ;;  %3558 = vtanh.f32 %v742_v39 }
 0x1b6   : > { %v743_v40 = vpop.f32.mrf.mxu2 }
 0x1b7   : > { %v744_v60 = vadd.f32 %v4048_v37, %v743_v40  ;;  %v4111_v6 = vpop.eup %3558 }
 0x1b8   : > { %v896_v15 = vsub.f32 0.0, %v4111_v6 }
 0x1b9   : > { %815 = vrot.lane.b32.xlu0 %v744_v60, %s3824_s17  ;;  %3560 = vtanh.f32 %v744_v60 }
 0x1ba   : > { %v912_v23 = vmul.f32 1.442695, %v896_v15 }
 0x1be   : > { %v746_v41 = vpop.f32.mrf.mxu2 }
 0x1bf   : > { %v747_v42 = vadd.f32 %v4048_v37, %v746_v41  ;;  %v4113_v9 = vpop.eup %3560  ;;  %v334_v41 = vmul.f32 %v4139_v35, %v3892_v1 }
 0x1c0   : > { %v897_v21 = vsub.f32 0.0, %v4113_v9 }
 0x1c1   : > { %817 = vrot.lane.b32.xlu1 %v747_v42, %s3824_s17  ;;  %3562 = vtanh.f32 %v747_v42 }
 0x1c2   : > { %v914_v28 = vmul.f32 1.442695, %v897_v21  ;;  %3564 = vpow2.f32 %v912_v23 }
 0x1c6   : > { %v748_v43 = vpop.f32.mrf.mxu2 }
 0x1c7   : > { %v749_v44 = vadd.f32 %v4048_v37, %v748_v43  ;;  %v4142_v39 = vpop.eup %3562  ;;  %v335_v43 = vmul.f32 %v4139_v35, %v3895_v2 }
 0x1c8   : > { %v3565_v40 = vpop.eup %3564 }
 0x1c9   : > { %819 = vrot.lane.b32.xlu1 %v749_v44, %s3824_s17  ;;  %3566 = vtanh.f32 %v749_v44 }
 0x1ca   : > { %3568 = vpow2.f32 %v914_v28 }
 0x1ce   : > { %v751_v45 = vpop.f32.mrf.mxu2 }
 0x1cf   : > { %v4059_v46 = vadd.f32 %v4048_v37, %v751_v45  ;;  %v4145_v60 = vpop.eup %3566 }
 0x1d0   : > { %v3569_v45 = vpop.eup %3568 }
 0x1d1   : > { %821 = vrot.lane.b32.xlu2 %v4059_v46, %s3824_s17 }
 0x1d6   : > { %v753_v47 = vpop.f32.mrf.mxu2 }
 0x1d7   : > { %v4064_v48 = vadd.f32 %v4048_v37, %v753_v47  ;;  %v898_v47 = vsub.f32 0.0, %v4142_v39 }
 0x1d9   : > { %823 = vrot.lane.b32.xlu2 %v4064_v48, %s3824_s17  ;;  %3570 = vtanh.f32 %v4064_v48 }
 0x1da   : > { %3572 = vtanh.f32 %v4059_v46  ;;  %v336_v46 = vmul.f32 %v4139_v35, %v3901_v4 }
 0x1de   : > { %v756_v49 = vpop.f32.mrf.mxu2 }
 0x1df   : > { %v4069_v50 = vadd.f32 %v4048_v37, %v756_v49 }
 0x1e1   : > { %825 = vrot.lane.b32.xlu0 %v4069_v50, %s3824_s17 }
 0x1e6   : > { %v758_v51 = vpop.f32.mrf.mxu2 }
 0x1e7   : > { %v4074_v52 = vadd.f32 %v4048_v37, %v758_v51  ;;  %v899_v51 = vsub.f32 0.0, %v4145_v60 }
 0x1e9   : > { %827 = vrot.lane.b32.xlu1 %v4074_v52, %s3824_s17 }
 0x1ee   : > { %v761_v53 = vpop.f32.mrf.mxu2 }
 0x1ef   : > { %v4079_v54 = vadd.f32 %v4048_v37, %v761_v53 }
 0x1f1   : > { %829 = vrot.lane.b32.xlu2 %v4079_v54, %s3824_s17 }
 0x1f6   : > { %v763_v55 = vpop.f32.mrf.mxu2 }
 0x1f7   : > { %v4084_v56 = vadd.f32 %v4048_v37, %v763_v55 }
 0x1f9   : > { %831 = vrot.lane.b32.xlu0 %v4084_v56, %s3824_s17 }
 0x1fe   : > { %v766_v57 = vpop.f32.mrf.mxu2 }
 0x1ff   : > { %v4089_v58 = vadd.f32 %v4048_v37, %v766_v57  ;;  %v916_v57 = vmul.f32 1.442695, %v898_v47 }
 0x201   : > { %833 = vrot.lane.b32.xlu1 %v4089_v58, %s3824_s17  ;;  %3574 = vpow2.f32 %v916_v57 }
 0x206   : > { %v768_v59 = vpop.f32.mrf.mxu2 }
 0x207   : > { %v4094_v61 = vadd.f32 %v4048_v37, %v768_v59 }
 0x209   : > { %835 = vrot.lane.b32.xlu2 %v4094_v61, %s3824_s17 }
 0x20e   : > { %v771_v62 = vpop.f32.mrf.mxu2 }
 0x20f   : > { %v4099_v63 = vadd.f32 %v4048_v37, %v771_v62 }
 0x211   : > { %837 = vrot.lane.b32.xlu0 %v4099_v63, %s3824_s17 }
 0x216   : > { %v773_v0 = vpop.f32.mrf.mxu2 }
 0x217   : > { %v4107_v3 = vadd.f32 %v4048_v37, %v773_v0  ;;  %v4164_v0 = vpop.eup %3570 }
 0x218   : > { %v4167_v21 = vpop.eup %3572  ;;  %v901_v23 = vsub.f32 0.0, %v4164_v0 }
 0x219   : > { %839 = vrot.lane.b32.xlu1 %v4107_v3, %s3824_s17  ;;  %v3575_v22 = vpop.eup %3574 }
 0x21e   : > { %v776_v12 = vpop.f32.mrf.mxu2 }
 0x21f   : > { %v4117_v18 = vadd.f32 %v4048_v37, %v776_v12 }
 0x221   : > { %841 = vrot.lane.b32.xlu2 %v4117_v18, %s3824_s17 }
 0x223   : > { %v814_v24 = vpop.permute.xlu0 %813 }
 0x224   : > { %v861_v29 = vsub.f32 %v3892_v1, %v814_v24 }
 0x226   : > { %v778_v31 = vpop.f32.mrf.mxu2  ;;  %v880_v36 = vmul.f32 %v4132_v34, %v861_v29 }
 0x227   : > { %v4130_v33 = vadd.f32 %v4048_v37, %v778_v31  ;;  %v900_v31 = vsub.f32 0.0, %v4167_v21 }
 0x228   : > { %v944_v42 = vmul.f32 %v3565_v40, %v880_v36  ;;  %v922_v36 = vmul.f32 1.442695, %v901_v23 }
 0x229   : > { %843 = vrot.lane.b32.xlu0 %v4130_v33, %s3824_s17 }
 0x22a   : > { %v4154_v53 = vadd.f32 %v944_v42, %v334_v41  ;;  %v920_v41 = vmul.f32 1.442695, %v900_v31 }
 0x22b   : > { %v816_v38 = vpop.permute.xlu0 %815  ;;  %v822_v30 = vpop.permute.xlu2 %821 }
 0x22c   : > { %v862_v37 = vsub.f32 %v3895_v2, %v816_v38  ;;  %v918_v2 = vmul.f32 1.442695, %v899_v51 }
 0x22e   : > { %v881_v44 = vmul.f32 %v4132_v34, %v862_v37  ;;  %3576 = vpow2.f32 %v918_v2 }
 0x22f   : > { %3578 = vpow2.f32 %v922_v36 }
 0x230   : > { %v945_v49 = vmul.f32 %v3569_v45, %v881_v44  ;;  %3580 = vtanh.f32 %v4069_v50  ;;  %v339_v50 = vmul.f32 %v4139_v35, %v3913_v8 }
 0x231   : > { %3582 = vpow2.f32 %v920_v41 }
 0x232   : > { %v4156_v55 = vadd.f32 %v945_v49, %v335_v43  ;;  %v3511_v43 = vld [vmem:[%s5445_s3 + $0x50] sm:$0xff]  ;;  %3584 = vtanh.f32 %v4074_v52 }
 0x233   : > { %v818_v59 = vpop.permute.xlu1 %817  ;;  %v824_v38 = vpop.permute.xlu2 %823  ;;  %1245 = vmatpush.bf16.msrb.mxu0 %v3511_v43  ;;  %3586 = vtanh.f32 %v4079_v54  ;;  %v340_v54 = vmul.f32 %v4139_v35, %v3919_v10 }
 0x234   : > { %v1027_v1 = vpack.c.bf16 %v4156_v55, %v4154_v53  ;;  %v863_v62 = vsub.f32 %v3901_v4, %v818_v59  ;;  %v3577_v29 = vpop.eup %3576  ;;  %v866_v42 = vsub.f32 %v3913_v8, %v824_v38 }
 0x235   : > { %v3579_v47 = vpop.eup %3578 }
 0x236   : > { %3282 = vmatmul.msk.bf16.vlgmr.msra.gmra.mxu3 %vm372_vm0, %v1027_v1  ;;  %v882_v12 = vmul.f32 %v4132_v34, %v863_v62  ;;  %v885_v44 = vmul.f32 %v4132_v34, %v866_v42  ;;  %v4193_v49 = vpop.eup %3580  ;;  %v338_v1 = vmul.f32 %v4139_v35, %v3910_v7 }
 0x237   : > { %v3583_v57 = vpop.eup %3582  ;;  %v902_v52 = vsub.f32 0.0, %v4193_v49 }
 0x238   : > { %v946_v24 = vmul.f32 %v3575_v22, %v882_v12  ;;  %v949_v51 = vmul.f32 %v3579_v47, %v885_v44  ;;  %v4197_v59 = vpop.eup %3584 }
 0x23a   : > { %v4177_v37 = vadd.f32 %v946_v24, %v336_v46  ;;  %v4202_v62 = vadd.f32 %v949_v51, %v339_v50  ;;  %v4214_v24 = vpop.eup %3586  ;;  %v3510_v51 = vld [vmem:[%s5445_s3 + $0x48] sm:$0xff] }
 0x23b   : > { %v820_v15 = vpop.permute.xlu1 %819  ;;  %v904_v38 = vsub.f32 0.0, %v4214_v24  ;;  %1246 = vmatpush.bf16.msrb.mxu0 %v3510_v51 }
 0x23c   : > { %v864_v48 = vsub.f32 %v3904_v5, %v820_v15  ;;  %v865_v5 = vsub.f32 %v3910_v7, %v822_v30  ;;  %v903_v30 = vsub.f32 0.0, %v4197_v59  ;;  %v924_v15 = vmul.f32 1.442695, %v902_v52 }
 0x23e   : > { %v883_v28 = vmul.f32 %v4132_v34, %v864_v48  ;;  %v884_v45 = vmul.f32 %v4132_v34, %v865_v5  ;;  %v926_v22 = vmul.f32 1.442695, %v903_v30  ;;  %3588 = vpow2.f32 %v924_v15 }
 0x23f   : > { %3590 = vtanh.f32 %v4084_v56  ;;  %v342_v15 = vmul.f32 %v4139_v35, %v3928_v13 }
 0x240   : > { %v947_v32 = vmul.f32 %v3577_v29, %v883_v28  ;;  %v948_v2 = vmul.f32 %v3583_v57, %v884_v45  ;;  %3592 = vpow2.f32 %v926_v22 }
 0x241   : > { %3594 = vtanh.f32 %v4089_v58 }
 0x242   : > { %v4179_v40 = vadd.f32 %v947_v32, %v337_v25  ;;  %v4205_v12 = vadd.f32 %v948_v2, %v338_v1  ;;  %v341_v32 = vmul.f32 %v4139_v35, %v3922_v11  ;;  %3596 = vtanh.f32 %v4094_v61 }
 0x244   : > { %v1028_v4 = vpack.c.bf16 %v4179_v40, %v4177_v37  ;;  %v1029_v8 = vpack.c.bf16 %v4202_v62, %v4205_v12  ;;  %v3589_v28 = vpop.eup %3588 }
 0x245   : > { %v4217_v29 = vpop.eup %3590 }
 0x246   : > { %3283 = vmatmul.msk.bf16.gmra.mxu3 %vm372_vm0, %v1028_v4  ;;  %v3593_v36 = vpop.eup %3592  ;;  %v905_v42 = vsub.f32 0.0, %v4217_v29 }
 0x247   : > { %v4234_v45 = vpop.eup %3594 }
 0x248   : > { %v930_v44 = vmul.f32 1.442695, %v905_v42  ;;  %v4238_v58 = vpop.eup %3596  ;;  %v906_v61 = vsub.f32 0.0, %v4234_v45 }
 0x249   : > { %v907_v57 = vsub.f32 0.0, %v4238_v58 }
 0x24a   : > { %v932_v30 = vmul.f32 1.442695, %v906_v61 }
 0x24b   : > { %v830_v43 = vpop.permute.xlu2 %829 }
 0x24c   : > { %v869_v47 = vsub.f32 %v3928_v13, %v830_v43  ;;  %v344_v43 = vmul.f32 %v4139_v35, %v3937_v16 }
 0x24e   : > { %v888_v50 = vmul.f32 %v4132_v34, %v869_v47 }
 0x253   : > { %v826_v48 = vpop.permute.xlu0 %825 }
 0x254   : > { %v867_v23 = vsub.f32 %v3919_v10, %v826_v48  ;;  %v928_v10 = vmul.f32 1.442695, %v904_v38 }
 0x256   : > { %3284 = vmatmul.msk.bf16.gmra.mxu3 %vm372_vm0, %v1029_v8  ;;  %v886_v7 = vmul.f32 %v4132_v34, %v867_v23  ;;  %3598 = vpow2.f32 %v928_v10  ;;  %v343_v8 = vmul.f32 %v4139_v35, %v3931_v14 }
 0x257   : > { %3600 = vpow2.f32 %v930_v44 }
 0x258   : > { %v950_v31 = vmul.f32 %v3589_v28, %v886_v7  ;;  %v934_v7 = vmul.f32 1.442695, %v907_v57  ;;  %3602 = vpow2.f32 %v932_v30 }
 0x25a   : > { %v4228_v4 = vadd.f32 %v950_v31, %v340_v54  ;;  %3604 = vpow2.f32 %v934_v7  ;;  %v347_v7 = vmul.f32 %v4139_v35, %v3949_v20 }
 0x25b   : > { %v828_v46 = vpop.permute.xlu1 %827  ;;  %3606 = vtanh.f32 %v4099_v63  ;;  %v345_v63 = vmul.f32 %v4139_v35, %v3940_v17 }
 0x25c   : > { %v868_v25 = vsub.f32 %v3922_v11, %v828_v46  ;;  %v3599_v52 = vpop.eup %3598  ;;  %3608 = vtanh.f32 %v4107_v3 }
 0x25d   : > { %v952_v48 = vmul.f32 %v3599_v52, %v888_v50  ;;  %v3601_v23 = vpop.eup %3600  ;;  %3610 = vtanh.f32 %v4117_v18 }
 0x25e   : > { %v887_v56 = vmul.f32 %v4132_v34, %v868_v25 }
 0x25f   : > { %v4252_v28 = vadd.f32 %v952_v48, %v342_v15 }
 0x260   : > { %v951_v41 = vmul.f32 %v3593_v36, %v887_v56  ;;  %v3603_v56 = vpop.eup %3602 }
 0x262   : > { %v4230_v5 = vadd.f32 %v951_v41, %v341_v32  ;;  %v3605_v41 = vpop.eup %3604 }
 0x263   : > { %v836_v25 = vpop.permute.xlu2 %835  ;;  %v4265_v42 = vpop.eup %3606 }
 0x264   : > { %v1030_v11 = vpack.c.bf16 %v4230_v5, %v4228_v4  ;;  %v908_v44 = vsub.f32 0.0, %v4265_v42  ;;  %v4272_v47 = vpop.eup %3608 }
 0x265   : > { %v909_v51 = vsub.f32 0.0, %v4272_v47  ;;  %v4288_v52 = vpop.eup %3610 }
 0x266   : > { %3285 = vmatmul.msk.bf16.gmra.mxu3 %vm372_vm0, %v1030_v11  ;;  %v936_v50 = vmul.f32 1.442695, %v908_v44  ;;  %v910_v15 = vsub.f32 0.0, %v4288_v52 }
 0x268   : > { %3612 = vpow2.f32 %v936_v50 }
 0x269   : > { %3614 = vtanh.f32 %v4130_v33 }
 0x26b   : > { %v832_v1 = vpop.permute.xlu0 %831 }
 0x26c   : > { %v870_v2 = vsub.f32 %v3931_v14, %v832_v1  ;;  %v872_v14 = vsub.f32 %v3940_v17, %v836_v25 }
 0x26e   : > { %v889_v22 = vmul.f32 %v4132_v34, %v870_v2  ;;  %v891_v36 = vmul.f32 %v4132_v34, %v872_v14  ;;  %v3509_v2 = vld [vmem:[%s5445_s3 + $0x40] sm:$0xff]  ;;  %v3613_v30 = vpop.eup %3612 }
 0x26f   : > { %1247 = vmatpush.bf16.msrb.mxu0 %v3509_v2 }
 0x270   : > { %v953_v46 = vmul.f32 %v3601_v23, %v889_v22  ;;  %v955_v10 = vmul.f32 %v3605_v41, %v891_v36  ;;  %v346_v22 = vmul.f32 %v4139_v35, %v3946_v19 }
 0x272   : > { %v4254_v54 = vadd.f32 %v953_v46, %v343_v8  ;;  %v4274_v3 = vadd.f32 %v955_v10, %v345_v63  ;;  %v4292_v8 = vpop.eup %3614 }
 0x273   : > { %v834_v31 = vpop.permute.xlu1 %833 }
 0x274   : > { %v1031_v13 = vpack.c.bf16 %v4254_v54, %v4252_v28  ;;  %v871_v32 = vsub.f32 %v3937_v16, %v834_v31  ;;  %v938_v16 = vmul.f32 1.442695, %v909_v51  ;;  %v940_v31 = vmul.f32 1.442695, %v910_v15 }
 0x275   : > { %v349_v51 = vmul.f32 %v4139_v35, %v3970_v27 }
 0x276   : > { %3286 = vmatmul.msk.bf16.gmra.mxu3 %vm372_vm0, %v1031_v13  ;;  %v890_v38 = vmul.f32 %v4132_v34, %v871_v32  ;;  %3616 = vpow2.f32 %v938_v16  ;;  %v911_v13 = vsub.f32 0.0, %v4292_v8 }
 0x277   : > { %3618 = vpow2.f32 %v940_v31 }
 0x278   : > { %v954_v11 = vmul.f32 %v3603_v56, %v890_v38  ;;  %v942_v38 = vmul.f32 1.442695, %v911_v13 }
 0x27a   : > { %v4276_v61 = vadd.f32 %v954_v11, %v344_v43  ;;  %3620 = vpow2.f32 %v942_v38  ;;  %v348_v43 = vmul.f32 %v4139_v35, %v3967_v26  ;;  %v3515_v38 = vld [vmem:[%s5447_s5 + $0x50] sm:$0xff] }
 0x27b   : > { %v842_v32 = vpop.permute.xlu2 %841 }
 0x27c   : > { %v1032_v17 = vpack.c.bf16 %v4274_v3, %v4276_v61  ;;  %v3617_v25 = vpop.eup %3616  ;;  %v875_v41 = vsub.f32 %v3967_v26, %v842_v32  ;;  %v3516_v26 = vld [vmem:[%s5447_s5 + $0x58] sm:$0xff] }
 0x27d   : > { %v3619_v63 = vpop.eup %3618  ;;  %1411 = vmatpush.bf16.msrb.mxu3 %v3516_v26 }
 0x280   : > { %v3621_v50 = vpop.eup %3620 }
 0x281   : > { %1412 = vmatpush.bf16.msrb.mxu3 %v3515_v38 }
 0x283   : > { %v838_v57 = vpop.permute.xlu0 %837 }
 0x284   : > { %v873_v1 = vsub.f32 %v3946_v19, %v838_v57 }
 0x286   : > { %3287 = vmatmul.msk.bf16.gmra.mxu3 %vm372_vm0, %v1032_v17  ;;  %v892_v18 = vmul.f32 %v4132_v34, %v873_v1 }
 0x288   : > { %v956_v23 = vmul.f32 %v3613_v30, %v892_v18 }
 0x28a   : > { %v4301_v56 = vadd.f32 %v956_v23, %v346_v22 }
 0x28b   : > { %v840_v48 = vpop.permute.xlu1 %839 }
 0x28c   : > { %v874_v33 = vsub.f32 %v3949_v20, %v840_v48  ;;  %v894_v20 = vmul.f32 %v4132_v34, %v875_v41 }
 0x28e   : > { %v893_v46 = vmul.f32 %v4132_v34, %v874_v33  ;;  %v958_v11 = vmul.f32 %v3619_v63, %v894_v20 }
 0x290   : > { %v957_v14 = vmul.f32 %v3617_v25, %v893_v46  ;;  %v4316_v17 = vadd.f32 %v958_v11, %v348_v43 }
 0x292   : > { %v4303_v36 = vadd.f32 %v957_v14, %v347_v7 }
 0x294   : > { %v1033_v19 = vpack.c.bf16 %v4303_v36, %v4301_v56 }
 0x296   : > { %3288 = vmatmul.msk.bf16.gmra.mxu3 %vm372_vm0, %v1033_v19 }
 0x29b   : > { %v844_v10 = vpop.permute.xlu0 %843 }
 0x29c   : > { %v876_v44 = vsub.f32 %v3970_v27, %v844_v10  ;;  %v4329_v27 = vld [vmem:[%s5444_s2 + $0x2] ss:$0 sm:$0xff] }
 0x29e   : > { %v895_v57 = vmul.f32 %v4132_v34, %v876_v44 }
 0x2a0   : > { %v959_v16 = vmul.f32 %v3621_v50, %v895_v57 }
 0x2a2   : > { %v4318_v1 = vadd.f32 %v959_v16, %v349_v51 }
 0x2a4   : > { %v1034_v2 = vpack.c.bf16 %v4318_v1, %v4316_v17 }
 0x2a6   : > { %3289 = vmatmul.msk.bf16.gmra.mxu3 %vm372_vm0, %v1034_v2 }
 0x2b9   : > { %v1082_v18 = vpop.f32.mrf.mxu3 }
 0x2ba   : > { %v1083_v35 = vadd.f32 %v4329_v27, %v1082_v18 }
 0x2bc   : > { %v1138_v15 = vmul.f32 0.01, %v1083_v35  ;;  %vm1122_vm6 = vcmp.gt.f32.partialorder %v1083_v35, 0.0 }
 0x2be   : > { %v1154_v22 = vsel %vm1122_vm6, %v1083_v35, %v1138_v15 }
 0x2c1   : > { %v1084_v30 = vpop.f32.mrf.mxu3 }
 0x2c2   : > { %v1085_v48 = vadd.f32 %v4329_v27, %v1084_v30 }
 0x2c4   : > { %vm1123_vm7 = vcmp.gt.f32.partialorder %v1085_v48, 0.0  ;;  %v1139_v33 = vmul.f32 0.01, %v1085_v48 }
 0x2c6   : > { %v1155_v23 = vsel %vm1123_vm7, %v1085_v48, %v1139_v33 }
 0x2c7   : > { %v1170_v7 = vpack.c.bf16 %v1155_v23, %v1154_v22  ;;  %v3514_v23 = vld [vmem:[%s5447_s5 + $0x48] sm:$0xff] }
 0x2c8   : > { %1413 = vmatpush.bf16.msrb.mxu3 %v3514_v23 }
 0x2c9   : > { %v1087_v46 = vpop.f32.mrf.mxu3  ;;  %3315 = vmatmul.msk.bf16.vlgmr.msrb.gmra.mxu0 %vm540_vm3, %v1170_v7 }
 0x2ca   : > { %v1088_v25 = vadd.f32 %v4329_v27, %v1087_v46 }
 0x2cc   : > { %v1140_v13 = vmul.f32 0.01, %v1088_v25  ;;  %vm1124_vm8 = vcmp.gt.f32.partialorder %v1088_v25, 0.0 }
 0x2ce   : > { %v1156_v19 = vsel %vm1124_vm8, %v1088_v25, %v1140_v13 }
 0x2d1   : > { %v1089_v31 = vpop.f32.mrf.mxu3 }
 0x2d2   : > { %v1090_v14 = vadd.f32 %v4329_v27, %v1089_v31 }
 0x2d4   : > { %vm1125_vm9 = vcmp.gt.f32.partialorder %v1090_v14, 0.0  ;;  %v1141_v32 = vmul.f32 0.01, %v1090_v14 }
 0x2d6   : > { %v1157_v41 = vsel %vm1125_vm9, %v1090_v14, %v1141_v32 }
 0x2d7   : > { %v1171_v20 = vpack.c.bf16 %v1157_v41, %v1156_v19 }
 0x2d9   : > { %v1092_v63 = vpop.f32.mrf.mxu3  ;;  %3316 = vmatmul.msk.bf16.gmra.mxu0 %vm540_vm3, %v1171_v20 }
 0x2da   : > { %v1093_v10 = vadd.f32 %v4329_v27, %v1092_v63 }
 0x2dc   : > { %v1142_v11 = vmul.f32 0.01, %v1093_v10  ;;  %vm1126_vm10 = vcmp.gt.f32.partialorder %v1093_v10, 0.0 }
 0x2de   : > { %v1158_v51 = vsel %vm1126_vm10, %v1093_v10, %v1142_v11 }
 0x2e1   : > { %v1094_v43 = vpop.f32.mrf.mxu3 }
 0x2e2   : > { %v1095_v44 = vadd.f32 %v4329_v27, %v1094_v43 }
 0x2e4   : > { %vm1127_vm11 = vcmp.gt.f32.partialorder %v1095_v44, 0.0  ;;  %v1143_v50 = vmul.f32 0.01, %v1095_v44 }
 0x2e6   : > { %v1159_v57 = vsel %vm1127_vm11, %v1095_v44, %v1143_v50 }
 0x2e7   : > { %v1172_v16 = vpack.c.bf16 %v1159_v57, %v1158_v51  ;;  %v3513_v57 = vld [vmem:[%s5447_s5 + $0x40] sm:$0xff] }
 0x2e8   : > { %1414 = vmatpush.bf16.msrb.mxu3 %v3513_v57 }
 0x2e9   : > { %v1097_v2 = vpop.f32.mrf.mxu3  ;;  %3317 = vmatmul.msk.bf16.gmra.mxu0 %vm540_vm3, %v1172_v16 }
 0x2ea   : > { %v1098_v26 = vadd.f32 %v4329_v27, %v1097_v2 }
 0x2ec   : > { %v1144_v35 = vmul.f32 0.01, %v1098_v26  ;;  %vm1128_vm12 = vcmp.gt.f32.partialorder %v1098_v26, 0.0 }
 0x2ee   : > { %v1160_v48 = vsel %vm1128_vm12, %v1098_v26, %v1144_v35 }
 0x2f1   : > { %v1099_v18 = vpop.f32.mrf.mxu3 }
 0x2f2   : > { %v1100_v30 = vadd.f32 %v4329_v27, %v1099_v18 }
 0x2f4   : > { %vm1129_vm13 = vcmp.gt.f32.partialorder %v1100_v30, 0.0  ;;  %v1145_v15 = vmul.f32 0.01, %v1100_v30 }
 0x2f6   : > { %v1161_v33 = vsel %vm1129_vm13, %v1100_v30, %v1145_v15 }
 0x2f7   : > { %v1173_v22 = vpack.c.bf16 %v1161_v33, %v1160_v48 }
 0x2f9   : > { %v1102_v7 = vpop.f32.mrf.mxu3  ;;  %3318 = vmatmul.msk.bf16.gmra.mxu0 %vm540_vm3, %v1173_v22 }
 0x2fa   : > { %v1103_v46 = vadd.f32 %v4329_v27, %v1102_v7 }
 0x2fc   : > { %v1146_v31 = vmul.f32 0.01, %v1103_v46  ;;  %vm1130_vm14 = vcmp.gt.f32.partialorder %v1103_v46, 0.0 }
 0x2fe   : > { %v1162_v32 = vsel %vm1130_vm14, %v1103_v46, %v1146_v31 }
 0x301   : > { %v1104_v25 = vpop.f32.mrf.mxu3 }
 0x302   : > { %v1105_v13 = vadd.f32 %v4329_v27, %v1104_v25 }
 0x304   : > { %vm1131_vm15 = vcmp.gt.f32.partialorder %v1105_v13, 0.0  ;;  %v1147_v14 = vmul.f32 0.01, %v1105_v13 }
 0x306   : > { %v1163_v38 = vsel %vm1131_vm15, %v1105_v13, %v1147_v14 }
 0x307   : > { %v1174_v19 = vpack.c.bf16 %v1163_v38, %v1162_v32 }
 0x309   : > { %v1107_v41 = vpop.f32.mrf.mxu3  ;;  %3319 = vmatmul.msk.bf16.gmra.mxu0 %vm540_vm3, %v1174_v19  ;;  %v4367_v19 = vld [vmem:[%s5446_s4 + $0x2] ss:$0 sm:$0xff] }
 0x30a   : > { %v1108_v20 = vadd.f32 %v4329_v27, %v1107_v41 }
 0x30c   : > { %v1148_v10 = vmul.f32 0.01, %v1108_v20  ;;  %vm1132_vm1 = vcmp.gt.f32.partialorder %v1108_v20, 0.0 }
 0x30e   : > { %v1164_v44 = vsel %vm1132_vm1, %v1108_v20, %v1148_v10 }
 0x311   : > { %v1109_v63 = vpop.f32.mrf.mxu3 }
 0x312   : > { %v1110_v43 = vadd.f32 %v4329_v27, %v1109_v63 }
 0x314   : > { %vm1133_vm2 = vcmp.gt.f32.partialorder %v1110_v43, 0.0  ;;  %v1149_v11 = vmul.f32 0.01, %v1110_v43 }
 0x316   : > { %v1165_v50 = vsel %vm1133_vm2, %v1110_v43, %v1149_v11 }
 0x317   : > { %v1175_v51 = vpack.c.bf16 %v1165_v50, %v1164_v44 }
 0x319   : > { %v1112_v16 = vpop.f32.mrf.mxu3  ;;  %3320 = vmatmul.msk.bf16.gmra.mxu0 %vm540_vm3, %v1175_v51 }
 0x31a   : > { %v1113_v2 = vadd.f32 %v4329_v27, %v1112_v16 }
 0x31c   : > { %v1150_v18 = vmul.f32 0.01, %v1113_v2  ;;  %vm1134_vm4 = vcmp.gt.f32.partialorder %v1113_v2, 0.0 }
 0x31e   : > { %v1166_v15 = vsel %vm1134_vm4, %v1113_v2, %v1150_v18 }
 0x321   : > { %v1114_v26 = vpop.f32.mrf.mxu3 }
 0x322   : > { %v1115_v35 = vadd.f32 %v4329_v27, %v1114_v26 }
 0x324   : > { %vm1135_vm5 = vcmp.gt.f32.partialorder %v1115_v35, 0.0  ;;  %v1151_v30 = vmul.f32 0.01, %v1115_v35 }
 0x326   : > { %v1167_v48 = vsel %vm1135_vm5, %v1115_v35, %v1151_v30 }
 0x327   : > { %v1176_v33 = vpack.c.bf16 %v1167_v48, %v1166_v15 }
 0x329   : > { %v1117_v22 = vpop.f32.mrf.mxu3  ;;  %3321 = vmatmul.msk.bf16.gmra.mxu0 %vm540_vm3, %v1176_v33 }
 0x32a   : > { %v1118_v23 = vadd.f32 %v4329_v27, %v1117_v22 }
 0x32c   : > { %v1152_v7 = vmul.f32 0.01, %v1118_v23  ;;  %vm1136_vm6 = vcmp.gt.f32.partialorder %v1118_v23, 0.0 }
 0x32e   : > { %v1168_v31 = vsel %vm1136_vm6, %v1118_v23, %v1152_v7 }
 0x331   : > { %v1119_v46 = vpop.f32.mrf.mxu3 }
 0x332   : > { %v1120_v25 = vadd.f32 %v4329_v27, %v1119_v46 }
 0x334   : > { %vm1137_vm7 = vcmp.gt.f32.partialorder %v1120_v25, 0.0  ;;  %v1153_v13 = vmul.f32 0.01, %v1120_v25 }
 0x336   : > { %v1169_v14 = vsel %vm1137_vm7, %v1120_v25, %v1153_v13 }
 0x337   : > { %v1177_v32 = vpack.c.bf16 %v1169_v14, %v1168_v31 }
 0x339   : > { %3322 = vmatmul.msk.bf16.gmra.mxu0 %vm540_vm3, %v1177_v32 }
 0x346   : > { %v1249_v38 = vpop.f32.mrf.mxu0 }
 0x347   : > { %v1250_v41 = vadd.f32 %v4367_v19, %v1249_v38 }
 0x349   : > { %v1305_v63 = vmul.f32 0.01, %v1250_v41  ;;  %vm1289_vm8 = vcmp.gt.f32.partialorder %v1250_v41, 0.0 }
 0x34b   : > { %v1321_v43 = vsel %vm1289_vm8, %v1250_v41, %v1305_v63 }
 0x34e   : > { %v1251_v20 = vpop.f32.mrf.mxu0 }
 0x34f   : > { %v1252_v10 = vadd.f32 %v4367_v19, %v1251_v20 }
 0x351   : > { %vm1290_vm9 = vcmp.gt.f32.partialorder %v1252_v10, 0.0  ;;  %v1306_v27 = vmul.f32 0.01, %v1252_v10 }
 0x353   : > { %v1322_v11 = vsel %vm1290_vm9, %v1252_v10, %v1306_v27 }
 0x354   : > { %v1337_v44 = vpack.c.bf16 %v1322_v11, %v1321_v43 }
 0x356   : > { %v1254_v50 = vpop.f32.mrf.mxu0  ;;  %3348 = vmatmul.msk.bf16.vlgmr.msrb.gmra.mxu3 %vm540_vm3, %v1337_v44 }
 0x357   : > { %v1255_v51 = vadd.f32 %v4367_v19, %v1254_v50 }
 0x359   : > { %v1307_v16 = vmul.f32 0.01, %v1255_v51  ;;  %vm1291_vm10 = vcmp.gt.f32.partialorder %v1255_v51, 0.0 }
 0x35b   : > { %v1323_v18 = vsel %vm1291_vm10, %v1255_v51, %v1307_v16 }
 0x35e   : > { %v1256_v57 = vpop.f32.mrf.mxu0 }
 0x35f   : > { %v1257_v2 = vadd.f32 %v4367_v19, %v1256_v57 }
 0x361   : > { %vm1292_vm11 = vcmp.gt.f32.partialorder %v1257_v2, 0.0  ;;  %v1308_v26 = vmul.f32 0.01, %v1257_v2 }
 0x363   : > { %v1324_v35 = vsel %vm1292_vm11, %v1257_v2, %v1308_v26 }
 0x364   : > { %v1338_v30 = vpack.c.bf16 %v1324_v35, %v1323_v18 }
 0x366   : > { %v1259_v15 = vpop.f32.mrf.mxu0  ;;  %3349 = vmatmul.msk.bf16.gmra.mxu3 %vm540_vm3, %v1338_v30 }
 0x367   : > { %v1260_v48 = vadd.f32 %v4367_v19, %v1259_v15 }
 0x369   : > { %v1309_v22 = vmul.f32 0.01, %v1260_v48  ;;  %vm1293_vm12 = vcmp.gt.f32.partialorder %v1260_v48, 0.0 }
 0x36b   : > { %v1325_v46 = vsel %vm1293_vm12, %v1260_v48, %v1309_v22 }
 0x36e   : > { %v1261_v33 = vpop.f32.mrf.mxu0 }
 0x36f   : > { %v1262_v23 = vadd.f32 %v4367_v19, %v1261_v33 }
 0x371   : > { %vm1294_vm13 = vcmp.gt.f32.partialorder %v1262_v23, 0.0  ;;  %v1310_v7 = vmul.f32 0.01, %v1262_v23 }
 0x373   : > { %v1326_v25 = vsel %vm1294_vm13, %v1262_v23, %v1310_v7 }
 0x374   : > { %v1339_v31 = vpack.c.bf16 %v1326_v25, %v1325_v46 }
 0x376   : > { %v1264_v13 = vpop.f32.mrf.mxu0  ;;  %3350 = vmatmul.msk.bf16.gmra.mxu3 %vm540_vm3, %v1339_v31 }
 0x377   : > { %v1265_v14 = vadd.f32 %v4367_v19, %v1264_v13 }
 0x379   : > { %v1311_v38 = vmul.f32 0.01, %v1265_v14  ;;  %vm1295_vm14 = vcmp.gt.f32.partialorder %v1265_v14, 0.0 }
 0x37b   : > { %v1327_v63 = vsel %vm1295_vm14, %v1265_v14, %v1311_v38 }
 0x37e   : > { %v1266_v32 = vpop.f32.mrf.mxu0 }
 0x37f   : > { %v1267_v41 = vadd.f32 %v4367_v19, %v1266_v32 }
 0x381   : > { %vm1296_vm15 = vcmp.gt.f32.partialorder %v1267_v41, 0.0  ;;  %v1312_v20 = vmul.f32 0.01, %v1267_v41 }
 0x383   : > { %v1328_v10 = vsel %vm1296_vm15, %v1267_v41, %v1312_v20 }
 0x384   : > { %v1340_v27 = vpack.c.bf16 %v1328_v10, %v1327_v63 }
 0x386   : > { %v1269_v43 = vpop.f32.mrf.mxu0  ;;  %3351 = vmatmul.msk.bf16.gmra.mxu3 %vm540_vm3, %v1340_v27 }
 0x387   : > { %v1270_v11 = vadd.f32 %v4367_v19, %v1269_v43 }
 0x389   : > { %v1313_v50 = vmul.f32 0.01, %v1270_v11  ;;  %vm1297_vm1 = vcmp.gt.f32.partialorder %v1270_v11, 0.0 }
 0x38b   : > { %v1329_v16 = vsel %vm1297_vm1, %v1270_v11, %v1313_v50 }
 0x38e   : > { %v1271_v44 = vpop.f32.mrf.mxu0 }
 0x38f   : > { %v1272_v51 = vadd.f32 %v4367_v19, %v1271_v44 }
 0x391   : > { %vm1298_vm2 = vcmp.gt.f32.partialorder %v1272_v51, 0.0  ;;  %v1314_v57 = vmul.f32 0.01, %v1272_v51 }
 0x393   : > { %v1330_v2 = vsel %vm1298_vm2, %v1272_v51, %v1314_v57 }
 0x394   : > { %v1341_v26 = vpack.c.bf16 %v1330_v2, %v1329_v16  ;;  %v3517_v16 = vld [vmem:[%s5443_s1 + $0x8] sm:$0xff]  ;;  %v4399_v2 = vld [vmem:[%s5448_s6 + $0x2] ss:$0 sm:$0xff] }
 0x395   : > { %1752 = vmatpush.bf16.msrb.mxu1 %v3517_v16  ;;  %v980_v16 = vmul.f32 %v4167_v21, %v4132_v34 }
 0x396   : > { %v1274_v18 = vpop.f32.mrf.mxu0  ;;  %3352 = vmatmul.msk.bf16.gmra.mxu3 %vm540_vm3, %v1341_v26 }
 0x397   : > { %v1275_v35 = vadd.f32 %v4367_v19, %v1274_v18 }
 0x399   : > { %v1315_v15 = vmul.f32 0.01, %v1275_v35  ;;  %vm1299_vm4 = vcmp.gt.f32.partialorder %v1275_v35, 0.0 }
 0x39b   : > { %v1331_v22 = vsel %vm1299_vm4, %v1275_v35, %v1315_v15 }
 0x39e   : > { %v1276_v30 = vpop.f32.mrf.mxu0 }
 0x39f   : > { %v1277_v48 = vadd.f32 %v4367_v19, %v1276_v30 }
 0x3a1   : > { %vm1300_vm5 = vcmp.gt.f32.partialorder %v1277_v48, 0.0  ;;  %v1316_v33 = vmul.f32 0.01, %v1277_v48 }
 0x3a3   : > { %v1332_v23 = vsel %vm1300_vm5, %v1277_v48, %v1316_v33 }
 0x3a4   : > { %v1342_v7 = vpack.c.bf16 %v1332_v23, %v1331_v22  ;;  %v976_v22 = vmul.f32 %v4111_v6, %v4132_v34 }
 0x3a6   : > { %v1279_v46 = vpop.f32.mrf.mxu0  ;;  %3353 = vmatmul.msk.bf16.gmra.mxu3 %vm540_vm3, %v1342_v7 }
 0x3a7   : > { %v1280_v25 = vadd.f32 %v4367_v19, %v1279_v46 }
 0x3a9   : > { %v1317_v13 = vmul.f32 0.01, %v1280_v25  ;;  %vm1301_vm6 = vcmp.gt.f32.partialorder %v1280_v25, 0.0 }
 0x3ab   : > { %v1333_v38 = vsel %vm1301_vm6, %v1280_v25, %v1317_v13  ;;  %v977_v13 = vmul.f32 %v4113_v9, %v4132_v34 }
 0x3ae   : > { %v1281_v31 = vpop.f32.mrf.mxu0 }
 0x3af   : > { %v1282_v14 = vadd.f32 %v4367_v19, %v1281_v31 }
 0x3b1   : > { %vm1302_vm7 = vcmp.gt.f32.partialorder %v1282_v14, 0.0  ;;  %v1318_v32 = vmul.f32 0.01, %v1282_v14 }
 0x3b3   : > { %v1334_v41 = vsel %vm1302_vm7, %v1282_v14, %v1318_v32 }
 0x3b4   : > { %v1343_v20 = vpack.c.bf16 %v1334_v41, %v1333_v38 }
 0x3b6   : > { %v1284_v63 = vpop.f32.mrf.mxu0  ;;  %3354 = vmatmul.msk.bf16.gmra.mxu3 %vm540_vm3, %v1343_v20  ;;  %v978_v20 = vmul.f32 %v4142_v39, %v4132_v34 }
 0x3b7   : > { %v1285_v10 = vadd.f32 %v4367_v19, %v1284_v63 }
 0x3b9   : > { %v1319_v27 = vmul.f32 0.01, %v1285_v10  ;;  %vm1303_vm8 = vcmp.gt.f32.partialorder %v1285_v10, 0.0 }
 0x3bb   : > { %v1335_v44 = vsel %vm1303_vm8, %v1285_v10, %v1319_v27 }
 0x3be   : > { %v1286_v43 = vpop.f32.mrf.mxu0 }
 0x3bf   : > { %v1287_v11 = vadd.f32 %v4367_v19, %v1286_v43  ;;  %v326_v19 = vld [vmem:[%s5442_s0] sm:$0x1] }
 0x3c0   : > { %v329_v35 = vsub.f32 1.0, %v326_v19 }
 0x3c1   : > { %vm1304_vm9 = vcmp.gt.f32.partialorder %v1287_v11, 0.0  ;;  %v1320_v50 = vmul.f32 0.01, %v1287_v11 }
 0x3c2   : > { %v4406_v30 = vperm.slane %v329_v35, 0 }
 0x3c3   : > { %v1336_v51 = vsel %vm1304_vm9, %v1287_v11, %v1320_v50  ;;  %v979_v11 = vmul.f32 %v4145_v60, %v4132_v34 }
 0x3c4   : > { %v1344_v57 = vpack.c.bf16 %v1336_v51, %v1335_v44 }
 0x3c6   : > { %3355 = vmatmul.msk.bf16.gmra.mxu3 %vm540_vm3, %v1344_v57 }
 0x3d9   : > { %v1416_v26 = vpop.f32.mrf.mxu3 }
 0x3da   : > { %v1417_v18 = vadd.f32 %v4399_v2, %v1416_v26 }
 0x3dc   : > { %3622 = vtanh.f32 %v1417_v18  ;;  %1488 = vrot.lane.b32.xlu1 %v1417_v18, %s3824_s17 }
 0x3e1   : > { %v1418_v15 = vpop.f32.mrf.mxu3 }
 0x3e2   : > { %v4408_v48 = vpop.eup %3622  ;;  %v1419_v33 = vadd.f32 %v4399_v2, %v1418_v15  ;;  %v981_v15 = vmul.f32 %v4164_v0, %v4132_v34 }
 0x3e3   : > { %v1651_v23 = vmul.f32 %v4408_v48, %v4406_v30 }
 0x3e4   : > { %3624 = vtanh.f32 %v1419_v33  ;;  %1490 = vrot.lane.b32.xlu2 %v1419_v33, %s3824_s17 }
 0x3e5   : > { %v4416_v7 = vadd.f32 %v1651_v23, %v976_v22 }
 0x3e9   : > { %v1421_v46 = vpop.f32.mrf.mxu3 }
 0x3ea   : > { %v4418_v25 = vpop.eup %3624  ;;  %v1422_v31 = vadd.f32 %v4399_v2, %v1421_v46 }
 0x3eb   : > { %v1652_v14 = vmul.f32 %v4418_v25, %v4406_v30 }
 0x3ec   : > { %3626 = vtanh.f32 %v1422_v31  ;;  %1492 = vrot.lane.b32.xlu0 %v1422_v31, %s3824_s17  ;;  %v982_v31 = vmul.f32 %v4193_v49, %v4132_v34 }
 0x3ed   : > { %v4426_v6 = vadd.f32 %v1652_v14, %v977_v13 }
 0x3f1   : > { %v1423_v32 = vpop.f32.mrf.mxu3 }
 0x3f2   : > { %v4428_v38 = vpop.eup %3626  ;;  %v1424_v41 = vadd.f32 %v4399_v2, %v1423_v32 }
 0x3f3   : > { %v1653_v63 = vmul.f32 %v4428_v38, %v4406_v30 }
 0x3f4   : > { %3628 = vtanh.f32 %v1424_v41  ;;  %1494 = vrot.lane.b32.xlu1 %v1424_v41, %s3824_s17 }
 0x3f5   : > { %v4436_v9 = vadd.f32 %v1653_v63, %v978_v20  ;;  %v983_v20 = vmul.f32 %v4197_v59, %v4132_v34 }
 0x3f9   : > { %v1426_v10 = vpop.f32.mrf.mxu3 }
 0x3fa   : > { %v4438_v27 = vpop.eup %3628  ;;  %v1427_v43 = vadd.f32 %v4399_v2, %v1426_v10 }
 0x3fb   : > { %v1654_v44 = vmul.f32 %v4438_v27, %v4406_v30 }
 0x3fc   : > { %3630 = vtanh.f32 %v1427_v43  ;;  %1496 = vrot.lane.b32.xlu2 %v1427_v43, %s3824_s17 }
 0x3fd   : > { %v4446_v39 = vadd.f32 %v1654_v44, %v979_v11  ;;  %v984_v44 = vmul.f32 %v4214_v24, %v4132_v34 }
 0x401   : > { %v1428_v50 = vpop.f32.mrf.mxu3 }
 0x402   : > { %v4448_v51 = vpop.eup %3630  ;;  %v1429_v57 = vadd.f32 %v4399_v2, %v1428_v50 }
 0x403   : > { %v1655_v19 = vmul.f32 %v4448_v51, %v4406_v30 }
 0x404   : > { %3632 = vtanh.f32 %v1429_v57  ;;  %1498 = vrot.lane.b32.xlu0 %v1429_v57, %s3824_s17 }
 0x405   : > { %v4456_v60 = vadd.f32 %v1655_v19, %v980_v16 }
 0x409   : > { %v1431_v26 = vpop.f32.mrf.mxu3 }
 0x40a   : > { %v4458_v18 = vpop.eup %3632  ;;  %v1432_v35 = vadd.f32 %v4399_v2, %v1431_v26  ;;  %v985_v26 = vmul.f32 %v4217_v29, %v4132_v34 }
 0x40b   : > { %v1656_v33 = vmul.f32 %v4458_v18, %v4406_v30 }
 0x40c   : > { %3634 = vtanh.f32 %v1432_v35  ;;  %1500 = vrot.lane.b32.xlu1 %v1432_v35, %s3824_s17 }
 0x40d   : > { %v4466_v21 = vadd.f32 %v1656_v33, %v981_v15 }
 0x411   : > { %v1433_v22 = vpop.f32.mrf.mxu3 }
 0x412   : > { %v4468_v23 = vpop.eup %3634  ;;  %v1434_v46 = vadd.f32 %v4399_v2, %v1433_v22 }
 0x413   : > { %v1657_v13 = vmul.f32 %v4468_v23, %v4406_v30 }
 0x414   : > { %3636 = vtanh.f32 %v1434_v46  ;;  %1502 = vrot.lane.b32.xlu2 %v1434_v46, %s3824_s17 }
 0x415   : > { %v4476_v0 = vadd.f32 %v1657_v13, %v982_v31  ;;  %v1572_v31 = vsub.f32 0.0, %v4418_v25 }
 0x419   : > { %v1436_v14 = vpop.f32.mrf.mxu3 }
 0x41a   : > { %v4478_v32 = vpop.eup %3636  ;;  %v1437_v41 = vadd.f32 %v4399_v2, %v1436_v14  ;;  %v1571_v14 = vsub.f32 0.0, %v4408_v48 }
 0x41b   : > { %v1658_v63 = vmul.f32 %v4478_v32, %v4406_v30 }
 0x41c   : > { %3638 = vtanh.f32 %v1437_v41  ;;  %1504 = vrot.lane.b32.xlu0 %v1437_v41, %s3824_s17  ;;  %v3521_v41 = vld [vmem:[%s5445_s3 + $0x38] sm:$0xff] }
 0x41d   : > { %v4486_v49 = vadd.f32 %v1658_v63, %v983_v20  ;;  %v1589_v20 = vmul.f32 1.442695, %v1572_v31  ;;  %1916 = vmatpush.bf16.msrb.mxu2 %v3521_v41 }
 0x421   : > { %v1438_v10 = vpop.f32.mrf.mxu3 }
 0x422   : > { %v4488_v43 = vpop.eup %3638  ;;  %v1439_v11 = vadd.f32 %v4399_v2, %v1438_v10  ;;  %v1587_v10 = vmul.f32 1.442695, %v1571_v14 }
 0x423   : > { %v1659_v50 = vmul.f32 %v4488_v43, %v4406_v30 }
 0x424   : > { %3640 = vtanh.f32 %v1439_v11  ;;  %1506 = vrot.lane.b32.xlu1 %v1439_v11, %s3824_s17 }
 0x425   : > { %v4496_v59 = vadd.f32 %v1659_v50, %v984_v44  ;;  %3642 = vpow2.f32 %v1589_v20 }
 0x426   : > { %3644 = vpow2.f32 %v1587_v10 }
 0x429   : > { %v1441_v57 = vpop.f32.mrf.mxu3 }
 0x42a   : > { %v4498_v16 = vpop.eup %3640  ;;  %v4501_v19 = vadd.f32 %v4399_v2, %v1441_v57  ;;  %v4541_v57 = vld [vmem:[%s5442_s0] ss:$0 sm:$0xff] }
 0x42b   : > { %v1660_v24 = vmul.f32 %v4498_v16, %v4406_v30  ;;  %v1012_v41 = vmul.f32 %v4541_v57, %v4156_v55  ;;  %v1011_v20 = vmul.f32 %v4541_v57, %v4154_v53 }
 0x42c   : > { %1508 = vrot.lane.b32.xlu2 %v4501_v19, %s3824_s17 }
 0x42d   : > { %v4509_v35 = vadd.f32 %v1660_v24, %v985_v26  ;;  %v3643_v24 = vpop.eup %3642 }
 0x42e   : > { %v3645_v31 = vpop.eup %3644 }
 0x431   : > { %v1443_v15 = vpop.f32.mrf.mxu3 }
 0x432   : > { %v4512_v33 = vadd.f32 %v4399_v2, %v1443_v15 }
 0x434   : > { %1510 = vrot.lane.b32.xlu0 %v4512_v33, %s3824_s17 }
 0x439   : > { %v1446_v22 = vpop.f32.mrf.mxu3 }
 0x43a   : > { %v4517_v46 = vadd.f32 %v4399_v2, %v1446_v22 }
 0x43c   : > { %1512 = vrot.lane.b32.xlu1 %v4517_v46, %s3824_s17 }
 0x43e   : > { %v1491_v63 = vpop.permute.xlu2 %1490 }
 0x43f   : > { %v1537_v11 = vsub.f32 %v4156_v55, %v1491_v63  ;;  %v1574_v55 = vsub.f32 0.0, %v4438_v27 }
 0x441   : > { %v1448_v29 = vpop.f32.mrf.mxu3  ;;  %v1556_v48 = vmul.f32 %v4406_v30, %v1537_v11 }
 0x442   : > { %v4523_v13 = vadd.f32 %v4399_v2, %v1448_v29 }
 0x443   : > { %v1620_v15 = vmul.f32 %v3643_v24, %v1556_v48 }
 0x444   : > { %1514 = vrot.lane.b32.xlu2 %v4523_v13, %s3824_s17 }
 0x445   : > { %v4554_v10 = vadd.f32 %v1620_v15, %v1012_v41  ;;  %v3520_v15 = vld [vmem:[%s5445_s3 + $0x30] sm:$0xff] }
 0x446   : > { %1917 = vmatpush.bf16.msrb.mxu2 %v3520_v15 }
 0x449   : > { %v1451_v44 = vpop.f32.mrf.mxu3 }
 0x44a   : > { %v4533_v25 = vadd.f32 %v4399_v2, %v1451_v44 }
 0x44c   : > { %1516 = vrot.lane.b32.xlu0 %v4533_v25, %s3824_s17 }
 0x44e   : > { %v1489_v50 = vpop.permute.xlu1 %1488 }
 0x44f   : > { %v1536_v26 = vsub.f32 %v4154_v53, %v1489_v50  ;;  %v1593_v53 = vmul.f32 1.442695, %v1574_v55  ;;  %v1576_v55 = vsub.f32 0.0, %v4458_v18 }
 0x451   : > { %v1555_v22 = vmul.f32 %v4406_v30, %v1536_v26  ;;  %v1453_v29 = vpop.f32.mrf.mxu3  ;;  %v1597_v15 = vmul.f32 1.442695, %v1576_v55 }
 0x452   : > { %v4546_v14 = vadd.f32 %v4399_v2, %v1453_v29  ;;  %v1573_v2 = vsub.f32 0.0, %v4428_v38 }
 0x453   : > { %v1619_v63 = vmul.f32 %v3645_v31, %v1555_v22 }
 0x454   : > { %1518 = vrot.lane.b32.xlu1 %v4546_v14, %s3824_s17  ;;  %v1591_v48 = vmul.f32 1.442695, %v1573_v2 }
 0x455   : > { %v4556_v11 = vadd.f32 %v1619_v63, %v1011_v20  ;;  %v1575_v20 = vsub.f32 0.0, %v4448_v51  ;;  %v1013_v63 = vmul.f32 %v4541_v57, %v4177_v37 }
 0x456   : > { %3646 = vpow2.f32 %v1591_v48 }
 0x457   : > { %v1699_v44 = vpack.c.bf16 %v4554_v10, %v4556_v11  ;;  %3648 = vpow2.f32 %v1593_v53  ;;  %v1595_v53 = vmul.f32 1.442695, %v1575_v20  ;;  %v1015_v20 = vmul.f32 %v4541_v57, %v4205_v12 }
 0x459   : > { %3363 = vmatmul.msk.bf16.vlgmr.msrb.gmra.mxu1 %vm372_vm0, %v1699_v44  ;;  %v1014_v44 = vmul.f32 %v4541_v57, %v4179_v40  ;;  %3650 = vpow2.f32 %v1595_v53 }
 0x45a   : > { %3652 = vpow2.f32 %v1597_v15 }
 0x45c   : > { %v3647_v38 = vpop.eup %3646 }
 0x45d   : > { %v3649_v41 = vpop.eup %3648 }
 0x45e   : > { %v1493_v50 = vpop.permute.xlu0 %1492 }
 0x45f   : > { %v1538_v26 = vsub.f32 %v4177_v37, %v1493_v50 }
 0x461   : > { %v1557_v24 = vmul.f32 %v4406_v30, %v1538_v26  ;;  %v1497_v26 = vpop.permute.xlu2 %1496 }
 0x462   : > { %v1540_v51 = vsub.f32 %v4205_v12, %v1497_v26 }
 0x463   : > { %v1621_v31 = vmul.f32 %v3647_v38, %v1557_v24 }
 0x464   : > { %v1559_v37 = vmul.f32 %v4406_v30, %v1540_v51 }
 0x465   : > { %v4576_v48 = vadd.f32 %v1621_v31, %v1013_v63  ;;  %v1016_v63 = vmul.f32 %v4541_v57, %v4202_v62 }
 0x466   : > { %v1495_v22 = vpop.permute.xlu1 %1494 }
 0x467   : > { %v1539_v29 = vsub.f32 %v4179_v40, %v1495_v22  ;;  %v3651_v22 = vpop.eup %3650 }
 0x468   : > { %v1623_v38 = vmul.f32 %v3651_v22, %v1559_v37  ;;  %v3519_v37 = vld [vmem:[%s5445_s3 + $0x28] sm:$0xff] }
 0x469   : > { %v1558_v27 = vmul.f32 %v4406_v30, %v1539_v29  ;;  %v1577_v29 = vsub.f32 0.0, %v4468_v23  ;;  %1918 = vmatpush.bf16.msrb.mxu2 %v3519_v37  ;;  %v1020_v37 = vmul.f32 %v4541_v57, %v4254_v54 }
 0x46a   : > { %v4593_v55 = vadd.f32 %v1623_v38, %v1015_v20  ;;  %v1017_v38 = vmul.f32 %v4541_v57, %v4228_v4  ;;  %v1580_v20 = vsub.f32 0.0, %v4498_v16 }
 0x46b   : > { %v1622_v2 = vmul.f32 %v3649_v41, %v1558_v27  ;;  %v3653_v27 = vpop.eup %3652  ;;  %v1578_v41 = vsub.f32 0.0, %v4478_v32 }
 0x46d   : > { %v4578_v50 = vadd.f32 %v1622_v2, %v1014_v44  ;;  %v1599_v2 = vmul.f32 1.442695, %v1577_v29  ;;  %v1601_v26 = vmul.f32 1.442695, %v1578_v41 }
 0x46e   : > { %v1503_v23 = vpop.permute.xlu2 %1502 }
 0x46f   : > { %v1700_v24 = vpack.c.bf16 %v4578_v50, %v4576_v48  ;;  %3654 = vpow2.f32 %v1599_v2  ;;  %v1543_v12 = vsub.f32 %v4230_v5, %v1503_v23  ;;  %v1605_v23 = vmul.f32 1.442695, %v1580_v20 }
 0x470   : > { %3656 = vpow2.f32 %v1601_v26 }
 0x471   : > { %3364 = vmatmul.msk.bf16.gmra.mxu1 %vm372_vm0, %v1700_v24  ;;  %v1562_v51 = vmul.f32 %v4406_v30, %v1543_v12  ;;  %3658 = vtanh.f32 %v4501_v19 }
 0x476   : > { %v1499_v40 = vpop.permute.xlu0 %1498 }
 0x477   : > { %v1541_v18 = vsub.f32 %v4202_v62, %v1499_v40  ;;  %v3655_v40 = vpop.eup %3654 }
 0x478   : > { %v3657_v22 = vpop.eup %3656 }
 0x479   : > { %v1560_v31 = vmul.f32 %v4406_v30, %v1541_v18  ;;  %v1626_v29 = vmul.f32 %v3657_v22, %v1562_v51  ;;  %v4624_v16 = vpop.eup %3658 }
 0x47a   : > { %v1581_v51 = vsub.f32 0.0, %v4624_v16 }
 0x47b   : > { %v1624_v44 = vmul.f32 %v3653_v27, %v1560_v31  ;;  %v1579_v31 = vsub.f32 0.0, %v4488_v43  ;;  %v1018_v27 = vmul.f32 %v4541_v57, %v4230_v5 }
 0x47d   : > { %v4595_v53 = vadd.f32 %v1624_v44, %v1016_v63  ;;  %v4615_v63 = vadd.f32 %v1626_v29, %v1018_v27  ;;  %v1603_v44 = vmul.f32 1.442695, %v1579_v31 }
 0x47e   : > { %v1501_v24 = vpop.permute.xlu1 %1500 }
 0x47f   : > { %v1542_v15 = vsub.f32 %v4228_v4, %v1501_v24  ;;  %v1701_v32 = vpack.c.bf16 %v4595_v53, %v4593_v55  ;;  %3660 = vpow2.f32 %v1603_v44 }
 0x480   : > { %3662 = vtanh.f32 %v4512_v33  ;;  %v1019_v33 = vmul.f32 %v4541_v57, %v4252_v28 }
 0x481   : > { %3365 = vmatmul.msk.bf16.gmra.mxu1 %vm372_vm0, %v1701_v32  ;;  %v1561_v62 = vmul.f32 %v4406_v30, %v1542_v15  ;;  %3664 = vpow2.f32 %v1605_v23 }
 0x482   : > { %3666 = vtanh.f32 %v4517_v46  ;;  %v3518_v46 = vld [vmem:[%s5445_s3 + $0x20] sm:$0xff] }
 0x483   : > { %v1625_v18 = vmul.f32 %v3655_v40, %v1561_v62  ;;  %3668 = vtanh.f32 %v4523_v13  ;;  %1919 = vmatpush.bf16.msrb.mxu2 %v3518_v46 }
 0x485   : > { %v4612_v41 = vadd.f32 %v1625_v18, %v1017_v38  ;;  %v3661_v15 = vpop.eup %3660  ;;  %v1607_v38 = vmul.f32 1.442695, %v1581_v51 }
 0x486   : > { %v4627_v32 = vpop.eup %3662  ;;  %v1509_v31 = vpop.permute.xlu2 %1508 }
 0x487   : > { %v1702_v26 = vpack.c.bf16 %v4615_v63, %v4612_v41  ;;  %v3665_v62 = vpop.eup %3664  ;;  %v1582_v18 = vsub.f32 0.0, %v4627_v32  ;;  %3670 = vpow2.f32 %v1607_v38 }
 0x489   : > { %v1609_v20 = vmul.f32 1.442695, %v1582_v18 }
 0x48b   : > { %3672 = vpow2.f32 %v1609_v20 }
 0x48e   : > { %v1505_v2 = vpop.permute.xlu0 %1504 }
 0x48f   : > { %v1544_v4 = vsub.f32 %v4252_v28, %v1505_v2  ;;  %v1546_v28 = vsub.f32 %v4276_v61, %v1509_v31 }
 0x491   : > { %3366 = vmatmul.msk.bf16.gmra.mxu1 %vm372_vm0, %v1702_v26  ;;  %v1563_v5 = vmul.f32 %v4406_v30, %v1544_v4  ;;  %v1565_v44 = vmul.f32 %v4406_v30, %v1546_v28 }
 0x493   : > { %v1627_v12 = vmul.f32 %v3661_v15, %v1563_v5 }
 0x495   : > { %v4636_v22 = vadd.f32 %v1627_v12, %v1019_v33  ;;  %v1021_v12 = vmul.f32 %v4541_v57, %v4276_v61 }
 0x496   : > { %v1507_v43 = vpop.permute.xlu1 %1506 }
 0x497   : > { %v1545_v24 = vsub.f32 %v4254_v54, %v1507_v43  ;;  %v4646_v54 = vpop.eup %3666 }
 0x498   : > { %v4652_v26 = vpop.eup %3668  ;;  %v1583_v4 = vsub.f32 0.0, %v4646_v54 }
 0x499   : > { %v1564_v19 = vmul.f32 %v4406_v30, %v1545_v24  ;;  %v3671_v13 = vpop.eup %3670  ;;  %v1584_v15 = vsub.f32 0.0, %v4652_v26 }
 0x49a   : > { %v1629_v5 = vmul.f32 %v3671_v13, %v1565_v44  ;;  %v3673_v24 = vpop.eup %3672  ;;  %v1611_v51 = vmul.f32 1.442695, %v1583_v4  ;;  %v1023_v13 = vmul.f32 %v4541_v57, %v4301_v56 }
 0x49b   : > { %v1628_v40 = vmul.f32 %v3665_v62, %v1564_v19  ;;  %v1022_v19 = vmul.f32 %v4541_v57, %v4274_v3 }
 0x49c   : > { %v4662_v33 = vadd.f32 %v1629_v5, %v1021_v12  ;;  %3674 = vpow2.f32 %v1611_v51 }
 0x49d   : > { %v4638_v29 = vadd.f32 %v1628_v40, %v1020_v37  ;;  %v1613_v40 = vmul.f32 1.442695, %v1584_v15 }
 0x49e   : > { %v1515_v18 = vpop.permute.xlu2 %1514 }
 0x49f   : > { %v1703_v27 = vpack.c.bf16 %v4638_v29, %v4636_v22  ;;  %v1549_v61 = vsub.f32 %v4303_v36, %v1515_v18  ;;  %3676 = vpow2.f32 %v1613_v40 }
 0x4a0   : > { %3678 = vtanh.f32 %v4533_v25  ;;  %v1024_v25 = vmul.f32 %v4541_v57, %v4303_v36 }
 0x4a1   : > { %3367 = vmatmul.msk.bf16.gmra.mxu1 %vm372_vm0, %v1703_v27  ;;  %3680 = vtanh.f32 %v4546_v14  ;;  %v1568_v20 = vmul.f32 %v4406_v30, %v1549_v61  ;;  %v1025_v61 = vmul.f32 %v4541_v57, %v4316_v17 }
 0x4a2   : > { %v3675_v28 = vpop.eup %3674 }
 0x4a5   : > { %v3677_v46 = vpop.eup %3676 }
 0x4a6   : > { %v1511_v2 = vpop.permute.xlu0 %1510 }
 0x4a7   : > { %v1547_v23 = vsub.f32 %v4274_v3, %v1511_v2  ;;  %v4675_v2 = vpop.eup %3678 }
 0x4a8   : > { %v1585_v4 = vsub.f32 0.0, %v4675_v2  ;;  %v4680_v5 = vpop.eup %3680 }
 0x4a9   : > { %v1566_v43 = vmul.f32 %v4406_v30, %v1547_v23  ;;  %v1632_v23 = vmul.f32 %v3677_v46, %v1568_v20  ;;  %v1586_v14 = vsub.f32 0.0, %v4680_v5 }
 0x4aa   : > { %v1615_v15 = vmul.f32 1.442695, %v1585_v4 }
 0x4ab   : > { %v1630_v62 = vmul.f32 %v3673_v24, %v1566_v43  ;;  %v4687_v24 = vadd.f32 %v1632_v23, %v1024_v25 }
 0x4ac   : > { %3682 = vpow2.f32 %v1615_v15 }
 0x4ad   : > { %v4664_v37 = vadd.f32 %v1630_v62, %v1022_v19  ;;  %v1617_v62 = vmul.f32 1.442695, %v1586_v14 }
 0x4ae   : > { %v1513_v38 = vpop.permute.xlu1 %1512 }
 0x4af   : > { %v1548_v31 = vsub.f32 %v4301_v56, %v1513_v38  ;;  %v1704_v27 = vpack.c.bf16 %v4664_v37, %v4662_v33  ;;  %3684 = vpow2.f32 %v1617_v62 }
 0x4b1   : > { %3368 = vmatmul.msk.bf16.gmra.mxu1 %vm372_vm0, %v1704_v27  ;;  %v1567_v3 = vmul.f32 %v4406_v30, %v1548_v31 }
 0x4b2   : > { %v3683_v18 = vpop.eup %3682 }
 0x4b3   : > { %v1631_v44 = vmul.f32 %v3675_v28, %v1567_v3  ;;  %v1026_v3 = vmul.f32 %v4541_v57, %v4318_v1 }
 0x4b5   : > { %v4684_v43 = vadd.f32 %v1631_v44, %v1023_v13  ;;  %v3685_v27 = vpop.eup %3684  ;;  %v4710_v13 = vld [vmem:[%s5444_s2 + $0x1] ss:$0 sm:$0xff] }
 0x4b7   : > { %v1705_v19 = vpack.c.bf16 %v4687_v24, %v4684_v43 }
 0x4be   : > { %v1517_v12 = vpop.permute.xlu0 %1516 }
 0x4bf   : > { %v1550_v56 = vsub.f32 %v4316_v17, %v1517_v12  ;;  %v3525_v17 = vld [vmem:[%s5447_s5 + $0x38] sm:$0xff] }
 0x4c0   : > { %2083 = vmatpush.bf16.msra.mxu0 %v3525_v17 }
 0x4c1   : > { %3369 = vmatmul.msk.bf16.gmra.mxu1 %vm372_vm0, %v1705_v19  ;;  %v1569_v36 = vmul.f32 %v4406_v30, %v1550_v56 }
 0x4c3   : > { %v1633_v38 = vmul.f32 %v3683_v18, %v1569_v36 }
 0x4c5   : > { %v4700_v28 = vadd.f32 %v1633_v38, %v1025_v61  ;;  %v3524_v38 = vld [vmem:[%s5447_s5 + $0x30] sm:$0xff] }
 0x4c6   : > { %v1519_v51 = vpop.permute.xlu1 %1518  ;;  %2084 = vmatpush.bf16.msra.mxu0 %v3524_v38 }
 0x4c7   : > { %v1551_v40 = vsub.f32 %v4318_v1, %v1519_v51 }
 0x4c9   : > { %v1570_v31 = vmul.f32 %v4406_v30, %v1551_v40 }
 0x4cb   : > { %v1634_v20 = vmul.f32 %v3685_v27, %v1570_v31 }
 0x4cd   : > { %v4702_v44 = vadd.f32 %v1634_v20, %v1026_v3 }
 0x4cf   : > { %v1706_v46 = vpack.c.bf16 %v4702_v44, %v4700_v28 }
 0x4d1   : > { %3370 = vmatmul.msk.bf16.gmra.mxu1 %vm372_vm0, %v1706_v46 }
 0x4d6   : > { %v1754_v23 = vpop.f32.mrf.mxu1 }
 0x4d7   : > { %v1755_v1 = vadd.f32 %v4710_v13, %v1754_v23 }
 0x4d9   : > { %v1810_v4 = vmul.f32 0.01, %v1755_v1  ;;  %vm1794_vm10 = vcmp.gt.f32.partialorder %v1755_v1, 0.0 }
 0x4db   : > { %v1826_v15 = vsel %vm1794_vm10, %v1755_v1, %v1810_v4 }
 0x4de   : > { %v1756_v57 = vpop.f32.mrf.mxu1 }
 0x4df   : > { %v1757_v25 = vadd.f32 %v4710_v13, %v1756_v57 }
 0x4e1   : > { %vm1795_vm11 = vcmp.gt.f32.partialorder %v1757_v25, 0.0  ;;  %v1811_v14 = vmul.f32 0.01, %v1757_v25 }
 0x4e3   : > { %v1827_v12 = vsel %vm1795_vm11, %v1757_v25, %v1811_v14 }
 0x4e4   : > { %v1842_v19 = vpack.c.bf16 %v1827_v12, %v1826_v15 }
 0x4e6   : > { %3396 = vmatmul.msk.bf16.vlgmr.msrb.gmra.mxu2 %vm540_vm3, %v1842_v19 }
 0x4ee   : > { %v1759_v62 = vpop.f32.mrf.mxu1 }
 0x4ef   : > { %v1760_v56 = vadd.f32 %v4710_v13, %v1759_v62 }
 0x4f1   : > { %v1812_v51 = vmul.f32 0.01, %v1760_v56  ;;  %vm1796_vm12 = vcmp.gt.f32.partialorder %v1760_v56, 0.0 }
 0x4f3   : > { %v1828_v31 = vsel %vm1796_vm12, %v1760_v56, %v1812_v51 }
 0x4f6   : > { %v1761_v36 = vpop.f32.mrf.mxu1 }
 0x4f7   : > { %v1762_v40 = vadd.f32 %v4710_v13, %v1761_v36 }
 0x4f9   : > { %vm1797_vm13 = vcmp.gt.f32.partialorder %v1762_v40, 0.0  ;;  %v1813_v18 = vmul.f32 0.01, %v1762_v40 }
 0x4fb   : > { %v1829_v27 = vsel %vm1797_vm13, %v1762_v40, %v1813_v18  ;;  %v3523_v18 = vld [vmem:[%s5447_s5 + $0x28] sm:$0xff] }
 0x4fc   : > { %v1843_v61 = vpack.c.bf16 %v1829_v27, %v1828_v31  ;;  %2085 = vmatpush.bf16.msra.mxu0 %v3523_v18 }
 0x4fe   : > { %v1764_v3 = vpop.f32.mrf.mxu1  ;;  %3397 = vmatmul.msk.bf16.gmra.mxu2 %vm540_vm3, %v1843_v61 }
 0x4ff   : > { %v1765_v20 = vadd.f32 %v4710_v13, %v1764_v3 }
 0x501   : > { %v1814_v23 = vmul.f32 0.01, %v1765_v20  ;;  %vm1798_vm14 = vcmp.gt.f32.partialorder %v1765_v20, 0.0 }
 0x503   : > { %v1830_v57 = vsel %vm1798_vm14, %v1765_v20, %v1814_v23 }
 0x506   : > { %v1766_v46 = vpop.f32.mrf.mxu1 }
 0x507   : > { %v1767_v17 = vadd.f32 %v4710_v13, %v1766_v46 }
 0x509   : > { %vm1799_vm15 = vcmp.gt.f32.partialorder %v1767_v17, 0.0  ;;  %v1815_v1 = vmul.f32 0.01, %v1767_v17 }
 0x50b   : > { %v1831_v4 = vsel %vm1799_vm15, %v1767_v17, %v1815_v1 }
 0x50c   : > { %v1844_v25 = vpack.c.bf16 %v1831_v4, %v1830_v57 }
 0x50e   : > { %v1769_v14 = vpop.f32.mrf.mxu1  ;;  %3398 = vmatmul.msk.bf16.gmra.mxu2 %vm540_vm3, %v1844_v25 }
 0x50f   : > { %v1770_v15 = vadd.f32 %v4710_v13, %v1769_v14 }
 0x511   : > { %v1816_v19 = vmul.f32 0.01, %v1770_v15  ;;  %vm1800_vm1 = vcmp.gt.f32.partialorder %v1770_v15, 0.0 }
 0x513   : > { %v1832_v36 = vsel %vm1800_vm1, %v1770_v15, %v1816_v19 }
 0x516   : > { %v1771_v12 = vpop.f32.mrf.mxu1 }
 0x517   : > { %v1772_v62 = vadd.f32 %v4710_v13, %v1771_v12 }
 0x519   : > { %vm1801_vm2 = vcmp.gt.f32.partialorder %v1772_v62, 0.0  ;;  %v1817_v56 = vmul.f32 0.01, %v1772_v62 }
 0x51b   : > { %v1833_v51 = vsel %vm1801_vm2, %v1772_v62, %v1817_v56  ;;  %v3522_v56 = vld [vmem:[%s5447_s5 + $0x20] sm:$0xff] }
 0x51c   : > { %v1845_v40 = vpack.c.bf16 %v1833_v51, %v1832_v36  ;;  %2086 = vmatpush.bf16.msra.mxu0 %v3522_v56 }
 0x51e   : > { %v1774_v38 = vpop.f32.mrf.mxu1  ;;  %3399 = vmatmul.msk.bf16.gmra.mxu2 %vm540_vm3, %v1845_v40 }
 0x51f   : > { %v1775_v31 = vadd.f32 %v4710_v13, %v1774_v38 }
 0x521   : > { %v1818_v61 = vmul.f32 0.01, %v1775_v31  ;;  %vm1802_vm4 = vcmp.gt.f32.partialorder %v1775_v31, 0.0 }
 0x523   : > { %v1834_v46 = vsel %vm1802_vm4, %v1775_v31, %v1818_v61 }
 0x526   : > { %v1776_v27 = vpop.f32.mrf.mxu1 }
 0x527   : > { %v1777_v3 = vadd.f32 %v4710_v13, %v1776_v27 }
 0x529   : > { %vm1803_vm5 = vcmp.gt.f32.partialorder %v1777_v3, 0.0  ;;  %v1819_v20 = vmul.f32 0.01, %v1777_v3 }
 0x52b   : > { %v1835_v23 = vsel %vm1803_vm5, %v1777_v3, %v1819_v20 }
 0x52c   : > { %v1846_v17 = vpack.c.bf16 %v1835_v23, %v1834_v46 }
 0x52e   : > { %v1779_v1 = vpop.f32.mrf.mxu1  ;;  %3400 = vmatmul.msk.bf16.gmra.mxu2 %vm540_vm3, %v1846_v17 }
 0x52f   : > { %v1780_v57 = vadd.f32 %v4710_v13, %v1779_v1 }
 0x531   : > { %v1820_v25 = vmul.f32 0.01, %v1780_v57  ;;  %vm1804_vm6 = vcmp.gt.f32.partialorder %v1780_v57, 0.0 }
 0x533   : > { %v1836_v12 = vsel %vm1804_vm6, %v1780_v57, %v1820_v25 }
 0x536   : > { %v1781_v4 = vpop.f32.mrf.mxu1 }
 0x537   : > { %v1782_v14 = vadd.f32 %v4710_v13, %v1781_v4 }
 0x539   : > { %vm1805_vm7 = vcmp.gt.f32.partialorder %v1782_v14, 0.0  ;;  %v1821_v15 = vmul.f32 0.01, %v1782_v14 }
 0x53b   : > { %v1837_v19 = vsel %vm1805_vm7, %v1782_v14, %v1821_v15 }
 0x53c   : > { %v1847_v62 = vpack.c.bf16 %v1837_v19, %v1836_v12  ;;  %v4751_v12 = vld [vmem:[%s5446_s4 + $0x1] ss:$0 sm:$0xff] }
 0x53e   : > { %v1784_v36 = vpop.f32.mrf.mxu1  ;;  %3401 = vmatmul.msk.bf16.gmra.mxu2 %vm540_vm3, %v1847_v62 }
 0x53f   : > { %v1785_v51 = vadd.f32 %v4710_v13, %v1784_v36 }
 0x541   : > { %v1822_v18 = vmul.f32 0.01, %v1785_v51  ;;  %vm1806_vm8 = vcmp.gt.f32.partialorder %v1785_v51, 0.0 }
 0x543   : > { %v1838_v27 = vsel %vm1806_vm8, %v1785_v51, %v1822_v18 }
 0x546   : > { %v1786_v40 = vpop.f32.mrf.mxu1 }
 0x547   : > { %v1787_v38 = vadd.f32 %v4710_v13, %v1786_v40 }
 0x549   : > { %vm1807_vm9 = vcmp.gt.f32.partialorder %v1787_v38, 0.0  ;;  %v1823_v31 = vmul.f32 0.01, %v1787_v38 }
 0x54b   : > { %v1839_v61 = vsel %vm1807_vm9, %v1787_v38, %v1823_v31 }
 0x54c   : > { %v1848_v3 = vpack.c.bf16 %v1839_v61, %v1838_v27 }
 0x54e   : > { %v1789_v20 = vpop.f32.mrf.mxu1  ;;  %3402 = vmatmul.msk.bf16.gmra.mxu2 %vm540_vm3, %v1848_v3 }
 0x54f   : > { %v1790_v46 = vadd.f32 %v4710_v13, %v1789_v20 }
 0x551   : > { %v1824_v17 = vmul.f32 0.01, %v1790_v46  ;;  %vm1808_vm10 = vcmp.gt.f32.partialorder %v1790_v46, 0.0 }
 0x553   : > { %v1840_v4 = vsel %vm1808_vm10, %v1790_v46, %v1824_v17 }
 0x556   : > { %v1791_v23 = vpop.f32.mrf.mxu1 }
 0x557   : > { %v1792_v1 = vadd.f32 %v4710_v13, %v1791_v23 }
 0x559   : > { %vm1809_vm11 = vcmp.gt.f32.partialorder %v1792_v1, 0.0  ;;  %v1825_v57 = vmul.f32 0.01, %v1792_v1 }
 0x55b   : > { %v1841_v25 = vsel %vm1809_vm11, %v1792_v1, %v1825_v57 }
 0x55c   : > { %v1849_v14 = vpack.c.bf16 %v1841_v25, %v1840_v4 }
 0x55e   : > { %3403 = vmatmul.msk.bf16.gmra.mxu2 %vm540_vm3, %v1849_v14 }
 0x569   : > { %v1921_v15 = vpop.f32.mrf.mxu2 }
 0x56a   : > { %v1922_v19 = vadd.f32 %v4751_v12, %v1921_v15 }
 0x56c   : > { %v1977_v56 = vmul.f32 0.01, %v1922_v19  ;;  %vm1961_vm12 = vcmp.gt.f32.partialorder %v1922_v19, 0.0 }
 0x56e   : > { %v1993_v51 = vsel %vm1961_vm12, %v1922_v19, %v1977_v56 }
 0x571   : > { %v1923_v62 = vpop.f32.mrf.mxu2 }
 0x572   : > { %v1924_v13 = vadd.f32 %v4751_v12, %v1923_v62 }
 0x574   : > { %vm1962_vm13 = vcmp.gt.f32.partialorder %v1924_v13, 0.0  ;;  %v1978_v36 = vmul.f32 0.01, %v1924_v13 }
 0x576   : > { %v1994_v40 = vsel %vm1962_vm13, %v1924_v13, %v1978_v36 }
 0x577   : > { %v2009_v18 = vpack.c.bf16 %v1994_v40, %v1993_v51 }
 0x579   : > { %3429 = vmatmul.msk.bf16.vlgmr.msra.gmra.mxu0 %vm540_vm3, %v2009_v18 }
 0x581   : > { %v1926_v38 = vpop.f32.mrf.mxu2 }
 0x582   : > { %v1927_v31 = vadd.f32 %v4751_v12, %v1926_v38 }
 0x584   : > { %v1979_v61 = vmul.f32 0.01, %v1927_v31  ;;  %vm1963_vm14 = vcmp.gt.f32.partialorder %v1927_v31, 0.0 }
 0x586   : > { %v1995_v46 = vsel %vm1963_vm14, %v1927_v31, %v1979_v61 }
 0x589   : > { %v1928_v27 = vpop.f32.mrf.mxu2 }
 0x58a   : > { %v1929_v3 = vadd.f32 %v4751_v12, %v1928_v27 }
 0x58c   : > { %vm1964_vm15 = vcmp.gt.f32.partialorder %v1929_v3, 0.0  ;;  %v1980_v20 = vmul.f32 0.01, %v1929_v3 }
 0x58e   : > { %v1996_v23 = vsel %vm1964_vm15, %v1929_v3, %v1980_v20 }
 0x58f   : > { %v2010_v17 = vpack.c.bf16 %v1996_v23, %v1995_v46 }
 0x591   : > { %v1931_v1 = vpop.f32.mrf.mxu2  ;;  %3430 = vmatmul.msk.bf16.gmra.mxu0 %vm540_vm3, %v2010_v17 }
 0x592   : > { %v1932_v57 = vadd.f32 %v4751_v12, %v1931_v1 }
 0x594   : > { %v1981_v25 = vmul.f32 0.01, %v1932_v57  ;;  %vm1965_vm1 = vcmp.gt.f32.partialorder %v1932_v57, 0.0 }
 0x596   : > { %v1997_v19 = vsel %vm1965_vm1, %v1932_v57, %v1981_v25 }
 0x599   : > { %v1933_v4 = vpop.f32.mrf.mxu2 }
 0x59a   : > { %v1934_v14 = vadd.f32 %v4751_v12, %v1933_v4 }
 0x59c   : > { %vm1966_vm2 = vcmp.gt.f32.partialorder %v1934_v14, 0.0  ;;  %v1982_v15 = vmul.f32 0.01, %v1934_v14 }
 0x59e   : > { %v1998_v62 = vsel %vm1966_vm2, %v1934_v14, %v1982_v15 }
 0x59f   : > { %v2011_v56 = vpack.c.bf16 %v1998_v62, %v1997_v19 }
 0x5a1   : > { %v1936_v13 = vpop.f32.mrf.mxu2  ;;  %3431 = vmatmul.msk.bf16.gmra.mxu0 %vm540_vm3, %v2011_v56 }
 0x5a2   : > { %v1937_v36 = vadd.f32 %v4751_v12, %v1936_v13 }
 0x5a4   : > { %v1983_v40 = vmul.f32 0.01, %v1937_v36  ;;  %vm1967_vm4 = vcmp.gt.f32.partialorder %v1937_v36, 0.0 }
 0x5a6   : > { %v1999_v31 = vsel %vm1967_vm4, %v1937_v36, %v1983_v40 }
 0x5a9   : > { %v1938_v51 = vpop.f32.mrf.mxu2 }
 0x5aa   : > { %v1939_v18 = vadd.f32 %v4751_v12, %v1938_v51 }
 0x5ac   : > { %vm1968_vm5 = vcmp.gt.f32.partialorder %v1939_v18, 0.0  ;;  %v1984_v38 = vmul.f32 0.01, %v1939_v18 }
 0x5ae   : > { %v2000_v27 = vsel %vm1968_vm5, %v1939_v18, %v1984_v38 }
 0x5af   : > { %v2012_v61 = vpack.c.bf16 %v2000_v27, %v1999_v31 }
 0x5b1   : > { %v1941_v3 = vpop.f32.mrf.mxu2  ;;  %3432 = vmatmul.msk.bf16.gmra.mxu0 %vm540_vm3, %v2012_v61 }
 0x5b2   : > { %v1942_v20 = vadd.f32 %v4751_v12, %v1941_v3 }
 0x5b4   : > { %v1985_v23 = vmul.f32 0.01, %v1942_v20  ;;  %vm1969_vm6 = vcmp.gt.f32.partialorder %v1942_v20, 0.0 }
 0x5b6   : > { %v2001_v57 = vsel %vm1969_vm6, %v1942_v20, %v1985_v23 }
 0x5b9   : > { %v1943_v46 = vpop.f32.mrf.mxu2 }
 0x5ba   : > { %v1944_v17 = vadd.f32 %v4751_v12, %v1943_v46 }
 0x5bc   : > { %vm1970_vm7 = vcmp.gt.f32.partialorder %v1944_v17, 0.0  ;;  %v1986_v1 = vmul.f32 0.01, %v1944_v17 }
 0x5be   : > { %v2002_v4 = vsel %vm1970_vm7, %v1944_v17, %v1986_v1 }
 0x5bf   : > { %v2013_v25 = vpack.c.bf16 %v2002_v4, %v2001_v57 }
 0x5c1   : > { %v1946_v14 = vpop.f32.mrf.mxu2  ;;  %3433 = vmatmul.msk.bf16.gmra.mxu0 %vm540_vm3, %v2013_v25 }
 0x5c2   : > { %v1947_v15 = vadd.f32 %v4751_v12, %v1946_v14 }
 0x5c4   : > { %v1987_v62 = vmul.f32 0.01, %v1947_v15  ;;  %vm1971_vm8 = vcmp.gt.f32.partialorder %v1947_v15, 0.0 }
 0x5c6   : > { %v2003_v36 = vsel %vm1971_vm8, %v1947_v15, %v1987_v62  ;;  %v3526_v15 = vld [vmem:[%s5443_s1] sm:$0xff] }
 0x5c7   : > { %2419 = vmatpush.bf16.msra.mxu3 %v3526_v15 }
 0x5c9   : > { %v1948_v19 = vpop.f32.mrf.mxu2 }
 0x5ca   : > { %v1949_v56 = vadd.f32 %v4751_v12, %v1948_v19 }
 0x5cc   : > { %vm1972_vm9 = vcmp.gt.f32.partialorder %v1949_v56, 0.0  ;;  %v1988_v13 = vmul.f32 0.01, %v1949_v56 }
 0x5ce   : > { %v2004_v51 = vsel %vm1972_vm9, %v1949_v56, %v1988_v13  ;;  %v4783_v13 = vld [vmem:[%s5448_s6 + $0x1] ss:$0 sm:$0xff] }
 0x5cf   : > { %v2014_v40 = vpack.c.bf16 %v2004_v51, %v2003_v36 }
 0x5d1   : > { %v1951_v18 = vpop.f32.mrf.mxu2  ;;  %3434 = vmatmul.msk.bf16.gmra.mxu0 %vm540_vm3, %v2014_v40 }
 0x5d2   : > { %v1952_v38 = vadd.f32 %v4751_v12, %v1951_v18 }
 0x5d4   : > { %v1989_v27 = vmul.f32 0.01, %v1952_v38  ;;  %vm1973_vm10 = vcmp.gt.f32.partialorder %v1952_v38, 0.0 }
 0x5d6   : > { %v2005_v20 = vsel %vm1973_vm10, %v1952_v38, %v1989_v27 }
 0x5d9   : > { %v1953_v31 = vpop.f32.mrf.mxu2 }
 0x5da   : > { %v1954_v61 = vadd.f32 %v4751_v12, %v1953_v31 }
 0x5dc   : > { %vm1974_vm11 = vcmp.gt.f32.partialorder %v1954_v61, 0.0  ;;  %v1990_v3 = vmul.f32 0.01, %v1954_v61 }
 0x5de   : > { %v2006_v46 = vsel %vm1974_vm11, %v1954_v61, %v1990_v3 }
 0x5df   : > { %v2015_v23 = vpack.c.bf16 %v2006_v46, %v2005_v20 }
 0x5e1   : > { %v1956_v17 = vpop.f32.mrf.mxu2  ;;  %3435 = vmatmul.msk.bf16.gmra.mxu0 %vm540_vm3, %v2015_v23 }
 0x5e2   : > { %v1957_v1 = vadd.f32 %v4751_v12, %v1956_v17 }
 0x5e4   : > { %v1991_v4 = vmul.f32 0.01, %v1957_v1  ;;  %vm1975_vm12 = vcmp.gt.f32.partialorder %v1957_v1, 0.0 }
 0x5e6   : > { %v2007_v19 = vsel %vm1975_vm12, %v1957_v1, %v1991_v4 }
 0x5e9   : > { %v1958_v57 = vpop.f32.mrf.mxu2 }
 0x5ea   : > { %v1959_v25 = vadd.f32 %v4751_v12, %v1958_v57 }
 0x5ec   : > { %vm1976_vm13 = vcmp.gt.f32.partialorder %v1959_v25, 0.0  ;;  %v1992_v14 = vmul.f32 0.01, %v1959_v25 }
 0x5ee   : > { %v2008_v62 = vsel %vm1976_vm13, %v1959_v25, %v1992_v14 }
 0x5ef   : > { %v2016_v56 = vpack.c.bf16 %v2008_v62, %v2007_v19 }
 0x5f1   : > { %3436 = vmatmul.msk.bf16.gmra.mxu0 %vm540_vm3, %v2016_v56 }
 0x5f6   : > { %v2088_v36 = vpop.f32.mrf.mxu0 }
 0x5f7   : > { %v2089_v12 = vadd.f32 %v4783_v13, %v2088_v36 }
 0x5f9   : > { %3686 = vtanh.f32 %v2089_v12  ;;  %2160 = vrot.lane.b32.xlu2 %v2089_v12, %s3824_s17 }
 0x5fe   : > { %v2090_v51 = vpop.f32.mrf.mxu0 }
 0x5ff   : > { %v4787_v40 = vpop.eup %3686  ;;  %v2091_v18 = vadd.f32 %v4783_v13, %v2090_v51 }
 0x600   : > { %v2320_v38 = vmul.f32 %v4787_v40, %v4132_v34 }
 0x601   : > { %3688 = vtanh.f32 %v2091_v18  ;;  %2162 = vrot.lane.b32.xlu0 %v2091_v18, %s3824_s17 }
 0x602   : > { %v4794_v31 = vadd.f32 %v2320_v38, %v4416_v7 }
 0x607   : > { %v4796_v27 = vpop.eup %3688 }
 0x608   : > { %v2321_v61 = vmul.f32 %v4796_v27, %v4132_v34 }
 0x60a   : > { %v4801_v3 = vadd.f32 %v2321_v61, %v4426_v6 }
 0x60e   : > { %v2093_v20 = vpop.f32.mrf.mxu0 }
 0x60f   : > { %v2094_v46 = vadd.f32 %v4783_v13, %v2093_v20 }
 0x611   : > { %3690 = vtanh.f32 %v2094_v46  ;;  %2164 = vrot.lane.b32.xlu1 %v2094_v46, %s3824_s17 }
 0x616   : > { %v2095_v23 = vpop.f32.mrf.mxu0 }
 0x617   : > { %v4805_v17 = vpop.eup %3690  ;;  %v2096_v7 = vadd.f32 %v4783_v13, %v2095_v23 }
 0x618   : > { %v2322_v1 = vmul.f32 %v4805_v17, %v4132_v34 }
 0x619   : > { %3692 = vtanh.f32 %v2096_v7  ;;  %2166 = vrot.lane.b32.xlu2 %v2096_v7, %s3824_s17 }
 0x61a   : > { %v4812_v6 = vadd.f32 %v2322_v1, %v4436_v9 }
 0x61e   : > { %v2098_v57 = vpop.f32.mrf.mxu0 }
 0x61f   : > { %v4814_v4 = vpop.eup %3692  ;;  %v2099_v25 = vadd.f32 %v4783_v13, %v2098_v57 }
 0x620   : > { %v2323_v14 = vmul.f32 %v4814_v4, %v4132_v34 }
 0x621   : > { %3694 = vtanh.f32 %v2099_v25  ;;  %2168 = vrot.lane.b32.xlu0 %v2099_v25, %s3824_s17 }
 0x622   : > { %v4821_v15 = vadd.f32 %v2323_v14, %v4446_v39 }
 0x626   : > { %v2100_v19 = vpop.f32.mrf.mxu0 }
 0x627   : > { %v4823_v62 = vpop.eup %3694  ;;  %v2101_v9 = vadd.f32 %v4783_v13, %v2100_v19 }
 0x628   : > { %v2324_v56 = vmul.f32 %v4823_v62, %v4132_v34 }
 0x629   : > { %3696 = vtanh.f32 %v2101_v9  ;;  %2170 = vrot.lane.b32.xlu1 %v2101_v9, %s3824_s17 }
 0x62a   : > { %v4830_v36 = vadd.f32 %v2324_v56, %v4456_v60 }
 0x62e   : > { %v2103_v12 = vpop.f32.mrf.mxu0 }
 0x62f   : > { %v4832_v51 = vpop.eup %3696  ;;  %v2104_v39 = vadd.f32 %v4783_v13, %v2103_v12 }
 0x630   : > { %v2325_v18 = vmul.f32 %v4832_v51, %v4132_v34 }
 0x631   : > { %3698 = vtanh.f32 %v2104_v39  ;;  %2172 = vrot.lane.b32.xlu2 %v2104_v39, %s3824_s17 }
 0x632   : > { %v4839_v38 = vadd.f32 %v2325_v18, %v4466_v21 }
 0x636   : > { %v2105_v61 = vpop.f32.mrf.mxu0 }
 0x637   : > { %v4841_v20 = vpop.eup %3698  ;;  %v2106_v60 = vadd.f32 %v4783_v13, %v2105_v61 }
 0x638   : > { %v2326_v46 = vmul.f32 %v4841_v20, %v4132_v34 }
 0x639   : > { %3700 = vtanh.f32 %v2106_v60  ;;  %2174 = vrot.lane.b32.xlu0 %v2106_v60, %s3824_s17  ;;  %v1661_v60 = vmul.f32 %v4624_v16, %v4406_v30  ;;  %v1662_v16 = vmul.f32 %v4627_v32, %v4406_v30  ;;  %v1663_v32 = vmul.f32 %v4646_v54, %v4406_v30 }
 0x63a   : > { %v4848_v23 = vadd.f32 %v2326_v46, %v4476_v0 }
 0x63e   : > { %v2108_v7 = vpop.f32.mrf.mxu0 }
 0x63f   : > { %v4850_v1 = vpop.eup %3700  ;;  %v2109_v21 = vadd.f32 %v4783_v13, %v2108_v7 }
 0x640   : > { %v2327_v57 = vmul.f32 %v4850_v1, %v4132_v34 }
 0x641   : > { %3702 = vtanh.f32 %v2109_v21  ;;  %2176 = vrot.lane.b32.xlu1 %v2109_v21, %s3824_s17 }
 0x642   : > { %v4857_v25 = vadd.f32 %v2327_v57, %v4486_v49 }
 0x646   : > { %v2110_v14 = vpop.f32.mrf.mxu0 }
 0x647   : > { %v4859_v19 = vpop.eup %3702  ;;  %v2111_v0 = vadd.f32 %v4783_v13, %v2110_v14 }
 0x648   : > { %v2328_v9 = vmul.f32 %v4859_v19, %v4132_v34 }
 0x649   : > { %3704 = vtanh.f32 %v2111_v0  ;;  %2178 = vrot.lane.b32.xlu2 %v2111_v0, %s3824_s17 }
 0x64a   : > { %v4866_v56 = vadd.f32 %v2328_v9, %v4496_v59  ;;  %v986_v59 = vmul.f32 %v4234_v45, %v4132_v34  ;;  %v987_v45 = vmul.f32 %v4238_v58, %v4132_v34  ;;  %v988_v58 = vmul.f32 %v4265_v42, %v4132_v34 }
 0x64c   : > { %v1677_v57 = vadd.f32 %v1661_v60, %v986_v59 }
 0x64e   : > { %v2113_v12 = vpop.f32.mrf.mxu0 }
 0x64f   : > { %v4868_v39 = vpop.eup %3704  ;;  %v2114_v49 = vadd.f32 %v4783_v13, %v2113_v12 }
 0x650   : > { %v2329_v18 = vmul.f32 %v4868_v39, %v4132_v34 }
 0x651   : > { %3706 = vtanh.f32 %v2114_v49  ;;  %2180 = vrot.lane.b32.xlu0 %v2114_v49, %s3824_s17  ;;  %v1678_v49 = vadd.f32 %v1662_v16, %v987_v45  ;;  %v1679_v16 = vadd.f32 %v1663_v32, %v988_v58 }
 0x652   : > { %v4875_v61 = vadd.f32 %v2329_v18, %v4509_v35 }
 0x656   : > { %v2115_v46 = vpop.f32.mrf.mxu0 }
 0x657   : > { %v4881_v7 = vpop.eup %3706  ;;  %v2116_v21 = vadd.f32 %v4783_v13, %v2115_v46 }
 0x658   : > { %v2330_v14 = vmul.f32 %v4881_v7, %v4132_v34 }
 0x659   : > { %3708 = vtanh.f32 %v2116_v21  ;;  %2182 = vrot.lane.b32.xlu1 %v2116_v21, %s3824_s17  ;;  %v2240_v21 = vsub.f32 0.0, %v4787_v40 }
 0x65a   : > { %v4887_v35 = vadd.f32 %v2330_v14, %v1677_v57  ;;  %v2241_v14 = vsub.f32 0.0, %v4796_v27  ;;  %v989_v27 = vmul.f32 %v4272_v47, %v4132_v34 }
 0x65b   : > { %v2256_v45 = vmul.f32 1.442695, %v2240_v21 }
 0x65c   : > { %v2258_v42 = vmul.f32 1.442695, %v2241_v14 }
 0x65e   : > { %v2118_v0 = vpop.f32.mrf.mxu0 }
 0x65f   : > { %v4893_v9 = vpop.eup %3708  ;;  %v2119_v12 = vadd.f32 %v4783_v13, %v2118_v0 }
 0x660   : > { %v2331_v18 = vmul.f32 %v4893_v9, %v4132_v34 }
 0x661   : > { %3710 = vtanh.f32 %v2119_v12  ;;  %2184 = vrot.lane.b32.xlu2 %v2119_v12, %s3824_s17  ;;  %v2161_v12 = vpop.permute.xlu2 %2160 }
 0x662   : > { %v4899_v60 = vadd.f32 %v2331_v18, %v1678_v49  ;;  %v1664_v49 = vmul.f32 %v4652_v26, %v4406_v30  ;;  %v2208_v40 = vsub.f32 %v4556_v11, %v2161_v12 }
 0x664   : > { %v1680_v58 = vadd.f32 %v1664_v49, %v989_v27  ;;  %v2224_v26 = vmul.f32 %v2208_v40, %v4132_v34  ;;  %v990_v40 = vmul.f32 %v4288_v52, %v4132_v34 }
 0x666   : > { %v2120_v46 = vpop.f32.mrf.mxu0 }
 0x667   : > { %v4905_v59 = vpop.eup %3710  ;;  %v2121_v57 = vadd.f32 %v4783_v13, %v2120_v46 }
 0x668   : > { %v2332_v0 = vmul.f32 %v4905_v59, %v4132_v34 }
 0x669   : > { %3712 = vtanh.f32 %v2121_v57  ;;  %2186 = vrot.lane.b32.xlu0 %v2121_v57, %s3824_s17  ;;  %v3530_v57 = vld [vmem:[%s5445_s3 + $0x18] sm:$0xff] }
 0x66a   : > { %v4913_v54 = vadd.f32 %v2332_v0, %v1679_v16  ;;  %3714 = vpow2.f32 %v2256_v45  ;;  %2581 = vmatpush.bf16.msra.mxu1 %v3530_v57  ;;  %v1665_v0 = vmul.f32 %v4675_v2, %v4406_v30 }
 0x66b   : > { %3716 = vpow2.f32 %v2258_v42 }
 0x66e   : > { %v2123_v18 = vpop.f32.mrf.mxu0 }
 0x66f   : > { %v4920_v32 = vpop.eup %3712  ;;  %v2124_v46 = vadd.f32 %v4783_v13, %v2123_v18 }
 0x670   : > { %v2333_v21 = vmul.f32 %v4920_v32, %v4132_v34  ;;  %v3715_v45 = vpop.eup %3714 }
 0x671   : > { %3718 = vtanh.f32 %v2124_v46  ;;  %2188 = vrot.lane.b32.xlu1 %v2124_v46, %s3824_s17  ;;  %v3717_v12 = vpop.eup %3716  ;;  %v2288_v42 = vmul.f32 %v3715_v45, %v2224_v26  ;;  %v2243_v46 = vsub.f32 0.0, %v4814_v4  ;;  %v2242_v4 = vsub.f32 0.0, %v4805_v17 }
 0x672   : > { %v4930_v47 = vadd.f32 %v2333_v21, %v1680_v58  ;;  %v4944_v58 = vld [vmem:[%s5442_s0 + $0x1] ss:$0 sm:$0xff] }
 0x673   : > { %v2163_v14 = vpop.permute.xlu0 %2162  ;;  %v1684_v2 = vmul.f32 %v4944_v58, %v4554_v10  ;;  %v1683_v26 = vmul.f32 %v4944_v58, %v4556_v11 }
 0x674   : > { %v2209_v16 = vsub.f32 %v4554_v10, %v2163_v14  ;;  %v1681_v14 = vadd.f32 %v1665_v0, %v990_v40  ;;  %v1666_v0 = vmul.f32 %v4680_v5, %v4406_v30 }
 0x676   : > { %v2225_v49 = vmul.f32 %v2209_v16, %v4132_v34  ;;  %v2125_v18 = vpop.f32.mrf.mxu0  ;;  %v4955_v16 = vadd.f32 %v2288_v42, %v1683_v26  ;;  %v991_v42 = vmul.f32 %v4292_v8, %v4132_v34 }
 0x677   : > { %v4938_v27 = vpop.eup %3718  ;;  %v2126_v21 = vadd.f32 %v4783_v13, %v2125_v18  ;;  %v2262_v13 = vmul.f32 1.442695, %v2243_v46  ;;  %v2167_v18 = vpop.permute.xlu2 %2166 }
 0x678   : > { %v2289_v57 = vmul.f32 %v3717_v12, %v2225_v49  ;;  %v2334_v52 = vmul.f32 %v4938_v27, %v4132_v34  ;;  %v2260_v12 = vmul.f32 1.442695, %v2242_v4  ;;  %v2211_v17 = vsub.f32 %v4578_v50, %v2167_v18 }
 0x679   : > { %3720 = vtanh.f32 %v2126_v21  ;;  %2190 = vrot.lane.b32.xlu2 %v2126_v21, %s3824_s17  ;;  %v1682_v40 = vadd.f32 %v1666_v0, %v991_v42  ;;  %v1686_v4 = vmul.f32 %v4944_v58, %v4578_v50  ;;  %v2245_v42 = vsub.f32 0.0, %v4832_v51  ;;  %v3529_v50 = vld [vmem:[%s5445_s3 + $0x10] sm:$0xff] }
 0x67a   : > { %v4957_v45 = vadd.f32 %v2289_v57, %v1684_v2  ;;  %v4959_v10 = vadd.f32 %v2334_v52, %v1681_v14  ;;  %3722 = vpow2.f32 %v2262_v13  ;;  %v2227_v2 = vmul.f32 %v2211_v17, %v4132_v34  ;;  %2582 = vmatpush.bf16.msra.mxu1 %v3529_v50 }
 0x67b   : > { %3724 = vpow2.f32 %v2260_v12  ;;  %v1685_v13 = vmul.f32 %v4944_v58, %v4576_v48  ;;  %v2244_v17 = vsub.f32 0.0, %v4823_v62 }
 0x67c   : > { %v2368_v11 = vpack.c.bf16 %v4957_v45, %v4955_v16 }
 0x67e   : > { %3441 = vmatmul.msk.bf16.vlgmr.msra.gmra.mxu3 %vm372_vm0, %v2368_v11 }
 0x67f   : > { %v4969_v49 = vpop.eup %3720 }
 0x680   : > { %v2335_v46 = vmul.f32 %v4969_v49, %v4132_v34  ;;  %v3723_v57 = vpop.eup %3722 }
 0x681   : > { %v2291_v14 = vmul.f32 %v3723_v57, %v2227_v2  ;;  %v3725_v8 = vpop.eup %3724 }
 0x682   : > { %v4974_v21 = vadd.f32 %v2335_v46, %v1682_v40  ;;  %v2264_v40 = vmul.f32 1.442695, %v2244_v17  ;;  %v2266_v46 = vmul.f32 1.442695, %v2245_v42 }
 0x683   : > { %v2165_v5 = vpop.permute.xlu1 %2164  ;;  %v4982_v11 = vadd.f32 %v2291_v14, %v1686_v4  ;;  %v1687_v4 = vmul.f32 %v4944_v58, %v4593_v55 }
 0x684   : > { %v2210_v26 = vsub.f32 %v4576_v48, %v2165_v5  ;;  %3726 = vpow2.f32 %v2264_v40 }
 0x685   : > { %3728 = vpow2.f32 %v2266_v46 }
 0x686   : > { %v2226_v52 = vmul.f32 %v2210_v26, %v4132_v34 }
 0x688   : > { %v2290_v18 = vmul.f32 %v3725_v8, %v2226_v52  ;;  %v2246_v8 = vsub.f32 0.0, %v4841_v20 }
 0x68a   : > { %v4984_v0 = vadd.f32 %v2290_v18, %v1685_v13  ;;  %v3727_v62 = vpop.eup %3726  ;;  %v1688_v13 = vmul.f32 %v4944_v58, %v4595_v53  ;;  %v2268_v50 = vmul.f32 1.442695, %v2246_v8 }
 0x68b   : > { %v3729_v52 = vpop.eup %3728  ;;  %v2173_v40 = vpop.permute.xlu2 %2172 }
 0x68c   : > { %v2369_v12 = vpack.c.bf16 %v4982_v11, %v4984_v0  ;;  %v2214_v20 = vsub.f32 %v4612_v41, %v2173_v40  ;;  %3730 = vpow2.f32 %v2268_v50 }
 0x68e   : > { %3442 = vmatmul.msk.bf16.gmra.mxu3 %vm372_vm0, %v2369_v12  ;;  %v2247_v12 = vsub.f32 0.0, %v4850_v1 }
 0x690   : > { %v2270_v46 = vmul.f32 1.442695, %v2247_v12 }
 0x692   : > { %3732 = vpow2.f32 %v2270_v46 }
 0x693   : > { %v2169_v48 = vpop.permute.xlu0 %2168 }
 0x694   : > { %v2212_v2 = vsub.f32 %v4593_v55, %v2169_v48  ;;  %v2230_v55 = vmul.f32 %v2214_v20, %v4132_v34 }
 0x696   : > { %v2228_v5 = vmul.f32 %v2212_v2, %v4132_v34  ;;  %v3731_v2 = vpop.eup %3730 }
 0x698   : > { %v2292_v14 = vmul.f32 %v3727_v62, %v2228_v5  ;;  %v2248_v5 = vsub.f32 0.0, %v4859_v19  ;;  %v3733_v62 = vpop.eup %3732  ;;  %v3528_v19 = vld [vmem:[%s5445_s3 + $0x8] sm:$0xff] }
 0x699   : > { %2583 = vmatpush.bf16.msra.mxu1 %v3528_v19 }
 0x69a   : > { %v5004_v17 = vadd.f32 %v2292_v14, %v1687_v4  ;;  %v2249_v14 = vsub.f32 0.0, %v4868_v39  ;;  %v2272_v4 = vmul.f32 1.442695, %v2248_v5  ;;  %v2250_v5 = vsub.f32 0.0, %v4881_v7 }
 0x69b   : > { %v2171_v26 = vpop.permute.xlu1 %2170 }
 0x69c   : > { %v2213_v57 = vsub.f32 %v4595_v53, %v2171_v26  ;;  %v2294_v26 = vmul.f32 %v3731_v2, %v2230_v55  ;;  %v2274_v12 = vmul.f32 1.442695, %v2249_v14  ;;  %3734 = vpow2.f32 %v2272_v4 }
 0x69d   : > { %v1691_v2 = vmul.f32 %v4944_v58, %v4636_v22 }
 0x69e   : > { %v2229_v51 = vmul.f32 %v2213_v57, %v4132_v34  ;;  %3736 = vpow2.f32 %v2274_v12 }
 0x6a0   : > { %v2293_v18 = vmul.f32 %v3729_v52, %v2229_v51  ;;  %v1689_v51 = vmul.f32 %v4944_v58, %v4612_v41  ;;  %v1690_v52 = vmul.f32 %v4944_v58, %v4615_v63 }
 0x6a2   : > { %v5006_v42 = vadd.f32 %v2293_v18, %v1688_v13  ;;  %v5021_v13 = vadd.f32 %v2294_v26, %v1689_v51  ;;  %v3735_v20 = vpop.eup %3734  ;;  %v1692_v26 = vmul.f32 %v4944_v58, %v4638_v29  ;;  %v2276_v51 = vmul.f32 1.442695, %v2250_v5 }
 0x6a3   : > { %v2179_v50 = vpop.permute.xlu2 %2178 }
 0x6a4   : > { %v2370_v48 = vpack.c.bf16 %v5006_v42, %v5004_v17  ;;  %3738 = vpow2.f32 %v2276_v51  ;;  %v2254_v51 = vsub.f32 0.0, %v4938_v27 }
 0x6a6   : > { %3443 = vmatmul.msk.bf16.gmra.mxu3 %vm372_vm0, %v2370_v48 }
 0x6ab   : > { %v2175_v53 = vpop.permute.xlu0 %2174 }
 0x6ac   : > { %v2215_v1 = vsub.f32 %v4615_v63, %v2175_v53  ;;  %v2217_v63 = vsub.f32 %v4638_v29, %v2179_v50  ;;  %v3737_v53 = vpop.eup %3736  ;;  %v3527_v29 = vld [vmem:[%s5445_s3] sm:$0xff] }
 0x6ad   : > { %2584 = vmatpush.bf16.msra.mxu1 %v3527_v29  ;;  %v3739_v12 = vpop.eup %3738  ;;  %v1696_v29 = vmul.f32 %v4944_v58, %v4687_v24 }
 0x6ae   : > { %v2231_v57 = vmul.f32 %v2215_v1, %v4132_v34  ;;  %v2233_v46 = vmul.f32 %v2217_v63, %v4132_v34  ;;  %v1693_v63 = vmul.f32 %v4944_v58, %v4662_v33 }
 0x6b0   : > { %v2295_v8 = vmul.f32 %v3733_v62, %v2231_v57  ;;  %v2297_v1 = vmul.f32 %v3737_v53, %v2233_v46  ;;  %v2251_v62 = vsub.f32 0.0, %v4893_v9 }
 0x6b2   : > { %v5023_v18 = vadd.f32 %v2295_v8, %v1690_v52  ;;  %v5043_v14 = vadd.f32 %v2297_v1, %v1692_v26  ;;  %v2278_v4 = vmul.f32 1.442695, %v2251_v62 }
 0x6b3   : > { %v2177_v40 = vpop.permute.xlu1 %2176 }
 0x6b4   : > { %v2216_v39 = vsub.f32 %v4636_v22, %v2177_v40  ;;  %v2371_v41 = vpack.c.bf16 %v5023_v18, %v5021_v13  ;;  %3740 = vpow2.f32 %v2278_v4 }
 0x6b6   : > { %3444 = vmatmul.msk.bf16.gmra.mxu3 %vm372_vm0, %v2371_v41  ;;  %v2232_v48 = vmul.f32 %v2216_v39, %v4132_v34  ;;  %v2252_v41 = vsub.f32 0.0, %v4905_v59 }
 0x6b8   : > { %v2296_v55 = vmul.f32 %v3735_v20, %v2232_v48  ;;  %v1694_v48 = vmul.f32 %v4944_v58, %v4664_v37  ;;  %v2253_v20 = vsub.f32 0.0, %v4920_v32  ;;  %v2280_v1 = vmul.f32 1.442695, %v2252_v41 }
 0x6ba   : > { %v5040_v57 = vadd.f32 %v2296_v55, %v1691_v2  ;;  %v3741_v39 = vpop.eup %3740  ;;  %v2282_v26 = vmul.f32 1.442695, %v2253_v20  ;;  %3742 = vpow2.f32 %v2280_v1 }
 0x6bb   : > { %v2185_v2 = vpop.permute.xlu2 %2184 }
 0x6bc   : > { %v2372_v8 = vpack.c.bf16 %v5043_v14, %v5040_v57  ;;  %v2220_v59 = vsub.f32 %v4684_v43, %v2185_v2  ;;  %3744 = vpow2.f32 %v2282_v26  ;;  %v1697_v2 = vmul.f32 %v4944_v58, %v4700_v28 }
 0x6c0   : > { %v3743_v62 = vpop.eup %3742 }
 0x6c2   : > { %v3745_v4 = vpop.eup %3744 }
 0x6c3   : > { %v2181_v52 = vpop.permute.xlu0 %2180 }
 0x6c4   : > { %v2218_v19 = vsub.f32 %v4662_v33, %v2181_v52  ;;  %v2236_v33 = vmul.f32 %v2220_v59, %v4132_v34 }
 0x6c6   : > { %3445 = vmatmul.msk.bf16.gmra.mxu3 %vm372_vm0, %v2372_v8  ;;  %v2234_v22 = vmul.f32 %v2218_v19, %v4132_v34  ;;  %v2300_v52 = vmul.f32 %v3743_v62, %v2236_v33  ;;  %v2255_v19 = vsub.f32 0.0, %v4969_v49 }
 0x6c8   : > { %v2298_v50 = vmul.f32 %v3739_v12, %v2234_v22  ;;  %v1695_v22 = vmul.f32 %v4944_v58, %v4684_v43 }
 0x6ca   : > { %v5061_v55 = vadd.f32 %v2298_v50, %v1693_v63  ;;  %v5078_v12 = vadd.f32 %v2300_v52, %v1695_v22 }
 0x6cb   : > { %v2183_v7 = vpop.permute.xlu1 %2182 }
 0x6cc   : > { %v2219_v9 = vsub.f32 %v4664_v37, %v2183_v7 }
 0x6ce   : > { %v2235_v40 = vmul.f32 %v2219_v9, %v4132_v34  ;;  %v2284_v9 = vmul.f32 1.442695, %v2254_v51 }
 0x6d0   : > { %v2299_v46 = vmul.f32 %v3741_v39, %v2235_v40  ;;  %v2286_v40 = vmul.f32 1.442695, %v2255_v19  ;;  %3746 = vpow2.f32 %v2284_v9 }
 0x6d2   : > { %v5063_v53 = vadd.f32 %v2299_v46, %v1694_v48  ;;  %3748 = vpow2.f32 %v2286_v40 }
 0x6d3   : > { %v2191_v27 = vpop.permute.xlu2 %2190 }
 0x6d4   : > { %v2373_v5 = vpack.c.bf16 %v5063_v53, %v5061_v55  ;;  %v2223_v43 = vsub.f32 %v4702_v44, %v2191_v27 }
 0x6d6   : > { %3446 = vmatmul.msk.bf16.gmra.mxu3 %vm372_vm0, %v2373_v5  ;;  %v2239_v63 = vmul.f32 %v2223_v43, %v4132_v34  ;;  %v3747_v48 = vpop.eup %3746  ;;  %v1698_v5 = vmul.f32 %v4944_v58, %v4702_v44 }
 0x6d8   : > { %v3749_v20 = vpop.eup %3748 }
 0x6d9   : > { %v2303_v1 = vmul.f32 %v3749_v20, %v2239_v63 }
 0x6db   : > { %v2187_v37 = vpop.permute.xlu0 %2186  ;;  %v5095_v59 = vadd.f32 %v2303_v1, %v1698_v5 }
 0x6dc   : > { %v2221_v32 = vsub.f32 %v4687_v24, %v2187_v37 }
 0x6de   : > { %v2237_v8 = vmul.f32 %v2221_v32, %v4132_v34 }
 0x6e0   : > { %v2301_v7 = vmul.f32 %v3745_v4, %v2237_v8 }
 0x6e2   : > { %v5080_v50 = vadd.f32 %v2301_v7, %v1696_v29 }
 0x6e3   : > { %v2189_v39 = vpop.permute.xlu1 %2188 }
 0x6e4   : > { %v2222_v41 = vsub.f32 %v4700_v28, %v2189_v39  ;;  %v2374_v49 = vpack.c.bf16 %v5080_v50, %v5078_v12  ;;  %v5106_v28 = vld [vmem:[%s5444_s2] ss:$0 sm:$0xff] }
 0x6e6   : > { %3447 = vmatmul.msk.bf16.gmra.mxu3 %vm372_vm0, %v2374_v49  ;;  %v2238_v24 = vmul.f32 %v2222_v41, %v4132_v34  ;;  %v3534_v34 = vld [vmem:[%s5447_s5 + $0x18] sm:$0xff]  ;;  %v3533_v41 = vld [vmem:[%s5447_s5 + $0x10] sm:$0xff] }
 0x6e7   : > { %2746 = vmatpush.bf16.msra.mxu2 %v3534_v34 }
 0x6e8   : > { %v2302_v46 = vmul.f32 %v3747_v48, %v2238_v24 }
 0x6ea   : > { %v5093_v26 = vadd.f32 %v2302_v46, %v1697_v2 }
 0x6eb   : > { %2747 = vmatpush.bf16.msra.mxu2 %v3533_v41 }
 0x6ec   : > { %v2375_v33 = vpack.c.bf16 %v5095_v59, %v5093_v26 }
 0x6f6   : > { %3448 = vmatmul.msk.bf16.gmra.mxu3 %vm372_vm0, %v2375_v33 }
 0x701   : > { %v2421_v37 = vpop.f32.mrf.mxu3 }
 0x702   : > { %v2422_v44 = vadd.f32 %v5106_v28, %v2421_v37  ;;  %v3532_v37 = vld [vmem:[%s5447_s5 + $0x8] sm:$0xff] }
 0x703   : > { %2748 = vmatpush.bf16.msra.mxu2 %v3532_v37 }
 0x704   : > { %v2477_v32 = vmul.f32 0.01, %v2422_v44  ;;  %vm2461_vm14 = vcmp.gt.f32.partialorder %v2422_v44, 0.0 }
 0x706   : > { %v2493_v52 = vsel %vm2461_vm14, %v2422_v44, %v2477_v32 }
 0x709   : > { %v2423_v58 = vpop.f32.mrf.mxu3 }
 0x70a   : > { %v2424_v62 = vadd.f32 %v5106_v28, %v2423_v58 }
 0x70c   : > { %vm2462_vm15 = vcmp.gt.f32.partialorder %v2424_v62, 0.0  ;;  %v2478_v51 = vmul.f32 0.01, %v2424_v62 }
 0x70e   : > { %v2494_v8 = vsel %vm2462_vm15, %v2424_v62, %v2478_v51 }
 0x70f   : > { %v2509_v4 = vpack.c.bf16 %v2494_v8, %v2493_v52 }
 0x711   : > { %v2426_v19 = vpop.f32.mrf.mxu3  ;;  %3465 = vmatmul.msk.bf16.vlgmr.msra.gmra.mxu1 %vm540_vm3, %v2509_v4 }
 0x712   : > { %v2427_v22 = vadd.f32 %v5106_v28, %v2426_v19 }
 0x714   : > { %v2479_v7 = vmul.f32 0.01, %v2427_v22  ;;  %vm2463_vm1 = vcmp.gt.f32.partialorder %v2427_v22, 0.0 }
 0x716   : > { %v2495_v27 = vsel %vm2463_vm1, %v2427_v22, %v2479_v7 }
 0x719   : > { %v2428_v29 = vpop.f32.mrf.mxu3 }
 0x71a   : > { %v2429_v9 = vadd.f32 %v5106_v28, %v2428_v29 }
 0x71c   : > { %vm2464_vm2 = vcmp.gt.f32.partialorder %v2429_v9, 0.0  ;;  %v2480_v40 = vmul.f32 0.01, %v2429_v9 }
 0x71e   : > { %v2496_v39 = vsel %vm2464_vm2, %v2429_v9, %v2480_v40 }
 0x71f   : > { %v2510_v49 = vpack.c.bf16 %v2496_v39, %v2495_v27 }
 0x721   : > { %3466 = vmatmul.msk.bf16.gmra.mxu1 %vm540_vm3, %v2510_v49 }
 0x729   : > { %v2431_v43 = vpop.f32.mrf.mxu3 }
 0x72a   : > { %v2432_v24 = vadd.f32 %v5106_v28, %v2431_v43  ;;  %v3531_v43 = vld [vmem:[%s5447_s5] sm:$0xff] }
 0x72b   : > { %2749 = vmatpush.bf16.msra.mxu2 %v3531_v43 }
 0x72c   : > { %v2481_v48 = vmul.f32 0.01, %v2432_v24  ;;  %vm2465_vm4 = vcmp.gt.f32.partialorder %v2432_v24, 0.0 }
 0x72e   : > { %v2497_v1 = vsel %vm2465_vm4, %v2432_v24, %v2481_v48 }
 0x731   : > { %v2433_v63 = vpop.f32.mrf.mxu3 }
 0x732   : > { %v2434_v46 = vadd.f32 %v5106_v28, %v2433_v63 }
 0x734   : > { %vm2466_vm5 = vcmp.gt.f32.partialorder %v2434_v46, 0.0  ;;  %v2482_v20 = vmul.f32 0.01, %v2434_v46 }
 0x736   : > { %v2498_v2 = vsel %vm2466_vm5, %v2434_v46, %v2482_v20 }
 0x737   : > { %v2511_v5 = vpack.c.bf16 %v2498_v2, %v2497_v1 }
 0x739   : > { %v2436_v33 = vpop.f32.mrf.mxu3  ;;  %3467 = vmatmul.msk.bf16.gmra.mxu1 %vm540_vm3, %v2511_v5 }
 0x73a   : > { %v2437_v34 = vadd.f32 %v5106_v28, %v2436_v33 }
 0x73c   : > { %v2483_v58 = vmul.f32 0.01, %v2437_v34  ;;  %vm2467_vm6 = vcmp.gt.f32.partialorder %v2437_v34, 0.0 }
 0x73e   : > { %v2499_v51 = vsel %vm2467_vm6, %v2437_v34, %v2483_v58 }
 0x741   : > { %v2438_v44 = vpop.f32.mrf.mxu3 }
 0x742   : > { %v2439_v32 = vadd.f32 %v5106_v28, %v2438_v44 }
 0x744   : > { %vm2468_vm7 = vcmp.gt.f32.partialorder %v2439_v32, 0.0  ;;  %v2484_v62 = vmul.f32 0.01, %v2439_v32 }
 0x746   : > { %v2500_v52 = vsel %vm2468_vm7, %v2439_v32, %v2484_v62 }
 0x747   : > { %v2512_v8 = vpack.c.bf16 %v2500_v52, %v2499_v51 }
 0x749   : > { %v2441_v4 = vpop.f32.mrf.mxu3  ;;  %3468 = vmatmul.msk.bf16.gmra.mxu1 %vm540_vm3, %v2512_v8 }
 0x74a   : > { %v2442_v19 = vadd.f32 %v5106_v28, %v2441_v4 }
 0x74c   : > { %v2485_v29 = vmul.f32 0.01, %v2442_v19  ;;  %vm2469_vm8 = vcmp.gt.f32.partialorder %v2442_v19, 0.0 }
 0x74e   : > { %v2501_v40 = vsel %vm2469_vm8, %v2442_v19, %v2485_v29 }
 0x751   : > { %v2443_v22 = vpop.f32.mrf.mxu3 }
 0x752   : > { %v2444_v7 = vadd.f32 %v5106_v28, %v2443_v22 }
 0x754   : > { %vm2470_vm9 = vcmp.gt.f32.partialorder %v2444_v7, 0.0  ;;  %v2486_v9 = vmul.f32 0.01, %v2444_v7 }
 0x756   : > { %v2502_v27 = vsel %vm2470_vm9, %v2444_v7, %v2486_v9 }
 0x757   : > { %v2513_v39 = vpack.c.bf16 %v2502_v27, %v2501_v40 }
 0x759   : > { %v2446_v41 = vpop.f32.mrf.mxu3  ;;  %3469 = vmatmul.msk.bf16.gmra.mxu1 %vm540_vm3, %v2513_v39  ;;  %v5144_v39 = vld [vmem:[%s5446_s4] ss:$0 sm:$0xff] }
 0x75a   : > { %v2447_v49 = vadd.f32 %v5106_v28, %v2446_v41 }
 0x75c   : > { %v2487_v63 = vmul.f32 0.01, %v2447_v49  ;;  %vm2471_vm10 = vcmp.gt.f32.partialorder %v2447_v49, 0.0 }
 0x75e   : > { %v2503_v20 = vsel %vm2471_vm10, %v2447_v49, %v2487_v63 }
 0x761   : > { %v2448_v24 = vpop.f32.mrf.mxu3 }
 0x762   : > { %v2449_v48 = vadd.f32 %v5106_v28, %v2448_v24 }
 0x764   : > { %vm2472_vm11 = vcmp.gt.f32.partialorder %v2449_v48, 0.0  ;;  %v2488_v46 = vmul.f32 0.01, %v2449_v48 }
 0x766   : > { %v2504_v1 = vsel %vm2472_vm11, %v2449_v48, %v2488_v46 }
 0x767   : > { %v2514_v2 = vpack.c.bf16 %v2504_v1, %v2503_v20 }
 0x769   : > { %v2451_v5 = vpop.f32.mrf.mxu3  ;;  %3470 = vmatmul.msk.bf16.gmra.mxu1 %vm540_vm3, %v2514_v2 }
 0x76a   : > { %v2452_v33 = vadd.f32 %v5106_v28, %v2451_v5 }
 0x76c   : > { %v2489_v37 = vmul.f32 0.01, %v2452_v33  ;;  %vm2473_vm12 = vcmp.gt.f32.partialorder %v2452_v33, 0.0 }
 0x76e   : > { %v2505_v32 = vsel %vm2473_vm12, %v2452_v33, %v2489_v37 }
 0x771   : > { %v2453_v34 = vpop.f32.mrf.mxu3 }
 0x772   : > { %v2454_v44 = vadd.f32 %v5106_v28, %v2453_v34 }
 0x774   : > { %vm2474_vm13 = vcmp.gt.f32.partialorder %v2454_v44, 0.0  ;;  %v2490_v58 = vmul.f32 0.01, %v2454_v44 }
 0x776   : > { %v2506_v62 = vsel %vm2474_vm13, %v2454_v44, %v2490_v58 }
 0x777   : > { %v2515_v51 = vpack.c.bf16 %v2506_v62, %v2505_v32 }
 0x779   : > { %v2456_v52 = vpop.f32.mrf.mxu3  ;;  %3471 = vmatmul.msk.bf16.gmra.mxu1 %vm540_vm3, %v2515_v51 }
 0x77a   : > { %v2457_v8 = vadd.f32 %v5106_v28, %v2456_v52 }
 0x77c   : > { %v2491_v19 = vmul.f32 0.01, %v2457_v8  ;;  %vm2475_vm14 = vcmp.gt.f32.partialorder %v2457_v8, 0.0 }
 0x77e   : > { %v2507_v7 = vsel %vm2475_vm14, %v2457_v8, %v2491_v19 }
 0x781   : > { %v2458_v4 = vpop.f32.mrf.mxu3 }
 0x782   : > { %v2459_v22 = vadd.f32 %v5106_v28, %v2458_v4 }
 0x784   : > { %vm2476_vm15 = vcmp.gt.f32.partialorder %v2459_v22, 0.0  ;;  %v2492_v29 = vmul.f32 0.01, %v2459_v22 }
 0x786   : > { %v2508_v9 = vsel %vm2476_vm15, %v2459_v22, %v2492_v29 }
 0x787   : > { %v2516_v40 = vpack.c.bf16 %v2508_v9, %v2507_v7 }
 0x789   : > { %3472 = vmatmul.msk.bf16.gmra.mxu1 %vm540_vm3, %v2516_v40 }
 0x78e   : > { %v2586_v27 = vpop.f32.mrf.mxu1 }
 0x78f   : > { %v2587_v41 = vadd.f32 %v5144_v39, %v2586_v27 }
 0x791   : > { %v2642_v43 = vmul.f32 0.01, %v2587_v41  ;;  %vm2626_vm1 = vcmp.gt.f32.partialorder %v2587_v41, 0.0 }
 0x793   : > { %v2658_v63 = vsel %vm2626_vm1, %v2587_v41, %v2642_v43 }
 0x796   : > { %v2588_v49 = vpop.f32.mrf.mxu1 }
 0x797   : > { %v2589_v28 = vadd.f32 %v5144_v39, %v2588_v49 }
 0x799   : > { %vm2627_vm2 = vcmp.gt.f32.partialorder %v2589_v28, 0.0  ;;  %v2643_v24 = vmul.f32 0.01, %v2589_v28 }
 0x79b   : > { %v2659_v48 = vsel %vm2627_vm2, %v2589_v28, %v2643_v24 }
 0x79c   : > { %v2674_v46 = vpack.c.bf16 %v2659_v48, %v2658_v63 }
 0x79e   : > { %v2591_v20 = vpop.f32.mrf.mxu1  ;;  %3489 = vmatmul.msk.bf16.vlgmr.msra.gmra.mxu2 %vm540_vm3, %v2674_v46 }
 0x79f   : > { %v2592_v1 = vadd.f32 %v5144_v39, %v2591_v20 }
 0x7a1   : > { %v2644_v5 = vmul.f32 0.01, %v2592_v1  ;;  %vm2628_vm4 = vcmp.gt.f32.partialorder %v2592_v1, 0.0 }
 0x7a3   : > { %v2660_v37 = vsel %vm2628_vm4, %v2592_v1, %v2644_v5 }
 0x7a6   : > { %v2593_v2 = vpop.f32.mrf.mxu1 }
 0x7a7   : > { %v2594_v33 = vadd.f32 %v5144_v39, %v2593_v2 }
 0x7a9   : > { %vm2629_vm5 = vcmp.gt.f32.partialorder %v2594_v33, 0.0  ;;  %v2645_v34 = vmul.f32 0.01, %v2594_v33 }
 0x7ab   : > { %v2661_v44 = vsel %vm2629_vm5, %v2594_v33, %v2645_v34 }
 0x7ac   : > { %v2675_v58 = vpack.c.bf16 %v2661_v44, %v2660_v37 }
 0x7ae   : > { %3490 = vmatmul.msk.bf16.gmra.mxu2 %vm540_vm3, %v2675_v58 }
 0x7b6   : > { %v2596_v32 = vpop.f32.mrf.mxu1 }
 0x7b7   : > { %v2597_v62 = vadd.f32 %v5144_v39, %v2596_v32 }
 0x7b9   : > { %v2646_v52 = vmul.f32 0.01, %v2597_v62  ;;  %vm2630_vm6 = vcmp.gt.f32.partialorder %v2597_v62, 0.0 }
 0x7bb   : > { %v2662_v19 = vsel %vm2630_vm6, %v2597_v62, %v2646_v52 }
 0x7be   : > { %v2598_v51 = vpop.f32.mrf.mxu1 }
 0x7bf   : > { %v2599_v8 = vadd.f32 %v5144_v39, %v2598_v51 }
 0x7c1   : > { %vm2631_vm7 = vcmp.gt.f32.partialorder %v2599_v8, 0.0  ;;  %v2647_v4 = vmul.f32 0.01, %v2599_v8 }
 0x7c3   : > { %v2663_v22 = vsel %vm2631_vm7, %v2599_v8, %v2647_v4 }
 0x7c4   : > { %v2676_v29 = vpack.c.bf16 %v2663_v22, %v2662_v19 }
 0x7c6   : > { %v2601_v7 = vpop.f32.mrf.mxu1  ;;  %3491 = vmatmul.msk.bf16.gmra.mxu2 %vm540_vm3, %v2676_v29 }
 0x7c7   : > { %v2602_v9 = vadd.f32 %v5144_v39, %v2601_v7 }
 0x7c9   : > { %v2648_v27 = vmul.f32 0.01, %v2602_v9  ;;  %vm2632_vm8 = vcmp.gt.f32.partialorder %v2602_v9, 0.0 }
 0x7cb   : > { %v2664_v43 = vsel %vm2632_vm8, %v2602_v9, %v2648_v27 }
 0x7ce   : > { %v2603_v40 = vpop.f32.mrf.mxu1 }
 0x7cf   : > { %v2604_v41 = vadd.f32 %v5144_v39, %v2603_v40 }
 0x7d1   : > { %vm2633_vm9 = vcmp.gt.f32.partialorder %v2604_v41, 0.0  ;;  %v2649_v49 = vmul.f32 0.01, %v2604_v41 }
 0x7d3   : > { %v2665_v28 = vsel %vm2633_vm9, %v2604_v41, %v2649_v49 }
 0x7d4   : > { %v2677_v24 = vpack.c.bf16 %v2665_v28, %v2664_v43 }
 0x7d6   : > { %v2606_v63 = vpop.f32.mrf.mxu1  ;;  %3492 = vmatmul.msk.bf16.gmra.mxu2 %vm540_vm3, %v2677_v24 }
 0x7d7   : > { %v2607_v48 = vadd.f32 %v5144_v39, %v2606_v63 }
 0x7d9   : > { %v2650_v20 = vmul.f32 0.01, %v2607_v48  ;;  %vm2634_vm10 = vcmp.gt.f32.partialorder %v2607_v48, 0.0 }
 0x7db   : > { %v2666_v5 = vsel %vm2634_vm10, %v2607_v48, %v2650_v20 }
 0x7de   : > { %v2608_v46 = vpop.f32.mrf.mxu1 }
 0x7df   : > { %v2609_v1 = vadd.f32 %v5144_v39, %v2608_v46 }
 0x7e1   : > { %vm2635_vm11 = vcmp.gt.f32.partialorder %v2609_v1, 0.0  ;;  %v2651_v2 = vmul.f32 0.01, %v2609_v1 }
 0x7e3   : > { %v2667_v33 = vsel %vm2635_vm11, %v2609_v1, %v2651_v2 }
 0x7e4   : > { %v2678_v34 = vpack.c.bf16 %v2667_v33, %v2666_v5  ;;  %v5173_v5 = vld [vmem:[%s5448_s6] ss:$0 sm:$0xff] }
 0x7e6   : > { %v2611_v37 = vpop.f32.mrf.mxu1  ;;  %3493 = vmatmul.msk.bf16.gmra.mxu2 %vm540_vm3, %v2678_v34 }
 0x7e7   : > { %v2612_v44 = vadd.f32 %v5144_v39, %v2611_v37 }
 0x7e9   : > { %v2652_v32 = vmul.f32 0.01, %v2612_v44  ;;  %vm2636_vm12 = vcmp.gt.f32.partialorder %v2612_v44, 0.0 }
 0x7eb   : > { %v2668_v52 = vsel %vm2636_vm12, %v2612_v44, %v2652_v32 }
 0x7ee   : > { %v2613_v58 = vpop.f32.mrf.mxu1 }
 0x7ef   : > { %v2614_v62 = vadd.f32 %v5144_v39, %v2613_v58 }
 0x7f1   : > { %vm2637_vm13 = vcmp.gt.f32.partialorder %v2614_v62, 0.0  ;;  %v2653_v51 = vmul.f32 0.01, %v2614_v62 }
 0x7f3   : > { %v2669_v8 = vsel %vm2637_vm13, %v2614_v62, %v2653_v51 }
 0x7f4   : > { %v2679_v4 = vpack.c.bf16 %v2669_v8, %v2668_v52 }
 0x7f6   : > { %v2616_v19 = vpop.f32.mrf.mxu1  ;;  %3494 = vmatmul.msk.bf16.gmra.mxu2 %vm540_vm3, %v2679_v4 }
 0x7f7   : > { %v2617_v22 = vadd.f32 %v5144_v39, %v2616_v19 }
 0x7f9   : > { %v2654_v7 = vmul.f32 0.01, %v2617_v22  ;;  %vm2638_vm14 = vcmp.gt.f32.partialorder %v2617_v22, 0.0 }
 0x7fb   : > { %v2670_v27 = vsel %vm2638_vm14, %v2617_v22, %v2654_v7 }
 0x7fe   : > { %v2618_v29 = vpop.f32.mrf.mxu1 }
 0x7ff   : > { %v2619_v9 = vadd.f32 %v5144_v39, %v2618_v29 }
 0x801   : > { %vm2639_vm15 = vcmp.gt.f32.partialorder %v2619_v9, 0.0  ;;  %v2655_v40 = vmul.f32 0.01, %v2619_v9 }
 0x803   : > { %v2671_v41 = vsel %vm2639_vm15, %v2619_v9, %v2655_v40 }
 0x804   : > { %v2680_v49 = vpack.c.bf16 %v2671_v41, %v2670_v27 }
 0x806   : > { %v2621_v43 = vpop.f32.mrf.mxu1  ;;  %3495 = vmatmul.msk.bf16.gmra.mxu2 %vm540_vm3, %v2680_v49 }
 0x807   : > { %v2622_v28 = vadd.f32 %v5144_v39, %v2621_v43 }
 0x809   : > { %v2656_v63 = vmul.f32 0.01, %v2622_v28  ;;  %vm2640_vm1 = vcmp.gt.f32.partialorder %v2622_v28, 0.0 }
 0x80b   : > { %v2672_v20 = vsel %vm2640_vm1, %v2622_v28, %v2656_v63 }
 0x80e   : > { %v2623_v24 = vpop.f32.mrf.mxu1 }
 0x80f   : > { %v2624_v48 = vadd.f32 %v5144_v39, %v2623_v24 }
 0x811   : > { %vm2641_vm2 = vcmp.gt.f32.partialorder %v2624_v48, 0.0  ;;  %v2657_v46 = vmul.f32 0.01, %v2624_v48 }
 0x813   : > { %v2673_v1 = vsel %vm2641_vm2, %v2624_v48, %v2657_v46 }
 0x814   : > { %v2681_v2 = vpack.c.bf16 %v2673_v1, %v2672_v20 }
 0x816   : > { %3496 = vmatmul.msk.bf16.gmra.mxu2 %vm540_vm3, %v2681_v2  ;;  %vm3095_vm3 = vcmask 138240  }
 0x821   : > { %v2751_v33 = vpop.f32.mrf.mxu2 }
 0x822   : > { %v2752_v34 = vadd.f32 %v5173_v5, %v2751_v33 }
 0x824   : > { %2823 = vrot.lane.b32.xlu0 %v2752_v34, %s3824_s17  ;;  %3750 = vtanh.f32 %v2752_v34 }
 0x829   : > { %v2753_v37 = vpop.f32.mrf.mxu2 }
 0x82a   : > { %v2754_v39 = vadd.f32 %v5173_v5, %v2753_v37  ;;  %v3751_v51 = vpop.eup %3750 }
 0x82b   : > { %v2983_v52 = vmul.f32 %v3751_v51, %v4406_v30 }
 0x82c   : > { %2825 = vrot.lane.b32.xlu1 %v2754_v39, %s3824_s17  ;;  %3752 = vtanh.f32 %v2754_v39 }
 0x82d   : > { %v2999_v4 = vadd.f32 %v2983_v52, %v4794_v31 }
 0x82f   : > { %v3015_v22 = vsel %vm372_vm0, %v2999_v4, 0.0 }
 0x831   : > { %v2756_v44 = vpop.f32.mrf.mxu2 }
 0x832   : > { %v2757_v58 = vadd.f32 %v5173_v5, %v2756_v44  ;;  %v5184_v8 = vpop.eup %3752 }
 0x833   : > { %v2984_v19 = vmul.f32 %v5184_v8, %v4406_v30 }
 0x834   : > { %2827 = vrot.lane.b32.xlu2 %v2757_v58, %s3824_s17 }
 0x835   : > { %v3000_v29 = vadd.f32 %v2984_v19, %v4801_v3 }
 0x837   : > { %v3018_v40 = vsel %vm372_vm0, %v3000_v29, 0.0  ;;  %v2903_v29 = vsub.f32 0.0, %v3751_v51 }
 0x839   : > { %v2758_v32 = vpop.f32.mrf.mxu2 }
 0x83a   : > { %v2759_v62 = vadd.f32 %v5173_v5, %v2758_v32 }
 0x83c   : > { %2829 = vrot.lane.b32.xlu0 %v2759_v62, %s3824_s17  ;;  %3754 = vtanh.f32 %v2759_v62 }
 0x83d   : > { %3756 = vtanh.f32 %v2757_v58 }
 0x842   : > { %v5191_v7 = vpop.eup %3754 }
 0x843   : > { %v5193_v9 = vpop.eup %3756  ;;  %v2986_v27 = vmul.f32 %v5191_v7, %v4406_v30  ;;  %v2906_v51 = vsub.f32 0.0, %v5191_v7 }
 0x844   : > { %v2985_v31 = vmul.f32 %v5193_v9, %v4406_v30 }
 0x845   : > { %v3002_v41 = vadd.f32 %v2986_v27, %v4821_v15  ;;  %v2904_v27 = vsub.f32 0.0, %v5184_v8 }
 0x846   : > { %v3001_v43 = vadd.f32 %v2985_v31, %v4812_v6 }
 0x847   : > { %v3024_v3 = vsel %vm372_vm0, %v3002_v41, 0.0 }
 0x848   : > { %v3021_v28 = vsel %vm372_vm0, %v3001_v43, 0.0 }
 0x849   : > { %v2761_v49 = vpop.f32.mrf.mxu2 }
 0x84a   : > { %v2762_v63 = vadd.f32 %v5173_v5, %v2761_v49  ;;  %v2921_v49 = vmul.f32 1.442695, %v2904_v27 }
 0x84c   : > { %3758 = vtanh.f32 %v2762_v63 }
 0x851   : > { %v2763_v24 = vpop.f32.mrf.mxu2 }
 0x852   : > { %v2764_v15 = vadd.f32 %v5173_v5, %v2763_v24  ;;  %v5210_v6 = vpop.eup %3758 }
 0x853   : > { %v2987_v20 = vmul.f32 %v5210_v6, %v4406_v30 }
 0x855   : > { %v3003_v1 = vadd.f32 %v2987_v20, %v4830_v36 }
 0x856   : > { %3016 = vadd.xlane.f32.xlu1 %v3015_v22 }
 0x857   : > { %v3027_v33 = vsel %vm372_vm0, %v3003_v1, 0.0 }
 0x859   : > { %v2766_v48 = vpop.f32.mrf.mxu2 }
 0x85a   : > { %v2767_v46 = vadd.f32 %v5173_v5, %v2766_v48  ;;  %v5243_v48 = vld [vmem:[%s5442_s0] ss:$0 sm:$0xff] }
 0x85c   : > { %3760 = vtanh.f32 %v2767_v46 }
 0x85d   : > { %3019 = vadd.xlane.f32.xlu2 %v3018_v40  ;;  %3762 = vtanh.f32 %v2764_v15 }
 0x861   : > { %v2768_v44 = vpop.f32.mrf.mxu2 }
 0x862   : > { %v5215_v2 = vpop.eup %3760  ;;  %v2769_v4 = vadd.f32 %v5173_v5, %v2768_v44 }
 0x863   : > { %v5218_v34 = vpop.eup %3762  ;;  %v2989_v37 = vmul.f32 %v5215_v2, %v4406_v30 }
 0x864   : > { %v2988_v39 = vmul.f32 %v5218_v34, %v4406_v30 }
 0x865   : > { %3025 = vadd.xlane.f32.xlu2 %v3024_v3  ;;  %v3005_v58 = vadd.f32 %v2989_v37, %v4848_v23  ;;  %v2919_v23 = vmul.f32 1.442695, %v2903_v29 }
 0x866   : > { %3022 = vadd.xlane.f32.xlu0 %v3021_v28  ;;  %v3004_v32 = vadd.f32 %v2988_v39, %v4839_v38 }
 0x867   : > { %v3033_v36 = vsel %vm372_vm0, %v3005_v58, 0.0  ;;  %3764 = vpow2.f32 %v2919_v23 }
 0x868   : > { %v3030_v62 = vsel %vm372_vm0, %v3004_v32, 0.0  ;;  %3766 = vpow2.f32 %v2921_v49 }
 0x869   : > { %v2771_v52 = vpop.f32.mrf.mxu2  ;;  %3768 = vtanh.f32 %v2769_v4 }
 0x86a   : > { %v2772_v38 = vadd.f32 %v5173_v5, %v2771_v52 }
 0x86d   : > { %v3765_v3 = vpop.eup %3764 }
 0x86f   : > { %2831 = vrot.lane.b32.xlu1 %v2762_v63, %s3824_s17  ;;  %v2905_v63 = vsub.f32 0.0, %v5193_v9  ;;  %v3767_v9 = vpop.eup %3766 }
 0x870   : > { %v5262_v52 = vpop.eup %3768 }
 0x871   : > { %v2773_v19 = vpop.f32.mrf.mxu2  ;;  %v2923_v39 = vmul.f32 1.442695, %v2905_v63 }
 0x872   : > { %v2774_v22 = vadd.f32 %v5173_v5, %v2773_v19 }
 0x87a   : > { %2835 = vrot.lane.b32.xlu0 %v2767_v46, %s3824_s17  ;;  %v2352_v46 = vmul.f32 %v5243_v48, %v4955_v16 }
 0x87d   : > { %2833 = vrot.lane.b32.xlu2 %v2764_v15, %s3824_s17  ;;  %v2925_v15 = vmul.f32 1.442695, %v2906_v51  ;;  %v2355_v51 = vmul.f32 %v5243_v48, %v4982_v11 }
 0x87f   : > { %3770 = vpow2.f32 %v2925_v15 }
 0x880   : > { %3772 = vpow2.f32 %v2923_v39 }
 0x881   : > { %3774 = vtanh.f32 %v2774_v22 }
 0x882   : > { %3776 = vtanh.f32 %v2772_v38 }
 0x88e   : > { %v2828_v8 = vpop.permute.xlu2 %2827 }
 0x896   : > { %v2824_v40 = vpop.permute.xlu0 %2823 }
 0x897   : > { %v2871_v31 = vsub.f32 %v4955_v16, %v2824_v40 }
 0x899   : > { %3028 = vadd.xlane.f32.xlu1 %v3027_v33  ;;  %v2887_v43 = vmul.f32 %v2871_v31, %v4406_v30  ;;  %v2990_v31 = vmul.f32 %v5262_v52, %v4406_v30 }
 0x89b   : > { %v2951_v24 = vmul.f32 %v3765_v3, %v2887_v43 }
 0x89d   : > { %v2967_v1 = vadd.f32 %v2951_v24, %v2352_v46  ;;  %v2354_v24 = vmul.f32 %v5243_v48, %v4984_v0 }
 0x89e   : > { %v2826_v41 = vpop.permute.xlu1 %2825 }
 0x89f   : > { %v2872_v28 = vsub.f32 %v4957_v45, %v2826_v41  ;;  %v3771_v41 = vpop.eup %3770 }
 0x8a0   : > { %v3773_v43 = vpop.eup %3772 }
 0x8a1   : > { %v2888_v20 = vmul.f32 %v2872_v28, %v4406_v30  ;;  %v3006_v28 = vadd.f32 %v2990_v31, %v4857_v25 }
 0x8a3   : > { %v2952_v44 = vmul.f32 %v3767_v9, %v2888_v20  ;;  %v3036_v25 = vsel %vm372_vm0, %v3006_v28, 0.0  ;;  %v2356_v28 = vmul.f32 %v5243_v48, %v5004_v17 }
 0x8a4   : > { %3034 = vadd.xlane.f32.xlu0 %v3033_v36  ;;  %v2873_v36 = vsub.f32 %v4984_v0, %v2828_v8 }
 0x8a6   : > { %3031 = vadd.xlane.f32.xlu2 %v3030_v62  ;;  %v2353_v62 = vmul.f32 %v5243_v48, %v4957_v45  ;;  %v2889_v40 = vmul.f32 %v2873_v36, %v4406_v30 }
 0x8a8   : > { %v2968_v19 = vadd.f32 %v2952_v44, %v2353_v62  ;;  %v2953_v3 = vmul.f32 %v3773_v43, %v2889_v40 }
 0x8aa   : > { %v2969_v20 = vadd.f32 %v2953_v3, %v2354_v24 }
 0x8ae   : > { %v2830_v33 = vpop.permute.xlu0 %2829 }
 0x8af   : > { %v2874_v58 = vsub.f32 %v4982_v11, %v2830_v33 }
 0x8b1   : > { %v2890_v29 = vmul.f32 %v2874_v58, %v4406_v30 }
 0x8b2   : > { %2837 = vrot.lane.b32.xlu1 %v2769_v4, %s3824_s17 }
 0x8b3   : > { %v2954_v45 = vmul.f32 %v3771_v41, %v2890_v29  ;;  %v2908_v41 = vsub.f32 0.0, %v5218_v34 }
 0x8b5   : > { %v2970_v8 = vadd.f32 %v2954_v45, %v2355_v51 }
 0x8b8   : > { %2841 = vrot.lane.b32.xlu0 %v2774_v22, %s3824_s17  ;;  %v5271_v22 = vpop.eup %3774 }
 0x8be   : > { %2839 = vrot.lane.b32.xlu2 %v2772_v38, %s3824_s17  ;;  %v2992_v38 = vmul.f32 %v5271_v22, %v4406_v30 }
 0x8c0   : > { %v3008_v9 = vadd.f32 %v2992_v38, %v4875_v61  ;;  %v2907_v61 = vsub.f32 0.0, %v5210_v6  ;;  %v2929_v6 = vmul.f32 1.442695, %v2908_v41 }
 0x8c2   : > { %v3042_v44 = vsel %vm372_vm0, %v3008_v9, 0.0 }
 0x8c9   : > { %v3017_v7 = vpop.xlane.xlu1 %3016 }
 0x8ca   : > { %v3063_v37 = vsub.f32 0.0, %v3017_v7 }
 0x8cc   : > { %v3079_v16 = vsel %vm372_vm0, %v2967_v1, %v3063_v37  ;;  %v5280_v1 = vpop.eup %3776  ;;  %v2776_v37 = vpop.f32.mrf.mxu2 }
 0x8cd   : > { %v3096_v32 = vsel %vm3095_vm3, %v3079_v16, 0.0  ;;  %v2991_v16 = vmul.f32 %v5280_v1, %v4406_v30 }
 0x8ce   : > { %3112 = vst [vmem:[%s5253_s13] sm:$0xff] %v3096_v32 }
 0x8cf   : > { %v3007_v58 = vadd.f32 %v2991_v16, %v4866_v56 }
 0x8d0   : > { %v3020_v4 = vpop.xlane.xlu2 %3019 }
 0x8d1   : > { %v3064_v23 = vsub.f32 0.0, %v3020_v4  ;;  %v3039_v32 = vsel %vm372_vm0, %v3007_v58, 0.0  ;;  %v2777_v4 = vadd.f32 %v5173_v5, %v2776_v37  ;;  %v2358_v37 = vmul.f32 %v5243_v48, %v5021_v13 }
 0x8d3   : > { %v3080_v27 = vsel %vm372_vm0, %v2968_v19, %v3064_v23  ;;  %v2927_v23 = vmul.f32 1.442695, %v2907_v61 }
 0x8d4   : > { %v3097_v49 = vsel %vm3095_vm3, %v3080_v27, 0.0  ;;  %v2778_v36 = vpop.f32.mrf.mxu2  ;;  %v2909_v27 = vsub.f32 0.0, %v5215_v2 }
 0x8d5   : > { %3113 = vst [vmem:[%s5253_s13 + $0x8] sm:$0xff] %v3097_v49  ;;  %v2779_v29 = vadd.f32 %v5173_v5, %v2778_v36  ;;  %3778 = vpow2.f32 %v2927_v23 }
 0x8d6   : > { %v2931_v43 = vmul.f32 1.442695, %v2909_v27 }
 0x8d8   : > { %v3026_v63 = vpop.xlane.xlu2 %3025  ;;  %3780 = vpow2.f32 %v2931_v43 }
 0x8d9   : > { %v3066_v46 = vsub.f32 0.0, %v3026_v63  ;;  %v3023_v15 = vpop.xlane.xlu0 %3022  ;;  %3782 = vtanh.f32 %v2777_v4 }
 0x8da   : > { %v3065_v7 = vsub.f32 0.0, %v3023_v15 }
 0x8db   : > { %v3082_v11 = vsel %vm372_vm0, %v2970_v8, %v3066_v46  ;;  %v3779_v49 = vpop.eup %3778 }
 0x8dc   : > { %v3099_v33 = vsel %vm3095_vm3, %v3082_v11, 0.0  ;;  %v3081_v0 = vsel %vm372_vm0, %v2969_v20, %v3065_v7  ;;  %3037 = vadd.xlane.f32.xlu1 %v3036_v25  ;;  %v2781_v62 = vpop.f32.mrf.mxu2 }
 0x8dd   : > { %3115 = vst [vmem:[%s5253_s13 + $0x18] sm:$0xff] %v3099_v33  ;;  %v3098_v39 = vsel %vm3095_vm3, %v3081_v0, 0.0  ;;  %v2782_v19 = vadd.f32 %v5173_v5, %v2781_v62 }
 0x8de   : > { %3114 = vst [vmem:[%s5253_s13 + $0x10] sm:$0xff] %v3098_v39  ;;  %v3781_v20 = vpop.eup %3780 }
 0x8df   : > { %3784 = vtanh.f32 %v2782_v19  ;;  %v5315_v7 = vpop.eup %3782 }
 0x8e0   : > { %v2834_v51 = vpop.permute.xlu2 %2833  ;;  %3786 = vpow2.f32 %v2929_v6  ;;  %v2993_v39 = vmul.f32 %v5315_v7, %v4406_v30  ;;  %v2910_v6 = vsub.f32 0.0, %v5262_v52 }
 0x8e1   : > { %v2832_v40 = vpop.permute.xlu1 %2831  ;;  %v2876_v34 = vsub.f32 %v5006_v42, %v2834_v51  ;;  %3788 = vtanh.f32 %v2779_v29 }
 0x8e2   : > { %3043 = vadd.xlane.f32.xlu0 %v3042_v44  ;;  %v2875_v56 = vsub.f32 %v5004_v17, %v2832_v40  ;;  %v2357_v44 = vmul.f32 %v5243_v48, %v5006_v42 }
 0x8e3   : > { %v2892_v17 = vmul.f32 %v2876_v34, %v4406_v30 }
 0x8e4   : > { %v2891_v31 = vmul.f32 %v2875_v56, %v4406_v30  ;;  %v2783_v61 = vpop.f32.mrf.mxu2 }
 0x8e5   : > { %v5317_v11 = vpop.eup %3784 }
 0x8e6   : > { %v2955_v45 = vmul.f32 %v3779_v49, %v2891_v31  ;;  %v3787_v33 = vpop.eup %3786  ;;  %v2995_v16 = vmul.f32 %v5317_v11, %v4406_v30 }
 0x8e7   : > { %3040 = vadd.xlane.f32.xlu2 %v3039_v32  ;;  %v2956_v0 = vmul.f32 %v3787_v33, %v2892_v17  ;;  %v5331_v40 = vpop.eup %3788 }
 0x8e8   : > { %v2971_v2 = vadd.f32 %v2955_v45, %v2356_v28  ;;  %v3011_v23 = vadd.f32 %v2995_v16, %v4913_v54 }
 0x8e9   : > { %v2972_v62 = vadd.f32 %v2956_v0, %v2357_v44 }
 0x8ea   : > { %v3051_v31 = vsel %vm372_vm0, %v3011_v23, 0.0  ;;  %v2360_v23 = vmul.f32 %v5243_v48, %v5040_v57 }
 0x8ec   : > { %v2836_v3 = vpop.permute.xlu0 %2835  ;;  %v2786_v54 = vpop.f32.mrf.mxu2 }
 0x8ed   : > { %v2877_v24 = vsub.f32 %v5021_v13, %v2836_v3  ;;  %v3009_v13 = vadd.f32 %v2993_v39, %v4887_v35  ;;  %v2994_v35 = vmul.f32 %v5331_v40, %v4406_v30  ;;  %v2784_v3 = vadd.f32 %v5173_v5, %v2783_v61 }
 0x8ee   : > { %v2787_v51 = vadd.f32 %v5173_v5, %v2786_v54 }
 0x8ef   : > { %v2893_v15 = vmul.f32 %v2877_v24, %v4406_v30  ;;  %v3045_v27 = vsel %vm372_vm0, %v3009_v13, 0.0  ;;  %v3010_v41 = vadd.f32 %v2994_v35, %v4899_v60  ;;  %v2933_v60 = vmul.f32 1.442695, %v2910_v6 }
 0x8f0   : > { %v2912_v24 = vsub.f32 0.0, %v5271_v22  ;;  %v2359_v22 = vmul.f32 %v5243_v48, %v5023_v18 }
 0x8f1   : > { %v2957_v25 = vmul.f32 %v3781_v20, %v2893_v15  ;;  %v3048_v49 = vsel %vm372_vm0, %v3010_v41, 0.0  ;;  %3790 = vpow2.f32 %v2933_v60  ;;  %v2915_v60 = vsub.f32 0.0, %v5317_v11 }
 0x8f3   : > { %v2973_v58 = vadd.f32 %v2957_v25, %v2358_v37 }
 0x8f4   : > { %v2788_v43 = vpop.f32.mrf.mxu2 }
 0x8f5   : > { %2843 = vrot.lane.b32.xlu1 %v2777_v4, %s3824_s17  ;;  %v2789_v45 = vadd.f32 %v5173_v5, %v2788_v43 }
 0x8f6   : > { %2847 = vrot.lane.b32.xlu0 %v2782_v19, %s3824_s17 }
 0x8f7   : > { %v3791_v52 = vpop.eup %3790 }
 0x8ff   : > { %2845 = vrot.lane.b32.xlu2 %v2779_v29, %s3824_s17 }
 0x90c   : > { %v3029_v63 = vpop.xlane.xlu1 %3028 }
 0x90d   : > { %v3067_v8 = vsub.f32 0.0, %v3029_v63 }
 0x90f   : > { %v3083_v46 = vsel %vm372_vm0, %v2971_v2, %v3067_v8  ;;  %v2911_v2 = vsub.f32 0.0, %v5280_v1  ;;  %v2937_v8 = vmul.f32 1.442695, %v2912_v24  ;;  %v2943_v24 = vmul.f32 1.442695, %v2915_v60 }
 0x910   : > { %v3100_v38 = vsel %vm3095_vm3, %v3083_v46, 0.0 }
 0x911   : > { %3116 = vst [vmem:[%s5253_s13 + $0x20] sm:$0xff] %v3100_v38  ;;  %v2935_v38 = vmul.f32 1.442695, %v2911_v2  ;;  %3792 = vpow2.f32 %v2937_v8 }
 0x912   : > { %3794 = vtanh.f32 %v2789_v45 }
 0x913   : > { %3796 = vpow2.f32 %v2935_v38 }
 0x914   : > { %3798 = vtanh.f32 %v2784_v3 }
 0x915   : > { %3800 = vtanh.f32 %v2787_v51 }
 0x917   : > { %v3035_v9 = vpop.xlane.xlu0 %3034  ;;  %v3793_v37 = vpop.eup %3792 }
 0x918   : > { %v3069_v32 = vsub.f32 0.0, %v3035_v9  ;;  %v5359_v39 = vpop.eup %3794 }
 0x919   : > { %v3032_v36 = vpop.xlane.xlu2 %3031 }
 0x91a   : > { %v3085_v4 = vsel %vm372_vm0, %v2973_v58, %v3069_v32  ;;  %v3068_v19 = vsub.f32 0.0, %v3032_v36  ;;  %v3797_v32 = vpop.eup %3796 }
 0x91b   : > { %v3102_v29 = vsel %vm3095_vm3, %v3085_v4, 0.0  ;;  %v5369_v4 = vpop.eup %3798 }
 0x91c   : > { %3118 = vst [vmem:[%s5253_s13 + $0x30] sm:$0xff] %v3102_v29  ;;  %v3084_v56 = vsel %vm372_vm0, %v2972_v62, %v3068_v19  ;;  %v2998_v62 = vmul.f32 %v5359_v39, %v4406_v30  ;;  %v5379_v41 = vpop.eup %3800 }
 0x91d   : > { %v3101_v42 = vsel %vm3095_vm3, %v3084_v56, 0.0 }
 0x91e   : > { %3117 = vst [vmem:[%s5253_s13 + $0x28] sm:$0xff] %v3101_v42  ;;  %v3014_v56 = vadd.f32 %v2998_v62, %v4974_v21  ;;  %v2996_v42 = vmul.f32 %v5369_v4, %v4406_v30  ;;  %v2997_v21 = vmul.f32 %v5379_v41, %v4406_v30 }
 0x91f   : > { %3046 = vadd.xlane.f32.xlu1 %v3045_v27 }
 0x920   : > { %3052 = vadd.xlane.f32.xlu0 %v3051_v31  ;;  %v3012_v43 = vadd.f32 %v2996_v42, %v4930_v47 }
 0x921   : > { %v2840_v5 = vpop.permute.xlu2 %2839 }
 0x922   : > { %v2879_v1 = vsub.f32 %v5040_v57, %v2840_v5 }
 0x924   : > { %v2838_v28 = vpop.permute.xlu1 %2837  ;;  %v2895_v44 = vmul.f32 %v2879_v1, %v4406_v30 }
 0x925   : > { %v2878_v63 = vsub.f32 %v5023_v18, %v2838_v28  ;;  %v2361_v18 = vmul.f32 %v5243_v48, %v5043_v14 }
 0x926   : > { %v2959_v61 = vmul.f32 %v3797_v32, %v2895_v44  ;;  %v2363_v32 = vmul.f32 %v5243_v48, %v5063_v53 }
 0x927   : > { %v2894_v46 = vmul.f32 %v2878_v63, %v4406_v30 }
 0x928   : > { %3049 = vadd.xlane.f32.xlu2 %v3048_v49  ;;  %v2975_v31 = vadd.f32 %v2959_v61, %v2360_v23  ;;  %v3060_v49 = vsel %vm372_vm0, %v3014_v56, 0.0  ;;  %v2916_v23 = vsub.f32 0.0, %v5369_v4 }
 0x929   : > { %v2958_v20 = vmul.f32 %v3791_v52, %v2894_v46 }
 0x92a   : > { %v2842_v34 = vpop.permute.xlu0 %2841 }
 0x92b   : > { %v2880_v15 = vsub.f32 %v5043_v14, %v2842_v34  ;;  %v2974_v33 = vadd.f32 %v2958_v20, %v2359_v22  ;;  %v2914_v34 = vsub.f32 0.0, %v5331_v40  ;;  %v2362_v22 = vmul.f32 %v5243_v48, %v5061_v55 }
 0x92c   : > { %v2364_v40 = vmul.f32 %v5243_v48, %v5078_v12 }
 0x92d   : > { %v2896_v17 = vmul.f32 %v2880_v15, %v4406_v30  ;;  %v2941_v15 = vmul.f32 1.442695, %v2914_v34 }
 0x92f   : > { %v2960_v9 = vmul.f32 %v3793_v37, %v2896_v17 }
 0x931   : > { %v2976_v19 = vadd.f32 %v2960_v9, %v2361_v18 }
 0x934   : > { %2853 = vrot.lane.b32.xlu0 %v2789_v45, %s3824_s17  ;;  %v3054_v45 = vsel %vm372_vm0, %v3012_v43, 0.0 }
 0x938   : > { %2849 = vrot.lane.b32.xlu1 %v2784_v3, %s3824_s17  ;;  %v3013_v3 = vadd.f32 %v2997_v21, %v4959_v10  ;;  %v2367_v21 = vmul.f32 %v5243_v48, %v5095_v59 }
 0x93a   : > { %v3057_v6 = vsel %vm372_vm0, %v3013_v3, 0.0 }
 0x940   : > { %2851 = vrot.lane.b32.xlu2 %v2787_v51, %s3824_s17  ;;  %v2913_v51 = vsub.f32 0.0, %v5315_v7 }
 0x942   : > { %v2939_v47 = vmul.f32 1.442695, %v2913_v51 }
 0x944   : > { %3802 = vpow2.f32 %v2939_v47  ;;  %v2365_v47 = vmul.f32 %v5243_v48, %v5080_v50 }
 0x945   : > { %3804 = vpow2.f32 %v2943_v24 }
 0x946   : > { %3806 = vpow2.f32 %v2941_v15 }
 0x94a   : > { %v3803_v52 = vpop.eup %3802 }
 0x94b   : > { %v3805_v11 = vpop.eup %3804 }
 0x94f   : > { %v3038_v25 = vpop.xlane.xlu1 %3037 }
 0x950   : > { %v3070_v0 = vsub.f32 0.0, %v3038_v25 }
 0x952   : > { %v3086_v16 = vsel %vm372_vm0, %v2974_v33, %v3070_v0 }
 0x953   : > { %v3103_v58 = vsel %vm3095_vm3, %v3086_v16, 0.0 }
 0x954   : > { %3119 = vst [vmem:[%s5253_s13 + $0x38] sm:$0xff] %v3103_v58 }
 0x955   : > { %v3044_v36 = vpop.xlane.xlu0 %3043 }
 0x956   : > { %v3072_v13 = vsub.f32 0.0, %v3044_v36 }
 0x958   : > { %v3088_v29 = vsel %vm372_vm0, %v2976_v19, %v3072_v13 }
 0x959   : > { %v3105_v14 = vsel %vm3095_vm3, %v3088_v29, 0.0  ;;  %v2918_v29 = vsub.f32 0.0, %v5359_v39 }
 0x95a   : > { %3121 = vst [vmem:[%s5253_s13 + $0x48] sm:$0xff] %v3105_v14  ;;  %v3041_v27 = vpop.xlane.xlu2 %3040 }
 0x95b   : > { %v3071_v35 = vsub.f32 0.0, %v3041_v27  ;;  %v2949_v14 = vmul.f32 1.442695, %v2918_v29  ;;  %v2945_v27 = vmul.f32 1.442695, %v2916_v23 }
 0x95d   : > { %v3087_v54 = vsel %vm372_vm0, %v2975_v31, %v3071_v35  ;;  %3808 = vpow2.f32 %v2949_v14 }
 0x95e   : > { %v3104_v57 = vsel %vm3095_vm3, %v3087_v54, 0.0  ;;  %3061 = vadd.xlane.f32.xlu0 %v3060_v49  ;;  %3810 = vpow2.f32 %v2945_v27 }
 0x95f   : > { %3120 = vst [vmem:[%s5253_s13 + $0x40] sm:$0xff] %v3104_v57 }
 0x962   : > { %3055 = vadd.xlane.f32.xlu1 %v3054_v45  ;;  %v2846_v7 = vpop.permute.xlu2 %2845 }
 0x963   : > { %v2882_v5 = vsub.f32 %v5063_v53, %v2846_v7  ;;  %v2917_v53 = vsub.f32 0.0, %v5379_v41 }
 0x965   : > { %v2898_v0 = vmul.f32 %v2882_v5, %v4406_v30  ;;  %v2947_v43 = vmul.f32 1.442695, %v2917_v53 }
 0x967   : > { %v2844_v28 = vpop.permute.xlu1 %2843  ;;  %3812 = vpow2.f32 %v2947_v43 }
 0x968   : > { %v2848_v63 = vpop.permute.xlu0 %2847  ;;  %v2881_v2 = vsub.f32 %v5061_v55, %v2844_v28  ;;  %v3807_v55 = vpop.eup %3806 }
 0x969   : > { %3058 = vadd.xlane.f32.xlu2 %v3057_v6  ;;  %v2883_v8 = vsub.f32 %v5078_v12, %v2848_v63  ;;  %v2962_v12 = vmul.f32 %v3807_v55, %v2898_v0  ;;  %v3809_v49 = vpop.eup %3808 }
 0x96a   : > { %v2897_v10 = vmul.f32 %v2881_v2, %v4406_v30  ;;  %v3811_v45 = vpop.eup %3810 }
 0x96b   : > { %v2899_v46 = vmul.f32 %v2883_v8, %v4406_v30  ;;  %v2978_v62 = vadd.f32 %v2962_v12, %v2363_v32 }
 0x96c   : > { %v2961_v38 = vmul.f32 %v3803_v52, %v2897_v10 }
 0x96d   : > { %v2963_v20 = vmul.f32 %v3805_v11, %v2899_v46  ;;  %v3813_v34 = vpop.eup %3812 }
 0x96e   : > { %v2977_v1 = vadd.f32 %v2961_v38, %v2362_v22 }
 0x96f   : > { %v2979_v37 = vadd.f32 %v2963_v20, %v2364_v40 }
 0x992   : > { %v3047_v17 = vpop.xlane.xlu1 %3046 }
 0x993   : > { %v3073_v25 = vsub.f32 0.0, %v3047_v17  ;;  %v3053_v33 = vpop.xlane.xlu0 %3052 }
 0x994   : > { %v3075_v9 = vsub.f32 0.0, %v3053_v33 }
 0x995   : > { %v3089_v16 = vsel %vm372_vm0, %v2977_v1, %v3073_v25 }
 0x996   : > { %v3106_v44 = vsel %vm3095_vm3, %v3089_v16, 0.0  ;;  %v3091_v58 = vsel %vm372_vm0, %v2979_v37, %v3075_v9 }
 0x997   : > { %3122 = vst [vmem:[%s5253_s13 + $0x50] sm:$0xff] %v3106_v44  ;;  %v3108_v18 = vsel %vm3095_vm3, %v3091_v58, 0.0 }
 0x998   : > { %3124 = vst [vmem:[%s5253_s13 + $0x60] sm:$0xff] %v3108_v18 }
 0x99b   : > { %v3050_v36 = vpop.xlane.xlu2 %3049 }
 0x99c   : > { %v3074_v19 = vsub.f32 0.0, %v3050_v36 }
 0x99e   : > { %v3090_v13 = vsel %vm372_vm0, %v2978_v62, %v3074_v19 }
 0x99f   : > { %v3107_v61 = vsel %vm3095_vm3, %v3090_v13, 0.0 }
 0x9a0   : > { %3123 = vst [vmem:[%s5253_s13 + $0x58] sm:$0xff] %v3107_v61 }
 0x9a3   : > { %v2852_v57 = vpop.permute.xlu2 %2851 }
 0x9a4   : > { %v2885_v3 = vsub.f32 %v5093_v26, %v2852_v57 }
 0x9a6   : > { %v2854_v56 = vpop.permute.xlu0 %2853  ;;  %v2901_v24 = vmul.f32 %v2885_v3, %v4406_v30 }
 0x9a7   : > { %v2886_v42 = vsub.f32 %v5095_v59, %v2854_v56 }
 0x9a8   : > { %v2965_v46 = vmul.f32 %v3813_v34, %v2901_v24 }
 0x9a9   : > { %v2902_v35 = vmul.f32 %v2886_v42, %v4406_v30 }
 0x9aa   : > { %v2850_v31 = vpop.permute.xlu1 %2849 }
 0x9ab   : > { %v2884_v54 = vsub.f32 %v5080_v50, %v2850_v31  ;;  %v2966_v39 = vmul.f32 %v3809_v49, %v2902_v35  ;;  %v2366_v50 = vmul.f32 %v5243_v48, %v5093_v26 }
 0x9ad   : > { %v2900_v4 = vmul.f32 %v2884_v54, %v4406_v30  ;;  %v2982_v41 = vadd.f32 %v2966_v39, %v2367_v21  ;;  %v2981_v52 = vadd.f32 %v2965_v46, %v2366_v50 }
 0x9af   : > { %v2964_v51 = vmul.f32 %v3811_v45, %v2900_v4 }
 0x9b1   : > { %v2980_v2 = vadd.f32 %v2964_v51, %v2365_v47 }
 0x9d1   : > { %v3062_v6 = vpop.xlane.xlu0 %3061 }
 0x9d2   : > { %v3078_v60 = vsub.f32 0.0, %v3062_v6 }
 0x9d4   : > { %v3094_v28 = vsel %vm372_vm0, %v2982_v41, %v3078_v60 }
 0x9d5   : > { %v3111_v63 = vsel %vm3095_vm3, %v3094_v28, 0.0  ;;  %v3056_v59 = vpop.xlane.xlu1 %3055 }
 0x9d6   : > { %3127 = vst [vmem:[%s5253_s13 + $0x78] sm:$0xff] %v3111_v63  ;;  %v3076_v8 = vsub.f32 0.0, %v3056_v59 }
 0x9d8   : > { %v3092_v10 = vsel %vm372_vm0, %v2980_v2, %v3076_v8 }
 0x9d9   : > { %v3109_v15 = vsel %vm3095_vm3, %v3092_v10, 0.0 }
 0x9da   : > { %3125 = vst [vmem:[%s5253_s13 + $0x68] sm:$0xff] %v3109_v15 }
 0x9dc   : > { %v3059_v7 = vpop.xlane.xlu2 %3058 }
 0x9dd   : > { %v3077_v30 = vsub.f32 0.0, %v3059_v7 }
 0x9df   : > { %v3093_v11 = vsel %vm372_vm0, %v2981_v52, %v3077_v30 }
 0x9e0   : > { %v3110_v38 = vsel %vm3095_vm3, %v3093_v11, 0.0 }
 0x9e1   : > { %3126 = vst [vmem:[%s5253_s13 + $0x70] sm:$0xff] %v3110_v38 }
 0x9e2 PF: > { %s18_s27 = sadd.s32 1, %s3822_s27  }
 0x9e3   : > { %p15_p4 = scmp.ge.s32.totalorder %s18_s27, 4  }
 0x9e5   :  { %17 = sbr.rel (!%p15_p4) target bundleno = 1 (0x1), region = 101 }

</bundles_post_ra>
